<compile_context>
chip_gen: v6e
topology: v6e:2x2x1
jax: 0.10.0
libtpu: 0.0.40
codegen_flags: <defaults>
</compile_context>

<pallas_src>
import functools
import math

import jax
import jax.numpy as jnp
from jax.experimental import pallas as pl
from jax.experimental.pallas import tpu as pltpu


# ------------------------------------------------------------------ kernel

def _branch_kernel(
    x_ref, pos_ref,
    fc_w_ref, fc_b_ref, fcp_w_ref, fcp_b_ref, cls_tok_ref,
    ln1_g_ref, ln1_b_ref, wqkv_ref, bqkv_ref, wo_ref, bo_ref,
    ln2_g_ref, ln2_b_ref, w1_ref, b1_ref, w2_ref, b2_ref,
    cls_w_ref, cls_b_ref,
    pred_ref, attn_ref, xs_ref,
    *, num_heads, att_pad,
):
    """Grid = (branch, transformer_block).  One step = one block of one branch."""
    blk = pl.program_id(1)
    n_blk = pl.num_programs(1)

    B, C, F = x_ref.shape[1:]
    S = C + 1
    E = wqkv_ref.shape[2]
    H = num_heads
    hd = E // H
    HS = H * S
    eps = 1e-5
    bf16 = jnp.bfloat16
    f32 = jnp.float32

    def ln(z, g, b):
        # one-pass statistics: E[x], E[x^2]
        mu = jnp.mean(z, axis=-1, keepdims=True)
        var = jnp.mean(z * z, axis=-1, keepdims=True) - mu * mu
        return (z - mu) * jax.lax.rsqrt(var + eps) * g + b

    def mm(a, w, bias):
        # bf16 MXU matmul, f32 accumulation, f32 bias add.
        return jnp.dot(a.astype(bf16), w, preferred_element_type=f32) + bias

    # ---- token embedding + positional encoding + cls token (first block only) ----
    @pl.when(blk == 0)
    def _embed():
        xe = mm(x_ref[0].reshape(B * C, F), fc_w_ref[0], fc_b_ref[0])      # (B*C, E)
        pe = mm(pos_ref[...], fcp_w_ref[0], fcp_b_ref[0])                  # (S, E)
        tok = xe.reshape(B, C, E) + pe[1:, :][None, :, :]                  # (B, C, E)
        cls = cls_tok_ref[0] + pe[0:1, :]                                  # (1, E), f32 exact
        xs_ref[:, 0:1, :] = jnp.broadcast_to(cls[None, :, :], (B, 1, E))
        xs_ref[:, 1:, :] = tok

    xs = xs_ref[...].reshape(B * S, E)                                      # (B*S, E), f32

    # constant head-selection mask: hmask[h, e] = 1 iff feature e belongs to head h
    lane = jax.lax.broadcasted_iota(jnp.int32, (H, E), 1)
    head_start = jax.lax.broadcasted_iota(jnp.int32, (H, E), 0) * hd
    hmask = ((lane >= head_start) & (lane < head_start + hd)).astype(bf16)  # (H, E)

    # ---- multi-head self-attention (pre-norm), fused QKV, mask-expanded heads ----
    xn = ln(xs, ln1_g_ref[0, 0], ln1_b_ref[0, 0])
    qkv = mm(xn, wqkv_ref[0, 0], bqkv_ref[0, 0])                            # (B*S, 3E)
    q = qkv[:, :E].reshape(B, S, E).astype(bf16)
    k = qkv[:, E:2 * E].reshape(B, S, E).astype(bf16)
    v = qkv[:, 2 * E:].reshape(B, S, E).astype(bf16)

    # head-expanded K/V: [b, h*S + kk, e] = K/V[b, kk, e] * 1{e in head h}
    kexp = (k[:, None, :, :] * hmask[None, :, None, :]).reshape(B, HS, E)
    vexp = (v[:, None, :, :] * hmask[None, :, None, :]).reshape(B, HS, E)

    # scores for all heads in one batched matmul (1/sqrt(hd) pre-folded into Wq).
    s = jnp.einsum("bqe,bke->bqk", q, kexp,
                   preferred_element_type=f32)                              # (B, S, H*S)
    s4 = s.reshape(B, S, H, S)
    s4 = s4 - jnp.max(s4, axis=-1, keepdims=True)
    e4 = jnp.exp(s4)
    p4 = e4 / jnp.sum(e4, axis=-1, keepdims=True)        # exact softmax (returned output)
    p = p4.reshape(B, S, HS)

    # PV: emits the merged-head (B, S, E) layout directly (no transpose/concat needed).
    o = jnp.einsum("bqk,bke->bqe", p.astype(bf16), vexp,
                   preferred_element_type=f32)                              # (B, S, E)
    xs = xs + mm(o.reshape(B * S, E), wo_ref[0, 0], bo_ref[0, 0])

    # ---- MLP (pre-norm) ----
    xn2 = ln(xs, ln2_g_ref[0, 0], ln2_b_ref[0, 0])
    h1 = jax.nn.gelu(mm(xn2, w1_ref[0, 0], b1_ref[0, 0]), approximate=True)
    xs = xs + mm(h1, w2_ref[0, 0], b2_ref[0, 0])

    xs_ref[...] = xs.reshape(B, S, E)                     # carry across the NB grid axis

    # ---- last block: emit attention maps (lane-dense), mean pool, classify ----
    @pl.when(blk == n_blk - 1)
    def _finalize():
        if att_pad > HS:
            attn_out = jnp.concatenate(
                [p, jnp.zeros((B, S, att_pad - HS), f32)], axis=-1)
        else:
            attn_out = p
        attn_ref[0] = attn_out                                              # single store
        pooled = jnp.mean(xs.reshape(B, S, E), axis=1)                      # (B, E)
        pred_ref[0] = mm(pooled, cls_w_ref[0], cls_b_ref[0])                # (B, NC)


# ------------------------------------------------------------------ specs / wrapper

def _per_branch_spec(arr):
    zeros = (0,) * (arr.ndim - 1)
    return pl.BlockSpec((1,) + tuple(arr.shape[1:]),
                        lambda br, blk, _z=zeros: (br,) + _z)


def _per_block_spec(arr):
    zeros = (0,) * (arr.ndim - 2)
    return pl.BlockSpec((1, 1) + tuple(arr.shape[2:]),
                        lambda br, blk, _z=zeros: (br, blk) + _z)


def _shared_spec(arr):
    zeros = (0,) * arr.ndim
    return pl.BlockSpec(tuple(arr.shape), lambda br, blk, _z=zeros: _z)


def forward(params, x_real, x_imag, x_abs, *, num_heads):
    B, C, F = x_real.shape
    S = C + 1
    H = num_heads
    NB = params["wqkv"].shape[1]
    E = params["wqkv"].shape[2]
    NC = params["cls_w"].shape[-1]
    HS = H * S
    ATT_PAD = ((HS + 127) // 128) * 128          # lane-dense attention output width
    assert E % H == 0

    x = jnp.stack([x_real, x_imag, x_abs], axis=0)                       # (3, B, C, F)

    inputs = (
        x, params["pos_embed"],
        params["fc_w"], params["fc_b"], params["fcp_w"], params["fcp_b"],
        params["cls_token"],
        params["ln1_g"], params["ln1_b"], params["wqkv"], params["bqkv"],
        params["wo"], params["bo"], params["ln2_g"], params["ln2_b"],
        params["w1"], params["b1"], params["w2"], params["b2"],
        params["cls_w"], params["cls_b"],
    )
    in_specs = [
        _per_branch_spec(x), _shared_spec(params["pos_embed"]),
        _per_branch_spec(params["fc_w"]), _per_branch_spec(params["fc_b"]),
        _per_branch_spec(params["fcp_w"]), _per_branch_spec(params["fcp_b"]),
        _per_branch_spec(params["cls_token"]),
    ] + [
        _per_block_spec(params[name])
        for name in ("ln1_g", "ln1_b", "wqkv", "bqkv", "wo", "bo",
                     "ln2_g", "ln2_b", "w1", "b1", "w2", "b2")
    ] + [
        _per_branch_spec(params["cls_w"]), _per_branch_spec(params["cls_b"]),
    ]

    preds, attn_pad = pl.pallas_call(
        functools.partial(_branch_kernel, num_heads=H, att_pad=ATT_PAD),
        grid=(3, NB),
        in_specs=in_specs,
        out_specs=[
            pl.BlockSpec((1, B, NC), lambda br, blk: (br, 0, 0)),
            pl.BlockSpec((1, B, S, ATT_PAD), lambda br, blk: (br, 0, 0, 0)),
        ],
        out_shape=[
            jax.ShapeDtypeStruct((3, B, NC), jnp.float32),
            jax.ShapeDtypeStruct((3, B, S, ATT_PAD), jnp.float32),
        ],
        scratch_shapes=[pltpu.VMEM((B, S, E), jnp.float32)],
        compiler_params=pltpu.CompilerParams(
            dimension_semantics=("parallel", "arbitrary"),
            vmem_limit_bytes=64 * 1024 * 1024,
        ),
    )(*inputs)

    # tiny combine (weighted sum of branch logits + softmax) -> plain XLA in the wrapper
    w = params["cls_weight"]                                            # (3,)
    pred = preds[0] * w[0] + preds[1] * w[1] + preds[2] * w[2]
    out = jax.nn.softmax(pred, axis=-1)

    attn = attn_pad[..., :HS].reshape(3, B, S, H, S)
    attn = jnp.transpose(attn, (0, 1, 3, 2, 4))                         # (3, B, H, S, S)
    return out, attn[0], attn[1], attn[2]


# ------------------------------------------------------------------ params

def init_params(key, *, num_heads, fft_dim, embed_dim, mlp_ratio, n_chans,
                num_blocks, num_classes, pe_dim):
    assert embed_dim % num_heads == 0
    E, F, P = embed_dim, fft_dim, pe_dim
    Dm = int(embed_dim * mlp_ratio)
    NB = num_blocks
    hd = E // num_heads
    bf16 = jnp.bfloat16

    def linear(k, fan_in, fan_out):
        kw, kb = jax.random.split(k)
        bound = 1.0 / math.sqrt(fan_in)
        w = jax.random.uniform(kw, (fan_in, fan_out), jnp.float32, -bound, bound)
        b = jax.random.uniform(kb, (fan_out,), jnp.float32, -bound, bound)
        return w, b

    def stacked_linear(k, n, fan_in, fan_out):
        ws, bs = zip(*[linear(kk, fan_in, fan_out) for kk in jax.random.split(k, n)])
        return jnp.stack(ws), jnp.stack(bs).reshape(n, 1, fan_out)

    def blk_linear(k, fan_in, fan_out):
        w, b = stacked_linear(k, 3 * NB, fan_in, fan_out)
        return w.reshape(3, NB, fan_in, fan_out), b.reshape(3, NB, 1, fan_out)

    keys = jax.random.split(key, 10)
    fc_w, fc_b = stacked_linear(keys[0], 3, F, E)
    fcp_w, fcp_b = stacked_linear(keys[1], 3, P, E)
    cls_w, cls_b = stacked_linear(keys[2], 3, E, num_classes)
    wq, bq = blk_linear(keys[3], E, E)
    wk, bk = blk_linear(keys[4], E, E)
    wv, bv = blk_linear(keys[5], E, E)
    wo, bo = blk_linear(keys[6], E, E)
    w1, b1 = blk_linear(keys[7], E, Dm)
    w2, b2 = blk_linear(keys[8], Dm, E)

    # fold the 1/sqrt(head_dim) attention scale into the Q projection
    scale = 1.0 / math.sqrt(hd)
    wq = wq * scale
    bq = bq * scale

    ones = jnp.ones((3, NB, 1, E), jnp.float32)
    zeros = jnp.zeros((3, NB, 1, E), jnp.float32)

    return dict(
        # fixed (non-trainable) positional encoding, deterministic
        pos_embed=jax.random.normal(keys[9], (n_chans + 1, P), jnp.float32),
        fc_w=fc_w.astype(bf16), fc_b=fc_b,
        fcp_w=fcp_w.astype(bf16), fcp_b=fcp_b,
        cls_token=jnp.zeros((3, 1, E), jnp.float32),
        ln1_g=ones, ln1_b=zeros,
        wqkv=jnp.concatenate([wq, wk, wv], axis=-1).astype(bf16),   # (3, NB, E, 3E)
        bqkv=jnp.concatenate([bq, bk, bv], axis=-1),                # (3, NB, 1, 3E)
        wo=wo.astype(bf16), bo=bo,
        ln2_g=ones, ln2_b=zeros,
        w1=w1.astype(bf16), b1=b1,
        w2=w2.astype(bf16), b2=b2,
        cls_w=cls_w.astype(bf16), cls_b=cls_b,
        cls_weight=jnp.full((3,), 0.3333, jnp.float32),
    )


# ------------------------------------------------------------------- driver

if __name__ == "__main__":
    batch = 2
    n_chans = 4
    fft_dim = 16
    embed_dim = 32
    num_heads = 4
    mlp_ratio = 2
    num_blocks = 2
    num_classes = 3
    pe_dim = 16          # position_encoding.shape[1]

    key = jax.random.PRNGKey(0)
    kp, kr, ki, ka = jax.random.split(key, 4)

    params = init_params(
        kp, num_heads=num_heads, fft_dim=fft_dim, embed_dim=embed_dim,
        mlp_ratio=mlp_ratio, n_chans=n_chans, num_blocks=num_blocks,
        num_classes=num_classes, pe_dim=pe_dim,
    )

    x_real = jax.random.normal(kr, (batch, n_chans, fft_dim), jnp.float32)
    x_imag = jax.random.normal(ki, (batch, n_chans, fft_dim), jnp.float32)
    x_abs = jax.random.normal(ka, (batch, n_chans, fft_dim), jnp.float32)

    fwd = jax.jit(functools.partial(forward, num_heads=num_heads))
    out, attn_r, attn_i, attn_a = fwd(params, x_real, x_imag, x_abs)
    jax.block_until_ready((out, attn_r, attn_i, attn_a))

    assert out.shape == (batch, num_classes)
    assert attn_r.shape == (batch, num_heads, n_chans + 1, n_chans + 1)
    assert attn_i.shape == attn_r.shape and attn_a.shape == attn_r.shape
    print("KERNEL_OK")
</pallas_src>

<mosaic_0001>
module attributes {stable_mosaic.version = 11 : i64} {
  func.func @_branch_kernel(%arg0: i32, %arg1: i32, %arg2: memref<1x2x4x16xf32, #tpu.memory_space<vmem>>, %arg3: memref<5x16xf32, #tpu.memory_space<vmem>>, %arg4: memref<1x16x32xbf16, #tpu.memory_space<vmem>>, %arg5: memref<1x1x32xf32, #tpu.memory_space<vmem>>, %arg6: memref<1x16x32xbf16, #tpu.memory_space<vmem>>, %arg7: memref<1x1x32xf32, #tpu.memory_space<vmem>>, %arg8: memref<1x1x32xf32, #tpu.memory_space<vmem>>, %arg9: memref<1x1x1x32xf32, #tpu.memory_space<vmem>>, %arg10: memref<1x1x1x32xf32, #tpu.memory_space<vmem>>, %arg11: memref<1x1x32x96xbf16, #tpu.memory_space<vmem>>, %arg12: memref<1x1x1x96xf32, #tpu.memory_space<vmem>>, %arg13: memref<1x1x32x32xbf16, #tpu.memory_space<vmem>>, %arg14: memref<1x1x1x32xf32, #tpu.memory_space<vmem>>, %arg15: memref<1x1x1x32xf32, #tpu.memory_space<vmem>>, %arg16: memref<1x1x1x32xf32, #tpu.memory_space<vmem>>, %arg17: memref<1x1x32x64xbf16, #tpu.memory_space<vmem>>, %arg18: memref<1x1x1x64xf32, #tpu.memory_space<vmem>>, %arg19: memref<1x1x64x32xbf16, #tpu.memory_space<vmem>>, %arg20: memref<1x1x1x32xf32, #tpu.memory_space<vmem>>, %arg21: memref<1x32x3xbf16, #tpu.memory_space<vmem>>, %arg22: memref<1x1x3xf32, #tpu.memory_space<vmem>>, %arg23: memref<1x2x3xf32, #tpu.memory_space<vmem>>, %arg24: memref<1x2x5x128xf32, #tpu.memory_space<vmem>>, %arg25: memref<2x5x32xf32, #tpu.memory_space<vmem>>) attributes {dimension_semantics = [#tpu.dimension_semantics<parallel>, #tpu.dimension_semantics<arbitrary>], iteration_bounds = array<i64: 3, 2>, scalar_prefetch = 0 : i64, scratch_operands = 1 : i64, tpu.core_type = #tpu.core_type<tc>, window_params = [{transform_indices = @transform_0, window_bounds = array<i64: 1, 2, 4, 16>}, {pipeline_mode = #tpu.pipeline_mode<synchronous>, transform_indices = @transform_1, window_bounds = array<i64: 5, 16>}, {transform_indices = @transform_2, window_bounds = array<i64: 1, 16, 32>}, {transform_indices = @transform_3, window_bounds = array<i64: 1, 1, 32>}, {transform_indices = @transform_4, window_bounds = array<i64: 1, 16, 32>}, {transform_indices = @transform_5, window_bounds = array<i64: 1, 1, 32>}, {transform_indices = @transform_6, window_bounds = array<i64: 1, 1, 32>}, {transform_indices = @transform_7, window_bounds = array<i64: 1, 1, 1, 32>}, {transform_indices = @transform_8, window_bounds = array<i64: 1, 1, 1, 32>}, {transform_indices = @transform_9, window_bounds = array<i64: 1, 1, 32, 96>}, {transform_indices = @transform_10, window_bounds = array<i64: 1, 1, 1, 96>}, {transform_indices = @transform_11, window_bounds = array<i64: 1, 1, 32, 32>}, {transform_indices = @transform_12, window_bounds = array<i64: 1, 1, 1, 32>}, {transform_indices = @transform_13, window_bounds = array<i64: 1, 1, 1, 32>}, {transform_indices = @transform_14, window_bounds = array<i64: 1, 1, 1, 32>}, {transform_indices = @transform_15, window_bounds = array<i64: 1, 1, 32, 64>}, {transform_indices = @transform_16, window_bounds = array<i64: 1, 1, 1, 64>}, {transform_indices = @transform_17, window_bounds = array<i64: 1, 1, 64, 32>}, {transform_indices = @transform_18, window_bounds = array<i64: 1, 1, 1, 32>}, {transform_indices = @transform_19, window_bounds = array<i64: 1, 32, 3>}, {transform_indices = @transform_20, window_bounds = array<i64: 1, 1, 3>}, {transform_indices = @transform_21, window_bounds = array<i64: 1, 2, 3>}, {transform_indices = @transform_22, window_bounds = array<i64: 1, 2, 5, 128>}]} {
    %c0_i32 = arith.constant 0 : i32
    %0 = arith.cmpi eq, %arg1, %c0_i32 : i32
    %1 = arith.extui %0 : i1 to i32
    %c0_i32_0 = arith.constant 0 : i32
    %2 = arith.cmpi ne, %1, %c0_i32_0 : i32
    scf.if %2 {
      %c0_77 = arith.constant 0 : index
      %c0_78 = arith.constant 0 : index
      %c0_79 = arith.constant 0 : index
      %c0_80 = arith.constant 0 : index
      %157 = vector.load %arg2[%c0_77, %c0_78, %c0_79, %c0_80] : memref<1x2x4x16xf32, #tpu.memory_space<vmem>>, vector<1x2x4x16xf32>
      %158 = vector.shape_cast %157 : vector<1x2x4x16xf32> to vector<2x4x16xf32>
      %159 = vector.shape_cast %158 : vector<2x4x16xf32> to vector<8x16xf32>
      %c0_81 = arith.constant 0 : index
      %c0_82 = arith.constant 0 : index
      %c0_83 = arith.constant 0 : index
      %160 = vector.load %arg4[%c0_81, %c0_82, %c0_83] : memref<1x16x32xbf16, #tpu.memory_space<vmem>>, vector<1x16x32xbf16>
      %161 = vector.shape_cast %160 : vector<1x16x32xbf16> to vector<16x32xbf16>
      %c0_84 = arith.constant 0 : index
      %c0_85 = arith.constant 0 : index
      %c0_86 = arith.constant 0 : index
      %162 = vector.load %arg5[%c0_84, %c0_85, %c0_86] : memref<1x1x32xf32, #tpu.memory_space<vmem>>, vector<1x1x32xf32>
      %163 = vector.shape_cast %162 : vector<1x1x32xf32> to vector<1x32xf32>
      %164 = arith.truncf %159 : vector<8x16xf32> to vector<8x16xbf16>
      %cst_87 = arith.constant dense<0.000000e+00> : vector<8x32xf32>
      %165 = tpu.matmul %164, %161, %cst_87 {dimension_numbers = #tpu.dot_dimension_numbers<[1], [0], [0], [1], [0, 0, 1, 1], [], []>} : vector<8x16xbf16>, vector<16x32xbf16>, vector<8x32xf32> -> vector<8x32xf32>
      %166 = vector.broadcast %163 : vector<1x32xf32> to vector<8x32xf32>
      %167 = arith.addf %165, %166 : vector<8x32xf32>
      %c0_88 = arith.constant 0 : index
      %c0_89 = arith.constant 0 : index
      %168 = vector.load %arg3[%c0_88, %c0_89] : memref<5x16xf32, #tpu.memory_space<vmem>>, vector<5x16xf32>
      %c0_90 = arith.constant 0 : index
      %c0_91 = arith.constant 0 : index
      %c0_92 = arith.constant 0 : index
      %169 = vector.load %arg6[%c0_90, %c0_91, %c0_92] : memref<1x16x32xbf16, #tpu.memory_space<vmem>>, vector<1x16x32xbf16>
      %170 = vector.shape_cast %169 : vector<1x16x32xbf16> to vector<16x32xbf16>
      %c0_93 = arith.constant 0 : index
      %c0_94 = arith.constant 0 : index
      %c0_95 = arith.constant 0 : index
      %171 = vector.load %arg7[%c0_93, %c0_94, %c0_95] : memref<1x1x32xf32, #tpu.memory_space<vmem>>, vector<1x1x32xf32>
      %172 = vector.shape_cast %171 : vector<1x1x32xf32> to vector<1x32xf32>
      %173 = arith.truncf %168 : vector<5x16xf32> to vector<5x16xbf16>
      %cst_96 = arith.constant dense<0.000000e+00> : vector<5x32xf32>
      %174 = tpu.matmul %173, %170, %cst_96 {dimension_numbers = #tpu.dot_dimension_numbers<[1], [0], [0], [1], [0, 0, 1, 1], [], []>} : vector<5x16xbf16>, vector<16x32xbf16>, vector<5x32xf32> -> vector<5x32xf32>
      %175 = vector.broadcast %172 : vector<1x32xf32> to vector<5x32xf32>
      %176 = arith.addf %174, %175 : vector<5x32xf32>
      %177 = vector.shape_cast %167 : vector<8x32xf32> to vector<2x4x32xf32>
      %178 = vector.extract_strided_slice %176 {offsets = [1, 0], sizes = [4, 32], strides = [1, 1]} : vector<5x32xf32> to vector<4x32xf32>
      %179 = vector.shape_cast %178 : vector<4x32xf32> to vector<1x4x32xf32>
      %180 = vector.broadcast %179 : vector<1x4x32xf32> to vector<2x4x32xf32>
      %181 = arith.addf %177, %180 : vector<2x4x32xf32>
      %c0_97 = arith.constant 0 : index
      %c0_98 = arith.constant 0 : index
      %c0_99 = arith.constant 0 : index
      %182 = vector.load %arg8[%c0_97, %c0_98, %c0_99] : memref<1x1x32xf32, #tpu.memory_space<vmem>>, vector<1x1x32xf32>
      %183 = vector.shape_cast %182 : vector<1x1x32xf32> to vector<1x32xf32>
      %184 = vector.extract_strided_slice %176 {offsets = [0, 0], sizes = [1, 32], strides = [1, 1]} : vector<5x32xf32> to vector<1x32xf32>
      %185 = arith.addf %183, %184 : vector<1x32xf32>
      %186 = vector.shape_cast %185 : vector<1x32xf32> to vector<1x1x32xf32>
      %187 = vector.shape_cast %186 : vector<1x1x32xf32> to vector<1x1x32xf32>
      %188 = vector.broadcast %187 : vector<1x1x32xf32> to vector<2x1x32xf32>
      %c0_100 = arith.constant 0 : index
      %c0_101 = arith.constant 0 : index
      %c0_102 = arith.constant 0 : index
      %189 = vector.load %arg25[%c0_100, %c0_101, %c0_102] : memref<2x5x32xf32, #tpu.memory_space<vmem>>, vector<2x1x32xf32>
      tpu.vector_store %arg25[%c0_100, %c0_101, %c0_102], %188 {strides = array<i32>} : memref<2x5x32xf32, #tpu.memory_space<vmem>>, vector<2x1x32xf32>,
      %c0_103 = arith.constant 0 : index
      %c1 = arith.constant 1 : index
      %c0_104 = arith.constant 0 : index
      %190 = vector.load %arg25[%c0_103, %c1, %c0_104] : memref<2x5x32xf32, #tpu.memory_space<vmem>>, vector<2x4x32xf32>
      tpu.vector_store %arg25[%c0_103, %c1, %c0_104], %181 {strides = array<i32>} : memref<2x5x32xf32, #tpu.memory_space<vmem>>, vector<2x4x32xf32>,
    } else {
    }
    %c0 = arith.constant 0 : index
    %c0_1 = arith.constant 0 : index
    %c0_2 = arith.constant 0 : index
    %3 = vector.load %arg25[%c0, %c0_1, %c0_2] : memref<2x5x32xf32, #tpu.memory_space<vmem>>, vector<2x5x32xf32>
    %4 = vector.shape_cast %3 : vector<2x5x32xf32> to vector<10x32xf32>
    %5 = tpu.iota {dimensions = array<i32: 1>} : vector<4x32xi32>
    %6 = tpu.iota {dimensions = array<i32: 0>} : vector<4x32xi32>
    %c8_i32 = arith.constant 8 : i32
    %7 = vector.broadcast %c8_i32 : i32 to vector<4x32xi32>
    %8 = arith.muli %6, %7 : vector<4x32xi32>
    %9 = arith.cmpi sge, %5, %8 : vector<4x32xi32>
    %c8_i32_3 = arith.constant 8 : i32
    %10 = vector.broadcast %c8_i32_3 : i32 to vector<4x32xi32>
    %11 = arith.addi %8, %10 : vector<4x32xi32>
    %12 = arith.cmpi slt, %5, %11 : vector<4x32xi32>
    %13 = arith.andi %9, %12 : vector<4x32xi1>
    %14 = arith.extui %13 : vector<4x32xi1> to vector<4x32xi32>
    %15 = arith.sitofp %14 : vector<4x32xi32> to vector<4x32xf32>
    %16 = arith.truncf %15 : vector<4x32xf32> to vector<4x32xbf16>
    %c0_4 = arith.constant 0 : index
    %c0_5 = arith.constant 0 : index
    %c0_6 = arith.constant 0 : index
    %c0_7 = arith.constant 0 : index
    %17 = vector.load %arg9[%c0_4, %c0_5, %c0_6, %c0_7] : memref<1x1x1x32xf32, #tpu.memory_space<vmem>>, vector<1x1x1x32xf32>
    %18 = vector.shape_cast %17 : vector<1x1x1x32xf32> to vector<1x32xf32>
    %c0_8 = arith.constant 0 : index
    %c0_9 = arith.constant 0 : index
    %c0_10 = arith.constant 0 : index
    %c0_11 = arith.constant 0 : index
    %19 = vector.load %arg10[%c0_8, %c0_9, %c0_10, %c0_11] : memref<1x1x1x32xf32, #tpu.memory_space<vmem>>, vector<1x1x1x32xf32>
    %20 = vector.shape_cast %19 : vector<1x1x1x32xf32> to vector<1x32xf32>
    %cst = arith.constant dense<0.000000e+00> : vector<10xf32>
    %21 = vector.multi_reduction <add>, %4, %cst [1] : vector<10x32xf32> to vector<10xf32>
    %22 = vector.shape_cast %21 : vector<10xf32> to vector<10x1xf32>
    %cst_12 = arith.constant 3.200000e+01 : f32
    %23 = vector.broadcast %cst_12 : f32 to vector<10x1xf32>
    %24 = arith.divf %22, %23 : vector<10x1xf32>
    %25 = arith.mulf %4, %4 : vector<10x32xf32>
    %cst_13 = arith.constant dense<0.000000e+00> : vector<10xf32>
    %26 = vector.multi_reduction <add>, %25, %cst_13 [1] : vector<10x32xf32> to vector<10xf32>
    %27 = vector.shape_cast %26 : vector<10xf32> to vector<10x1xf32>
    %cst_14 = arith.constant 3.200000e+01 : f32
    %28 = vector.broadcast %cst_14 : f32 to vector<10x1xf32>
    %29 = arith.divf %27, %28 : vector<10x1xf32>
    %30 = arith.mulf %24, %24 : vector<10x1xf32>
    %31 = arith.subf %29, %30 : vector<10x1xf32>
    %32 = vector.broadcast %24 : vector<10x1xf32> to vector<10x32xf32>
    %33 = arith.subf %4, %32 : vector<10x32xf32>
    %cst_15 = arith.constant 9.99999974E-6 : f32
    %34 = vector.broadcast %cst_15 : f32 to vector<10x1xf32>
    %35 = arith.addf %31, %34 : vector<10x1xf32>
    %36 = math.rsqrt %35 : vector<10x1xf32>
    %37 = vector.broadcast %36 : vector<10x1xf32> to vector<10x32xf32>
    %38 = arith.mulf %33, %37 : vector<10x32xf32>
    %39 = vector.broadcast %18 : vector<1x32xf32> to vector<10x32xf32>
    %40 = arith.mulf %38, %39 : vector<10x32xf32>
    %41 = vector.broadcast %20 : vector<1x32xf32> to vector<10x32xf32>
    %42 = arith.addf %40, %41 : vector<10x32xf32>
    %c0_16 = arith.constant 0 : index
    %c0_17 = arith.constant 0 : index
    %c0_18 = arith.constant 0 : index
    %c0_19 = arith.constant 0 : index
    %43 = vector.load %arg11[%c0_16, %c0_17, %c0_18, %c0_19] : memref<1x1x32x96xbf16, #tpu.memory_space<vmem>>, vector<1x1x32x96xbf16>
    %44 = vector.shape_cast %43 : vector<1x1x32x96xbf16> to vector<32x96xbf16>
    %c0_20 = arith.constant 0 : index
    %c0_21 = arith.constant 0 : index
    %c0_22 = arith.constant 0 : index
    %c0_23 = arith.constant 0 : index
    %45 = vector.load %arg12[%c0_20, %c0_21, %c0_22, %c0_23] : memref<1x1x1x96xf32, #tpu.memory_space<vmem>>, vector<1x1x1x96xf32>
    %46 = vector.shape_cast %45 : vector<1x1x1x96xf32> to vector<1x96xf32>
    %47 = arith.truncf %42 : vector<10x32xf32> to vector<10x32xbf16>
    %cst_24 = arith.constant dense<0.000000e+00> : vector<10x96xf32>
    %48 = tpu.matmul %47, %44, %cst_24 {dimension_numbers = #tpu.dot_dimension_numbers<[1], [0], [0], [1], [0, 0, 1, 1], [], []>} : vector<10x32xbf16>, vector<32x96xbf16>, vector<10x96xf32> -> vector<10x96xf32>
    %49 = vector.broadcast %46 : vector<1x96xf32> to vector<10x96xf32>
    %50 = arith.addf %48, %49 : vector<10x96xf32>
    %51 = vector.extract_strided_slice %50 {offsets = [0, 0], sizes = [10, 32], strides = [1, 1]} : vector<10x96xf32> to vector<10x32xf32>
    %52 = vector.shape_cast %51 : vector<10x32xf32> to vector<2x5x32xf32>
    %53 = arith.truncf %52 : vector<2x5x32xf32> to vector<2x5x32xbf16>
    %54 = vector.extract_strided_slice %50 {offsets = [0, 32], sizes = [10, 32], strides = [1, 1]} : vector<10x96xf32> to vector<10x32xf32>
    %55 = vector.shape_cast %54 : vector<10x32xf32> to vector<2x5x32xf32>
    %56 = arith.truncf %55 : vector<2x5x32xf32> to vector<2x5x32xbf16>
    %57 = vector.extract_strided_slice %50 {offsets = [0, 64], sizes = [10, 32], strides = [1, 1]} : vector<10x96xf32> to vector<10x32xf32>
    %58 = vector.shape_cast %57 : vector<10x32xf32> to vector<2x5x32xf32>
    %59 = arith.truncf %58 : vector<2x5x32xf32> to vector<2x5x32xbf16>
    %60 = vector.shape_cast %56 : vector<2x5x32xbf16> to vector<2x1x5x32xbf16>
    %61 = vector.shape_cast %16 : vector<4x32xbf16> to vector<1x4x1x32xbf16>
    %62 = vector.broadcast %60 : vector<2x1x5x32xbf16> to vector<2x4x5x32xbf16>
    %63 = vector.broadcast %61 : vector<1x4x1x32xbf16> to vector<2x4x5x32xbf16>
    %64 = arith.mulf %62, %63 : vector<2x4x5x32xbf16>
    %65 = vector.shape_cast %64 : vector<2x4x5x32xbf16> to vector<2x20x32xbf16>
    %66 = vector.shape_cast %59 : vector<2x5x32xbf16> to vector<2x1x5x32xbf16>
    %67 = vector.shape_cast %16 : vector<4x32xbf16> to vector<1x4x1x32xbf16>
    %68 = vector.broadcast %66 : vector<2x1x5x32xbf16> to vector<2x4x5x32xbf16>
    %69 = vector.broadcast %67 : vector<1x4x1x32xbf16> to vector<2x4x5x32xbf16>
    %70 = arith.mulf %68, %69 : vector<2x4x5x32xbf16>
    %71 = vector.shape_cast %70 : vector<2x4x5x32xbf16> to vector<2x20x32xbf16>
    "tpu.trace_start"() <{level = 10 : i32, message = "bqe,bke->bqk"}> : () -> ()
    %cst_25 = arith.constant dense<0.000000e+00> : vector<2x5x20xf32>
    %72 = tpu.matmul %53, %65, %cst_25 {dimension_numbers = #tpu.dot_dimension_numbers<[2], [2], [1], [1], [0, 0, 0, 1, 1, 1], [0], [0]>} : vector<2x5x32xbf16>, vector<2x20x32xbf16>, vector<2x5x20xf32> -> vector<2x5x20xf32>
    "tpu.trace_stop"() : () -> ()
    %73 = vector.shape_cast %72 : vector<2x5x20xf32> to vector<2x5x4x5xf32>
    %cst_26 = arith.constant dense<0xFF800000> : vector<2x5x4xf32>
    %74 = vector.multi_reduction <maximumf>, %73, %cst_26 [3] : vector<2x5x4x5xf32> to vector<2x5x4xf32>
    %75 = vector.shape_cast %74 : vector<2x5x4xf32> to vector<2x5x4x1xf32>
    %76 = vector.broadcast %75 : vector<2x5x4x1xf32> to vector<2x5x4x5xf32>
    %77 = arith.subf %73, %76 : vector<2x5x4x5xf32>
    %78 = math.exp %77 : vector<2x5x4x5xf32>
    %cst_27 = arith.constant dense<0.000000e+00> : vector<2x5x4xf32>
    %79 = vector.multi_reduction <add>, %78, %cst_27 [3] : vector<2x5x4x5xf32> to vector<2x5x4xf32>
    %80 = vector.shape_cast %79 : vector<2x5x4xf32> to vector<2x5x4x1xf32>
    %81 = vector.broadcast %80 : vector<2x5x4x1xf32> to vector<2x5x4x5xf32>
    %82 = arith.divf %78, %81 : vector<2x5x4x5xf32>
    %83 = vector.shape_cast %82 : vector<2x5x4x5xf32> to vector<2x5x20xf32>
    %84 = arith.truncf %83 : vector<2x5x20xf32> to vector<2x5x20xbf16>
    "tpu.trace_start"() <{level = 10 : i32, message = "bqk,bke->bqe"}> : () -> ()
    %cst_28 = arith.constant dense<0.000000e+00> : vector<2x5x32xf32>
    %85 = tpu.matmul %84, %71, %cst_28 {dimension_numbers = #tpu.dot_dimension_numbers<[2], [1], [1], [2], [0, 0, 0, 1, 1, 2], [0], [0]>} : vector<2x5x20xbf16>, vector<2x20x32xbf16>, vector<2x5x32xf32> -> vector<2x5x32xf32>
    "tpu.trace_stop"() : () -> ()
    %86 = vector.shape_cast %85 : vector<2x5x32xf32> to vector<10x32xf32>
    %c0_29 = arith.constant 0 : index
    %c0_30 = arith.constant 0 : index
    %c0_31 = arith.constant 0 : index
    %c0_32 = arith.constant 0 : index
    %87 = vector.load %arg13[%c0_29, %c0_30, %c0_31, %c0_32] : memref<1x1x32x32xbf16, #tpu.memory_space<vmem>>, vector<1x1x32x32xbf16>
    %88 = vector.shape_cast %87 : vector<1x1x32x32xbf16> to vector<32x32xbf16>
    %c0_33 = arith.constant 0 : index
    %c0_34 = arith.constant 0 : index
    %c0_35 = arith.constant 0 : index
    %c0_36 = arith.constant 0 : index
    %89 = vector.load %arg14[%c0_33, %c0_34, %c0_35, %c0_36] : memref<1x1x1x32xf32, #tpu.memory_space<vmem>>, vector<1x1x1x32xf32>
    %90 = vector.shape_cast %89 : vector<1x1x1x32xf32> to vector<1x32xf32>
    %91 = arith.truncf %86 : vector<10x32xf32> to vector<10x32xbf16>
    %cst_37 = arith.constant dense<0.000000e+00> : vector<10x32xf32>
    %92 = tpu.matmul %91, %88, %cst_37 {dimension_numbers = #tpu.dot_dimension_numbers<[1], [0], [0], [1], [0, 0, 1, 1], [], []>} : vector<10x32xbf16>, vector<32x32xbf16>, vector<10x32xf32> -> vector<10x32xf32>
    %93 = vector.broadcast %90 : vector<1x32xf32> to vector<10x32xf32>
    %94 = arith.addf %92, %93 : vector<10x32xf32>
    %95 = arith.addf %4, %94 : vector<10x32xf32>
    %c0_38 = arith.constant 0 : index
    %c0_39 = arith.constant 0 : index
    %c0_40 = arith.constant 0 : index
    %c0_41 = arith.constant 0 : index
    %96 = vector.load %arg15[%c0_38, %c0_39, %c0_40, %c0_41] : memref<1x1x1x32xf32, #tpu.memory_space<vmem>>, vector<1x1x1x32xf32>
    %97 = vector.shape_cast %96 : vector<1x1x1x32xf32> to vector<1x32xf32>
    %c0_42 = arith.constant 0 : index
    %c0_43 = arith.constant 0 : index
    %c0_44 = arith.constant 0 : index
    %c0_45 = arith.constant 0 : index
    %98 = vector.load %arg16[%c0_42, %c0_43, %c0_44, %c0_45] : memref<1x1x1x32xf32, #tpu.memory_space<vmem>>, vector<1x1x1x32xf32>
    %99 = vector.shape_cast %98 : vector<1x1x1x32xf32> to vector<1x32xf32>
    %cst_46 = arith.constant dense<0.000000e+00> : vector<10xf32>
    %100 = vector.multi_reduction <add>, %95, %cst_46 [1] : vector<10x32xf32> to vector<10xf32>
    %101 = vector.shape_cast %100 : vector<10xf32> to vector<10x1xf32>
    %cst_47 = arith.constant 3.200000e+01 : f32
    %102 = vector.broadcast %cst_47 : f32 to vector<10x1xf32>
    %103 = arith.divf %101, %102 : vector<10x1xf32>
    %104 = arith.mulf %95, %95 : vector<10x32xf32>
    %cst_48 = arith.constant dense<0.000000e+00> : vector<10xf32>
    %105 = vector.multi_reduction <add>, %104, %cst_48 [1] : vector<10x32xf32> to vector<10xf32>
    %106 = vector.shape_cast %105 : vector<10xf32> to vector<10x1xf32>
    %cst_49 = arith.constant 3.200000e+01 : f32
    %107 = vector.broadcast %cst_49 : f32 to vector<10x1xf32>
    %108 = arith.divf %106, %107 : vector<10x1xf32>
    %109 = arith.mulf %103, %103 : vector<10x1xf32>
    %110 = arith.subf %108, %109 : vector<10x1xf32>
    %111 = vector.broadcast %103 : vector<10x1xf32> to vector<10x32xf32>
    %112 = arith.subf %95, %111 : vector<10x32xf32>
    %cst_50 = arith.constant 9.99999974E-6 : f32
    %113 = vector.broadcast %cst_50 : f32 to vector<10x1xf32>
    %114 = arith.addf %110, %113 : vector<10x1xf32>
    %115 = math.rsqrt %114 : vector<10x1xf32>
    %116 = vector.broadcast %115 : vector<10x1xf32> to vector<10x32xf32>
    %117 = arith.mulf %112, %116 : vector<10x32xf32>
    %118 = vector.broadcast %97 : vector<1x32xf32> to vector<10x32xf32>
    %119 = arith.mulf %117, %118 : vector<10x32xf32>
    %120 = vector.broadcast %99 : vector<1x32xf32> to vector<10x32xf32>
    %121 = arith.addf %119, %120 : vector<10x32xf32>
    %c0_51 = arith.constant 0 : index
    %c0_52 = arith.constant 0 : index
    %c0_53 = arith.constant 0 : index
    %c0_54 = arith.constant 0 : index
    %122 = vector.load %arg17[%c0_51, %c0_52, %c0_53, %c0_54] : memref<1x1x32x64xbf16, #tpu.memory_space<vmem>>, vector<1x1x32x64xbf16>
    %123 = vector.shape_cast %122 : vector<1x1x32x64xbf16> to vector<32x64xbf16>
    %c0_55 = arith.constant 0 : index
    %c0_56 = arith.constant 0 : index
    %c0_57 = arith.constant 0 : index
    %c0_58 = arith.constant 0 : index
    %124 = vector.load %arg18[%c0_55, %c0_56, %c0_57, %c0_58] : memref<1x1x1x64xf32, #tpu.memory_space<vmem>>, vector<1x1x1x64xf32>
    %125 = vector.shape_cast %124 : vector<1x1x1x64xf32> to vector<1x64xf32>
    %126 = arith.truncf %121 : vector<10x32xf32> to vector<10x32xbf16>
    %cst_59 = arith.constant dense<0.000000e+00> : vector<10x64xf32>
    %127 = tpu.matmul %126, %123, %cst_59 {dimension_numbers = #tpu.dot_dimension_numbers<[1], [0], [0], [1], [0, 0, 1, 1], [], []>} : vector<10x32xbf16>, vector<32x64xbf16>, vector<10x64xf32> -> vector<10x64xf32>
    %128 = vector.broadcast %125 : vector<1x64xf32> to vector<10x64xf32>
    %129 = arith.addf %127, %128 : vector<10x64xf32>
    %130 = arith.mulf %129, %129 : vector<10x64xf32>
    %131 = arith.mulf %129, %130 : vector<10x64xf32>
    %cst_60 = arith.constant 4.471500e-02 : f32
    %132 = vector.broadcast %cst_60 : f32 to vector<10x64xf32>
    %133 = arith.mulf %132, %131 : vector<10x64xf32>
    %134 = arith.addf %129, %133 : vector<10x64xf32>
    %cst_61 = arith.constant 0.797884583 : f32
    %135 = vector.broadcast %cst_61 : f32 to vector<10x64xf32>
    %136 = arith.mulf %135, %134 : vector<10x64xf32>
    %137 = math.tanh %136 : vector<10x64xf32>
    %cst_62 = arith.constant 1.000000e+00 : f32
    %138 = vector.broadcast %cst_62 : f32 to vector<10x64xf32>
    %139 = arith.addf %138, %137 : vector<10x64xf32>
    %cst_63 = arith.constant 5.000000e-01 : f32
    %140 = vector.broadcast %cst_63 : f32 to vector<10x64xf32>
    %141 = arith.mulf %140, %139 : vector<10x64xf32>
    %142 = arith.mulf %129, %141 : vector<10x64xf32>
    %c0_64 = arith.constant 0 : index
    %c0_65 = arith.constant 0 : index
    %c0_66 = arith.constant 0 : index
    %c0_67 = arith.constant 0 : index
    %143 = vector.load %arg19[%c0_64, %c0_65, %c0_66, %c0_67] : memref<1x1x64x32xbf16, #tpu.memory_space<vmem>>, vector<1x1x64x32xbf16>
    %144 = vector.shape_cast %143 : vector<1x1x64x32xbf16> to vector<64x32xbf16>
    %c0_68 = arith.constant 0 : index
    %c0_69 = arith.constant 0 : index
    %c0_70 = arith.constant 0 : index
    %c0_71 = arith.constant 0 : index
    %145 = vector.load %arg20[%c0_68, %c0_69, %c0_70, %c0_71] : memref<1x1x1x32xf32, #tpu.memory_space<vmem>>, vector<1x1x1x32xf32>
    %146 = vector.shape_cast %145 : vector<1x1x1x32xf32> to vector<1x32xf32>
    %147 = arith.truncf %142 : vector<10x64xf32> to vector<10x64xbf16>
    %cst_72 = arith.constant dense<0.000000e+00> : vector<10x32xf32>
    %148 = tpu.matmul %147, %144, %cst_72 {dimension_numbers = #tpu.dot_dimension_numbers<[1], [0], [0], [1], [0, 0, 1, 1], [], []>} : vector<10x64xbf16>, vector<64x32xbf16>, vector<10x32xf32> -> vector<10x32xf32>
    %149 = vector.broadcast %146 : vector<1x32xf32> to vector<10x32xf32>
    %150 = arith.addf %148, %149 : vector<10x32xf32>
    %151 = arith.addf %95, %150 : vector<10x32xf32>
    %152 = vector.shape_cast %151 : vector<10x32xf32> to vector<2x5x32xf32>
    %c0_73 = arith.constant 0 : index
    %c0_74 = arith.constant 0 : index
    %c0_75 = arith.constant 0 : index
    %153 = vector.load %arg25[%c0_73, %c0_74, %c0_75] : memref<2x5x32xf32, #tpu.memory_space<vmem>>, vector<2x5x32xf32>
    tpu.vector_store %arg25[%c0_73, %c0_74, %c0_75], %152 {strides = array<i32>} : memref<2x5x32xf32, #tpu.memory_space<vmem>>, vector<2x5x32xf32>,
    %c1_i32 = arith.constant 1 : i32
    %154 = arith.cmpi eq, %arg1, %c1_i32 : i32
    %155 = arith.extui %154 : i1 to i32
    %c0_i32_76 = arith.constant 0 : i32
    %156 = arith.cmpi ne, %155, %c0_i32_76 : i32
    scf.if %156 {
      %cst_77 = arith.constant 0.000000e+00 : f32
      %157 = vector.broadcast %cst_77 : f32 to vector<2x5x108xf32>
      %158 = tpu.concatenate %83, %157 in 2 : vector<2x5x20xf32>, vector<2x5x108xf32> -> vector<2x5x128xf32>
      %c0_78 = arith.constant 0 : index
      %c0_79 = arith.constant 0 : index
      %c0_80 = arith.constant 0 : index
      %c0_81 = arith.constant 0 : index
      %159 = vector.load %arg24[%c0_78, %c0_79, %c0_80, %c0_81] : memref<1x2x5x128xf32, #tpu.memory_space<vmem>>, vector<1x2x5x128xf32>
      %160 = vector.shape_cast %159 : vector<1x2x5x128xf32> to vector<2x5x128xf32>
      %161 = vector.shape_cast %158 : vector<2x5x128xf32> to vector<1x2x5x128xf32>
      tpu.vector_store %arg24[%c0_78, %c0_79, %c0_80, %c0_81], %161 {strides = array<i32>} : memref<1x2x5x128xf32, #tpu.memory_space<vmem>>, vector<1x2x5x128xf32>,
      %162 = vector.shape_cast %151 : vector<10x32xf32> to vector<2x5x32xf32>
      %cst_82 = arith.constant dense<0.000000e+00> : vector<2x32xf32>
      %163 = vector.multi_reduction <add>, %162, %cst_82 [1] : vector<2x5x32xf32> to vector<2x32xf32>
      %cst_83 = arith.constant 5.000000e+00 : f32
      %164 = vector.broadcast %cst_83 : f32 to vector<2x32xf32>
      %165 = arith.divf %163, %164 : vector<2x32xf32>
      %c0_84 = arith.constant 0 : index
      %c0_85 = arith.constant 0 : index
      %c0_86 = arith.constant 0 : index
      %166 = vector.load %arg21[%c0_84, %c0_85, %c0_86] : memref<1x32x3xbf16, #tpu.memory_space<vmem>>, vector<1x32x3xbf16>
      %167 = vector.shape_cast %166 : vector<1x32x3xbf16> to vector<32x3xbf16>
      %c0_87 = arith.constant 0 : index
      %c0_88 = arith.constant 0 : index
      %c0_89 = arith.constant 0 : index
      %168 = vector.load %arg22[%c0_87, %c0_88, %c0_89] : memref<1x1x3xf32, #tpu.memory_space<vmem>>, vector<1x1x3xf32>
      %169 = vector.shape_cast %168 : vector<1x1x3xf32> to vector<1x3xf32>
      %170 = arith.truncf %165 : vector<2x32xf32> to vector<2x32xbf16>
      %cst_90 = arith.constant dense<0.000000e+00> : vector<2x3xf32>
      %171 = tpu.matmul %170, %167, %cst_90 {dimension_numbers = #tpu.dot_dimension_numbers<[1], [0], [0], [1], [0, 0, 1, 1], [], []>} : vector<2x32xbf16>, vector<32x3xbf16>, vector<2x3xf32> -> vector<2x3xf32>
      %172 = vector.broadcast %169 : vector<1x3xf32> to vector<2x3xf32>
      %173 = arith.addf %171, %172 : vector<2x3xf32>
      %c0_91 = arith.constant 0 : index
      %c0_92 = arith.constant 0 : index
      %c0_93 = arith.constant 0 : index
      %174 = vector.load %arg23[%c0_91, %c0_92, %c0_93] : memref<1x2x3xf32, #tpu.memory_space<vmem>>, vector<1x2x3xf32>
      %175 = vector.shape_cast %174 : vector<1x2x3xf32> to vector<2x3xf32>
      %176 = vector.shape_cast %173 : vector<2x3xf32> to vector<1x2x3xf32>
      tpu.vector_store %arg23[%c0_91, %c0_92, %c0_93], %176 {strides = array<i32>} : memref<1x2x3xf32, #tpu.memory_space<vmem>>, vector<1x2x3xf32>,
    } else {
    }
    return
  }
  func.func @transform_0(%arg0: i32, %arg1: i32) -> (i32, i32, i32, i32) {
    %c0_i32 = arith.constant 0 : i32
    %c0_i32_0 = arith.constant 0 : i32
    %c0_i32_1 = arith.constant 0 : i32
    %c0_i32_2 = arith.constant 0 : i32
    return %arg0, %c0_i32, %c0_i32_0, %c0_i32_1 : i32, i32, i32, i32
  }
  func.func @transform_1(%arg0: i32, %arg1: i32) -> (i32, i32) {
    %c0_i32 = arith.constant 0 : i32
    %c0_i32_0 = arith.constant 0 : i32
    %c0_i32_1 = arith.constant 0 : i32
    return %c0_i32, %c0_i32_0 : i32, i32
  }
  func.func @transform_2(%arg0: i32, %arg1: i32) -> (i32, i32, i32) {
    %c0_i32 = arith.constant 0 : i32
    %c0_i32_0 = arith.constant 0 : i32
    %c0_i32_1 = arith.constant 0 : i32
    return %arg0, %c0_i32, %c0_i32_0 : i32, i32, i32
  }
  func.func @transform_3(%arg0: i32, %arg1: i32) -> (i32, i32, i32) {
    %c0_i32 = arith.constant 0 : i32
    %c0_i32_0 = arith.constant 0 : i32
    %c0_i32_1 = arith.constant 0 : i32
    return %arg0, %c0_i32, %c0_i32_0 : i32, i32, i32
  }
  func.func @transform_4(%arg0: i32, %arg1: i32) -> (i32, i32, i32) {
    %c0_i32 = arith.constant 0 : i32
    %c0_i32_0 = arith.constant 0 : i32
    %c0_i32_1 = arith.constant 0 : i32
    return %arg0, %c0_i32, %c0_i32_0 : i32, i32, i32
  }
  func.func @transform_5(%arg0: i32, %arg1: i32) -> (i32, i32, i32) {
    %c0_i32 = arith.constant 0 : i32
    %c0_i32_0 = arith.constant 0 : i32
    %c0_i32_1 = arith.constant 0 : i32
    return %arg0, %c0_i32, %c0_i32_0 : i32, i32, i32
  }
  func.func @transform_6(%arg0: i32, %arg1: i32) -> (i32, i32, i32) {
    %c0_i32 = arith.constant 0 : i32
    %c0_i32_0 = arith.constant 0 : i32
    %c0_i32_1 = arith.constant 0 : i32
    return %arg0, %c0_i32, %c0_i32_0 : i32, i32, i32
  }
  func.func @transform_7(%arg0: i32, %arg1: i32) -> (i32, i32, i32, i32) {
    %c0_i32 = arith.constant 0 : i32
    %c0_i32_0 = arith.constant 0 : i32
    %c0_i32_1 = arith.constant 0 : i32
    return %arg0, %arg1, %c0_i32, %c0_i32_0 : i32, i32, i32, i32
  }
  func.func @transform_8(%arg0: i32, %arg1: i32) -> (i32, i32, i32, i32) {
    %c0_i32 = arith.constant 0 : i32
    %c0_i32_0 = arith.constant 0 : i32
    %c0_i32_1 = arith.constant 0 : i32
    return %arg0, %arg1, %c0_i32, %c0_i32_0 : i32, i32, i32, i32
  }
  func.func @transform_9(%arg0: i32, %arg1: i32) -> (i32, i32, i32, i32) {
    %c0_i32 = arith.constant 0 : i32
    %c0_i32_0 = arith.constant 0 : i32
    %c0_i32_1 = arith.constant 0 : i32
    return %arg0, %arg1, %c0_i32, %c0_i32_0 : i32, i32, i32, i32
  }
  func.func @transform_10(%arg0: i32, %arg1: i32) -> (i32, i32, i32, i32) {
    %c0_i32 = arith.constant 0 : i32
    %c0_i32_0 = arith.constant 0 : i32
    %c0_i32_1 = arith.constant 0 : i32
    return %arg0, %arg1, %c0_i32, %c0_i32_0 : i32, i32, i32, i32
  }
  func.func @transform_11(%arg0: i32, %arg1: i32) -> (i32, i32, i32, i32) {
    %c0_i32 = arith.constant 0 : i32
    %c0_i32_0 = arith.constant 0 : i32
    %c0_i32_1 = arith.constant 0 : i32
    return %arg0, %arg1, %c0_i32, %c0_i32_0 : i32, i32, i32, i32
  }
  func.func @transform_12(%arg0: i32, %arg1: i32) -> (i32, i32, i32, i32) {
    %c0_i32 = arith.constant 0 : i32
    %c0_i32_0 = arith.constant 0 : i32
    %c0_i32_1 = arith.constant 0 : i32
    return %arg0, %arg1, %c0_i32, %c0_i32_0 : i32, i32, i32, i32
  }
  func.func @transform_13(%arg0: i32, %arg1: i32) -> (i32, i32, i32, i32) {
    %c0_i32 = arith.constant 0 : i32
    %c0_i32_0 = arith.constant 0 : i32
    %c0_i32_1 = arith.constant 0 : i32
    return %arg0, %arg1, %c0_i32, %c0_i32_0 : i32, i32, i32, i32
  }
  func.func @transform_14(%arg0: i32, %arg1: i32) -> (i32, i32, i32, i32) {
    %c0_i32 = arith.constant 0 : i32
    %c0_i32_0 = arith.constant 0 : i32
    %c0_i32_1 = arith.constant 0 : i32
    return %arg0, %arg1, %c0_i32, %c0_i32_0 : i32, i32, i32, i32
  }
  func.func @transform_15(%arg0: i32, %arg1: i32) -> (i32, i32, i32, i32) {
    %c0_i32 = arith.constant 0 : i32
    %c0_i32_0 = arith.constant 0 : i32
    %c0_i32_1 = arith.constant 0 : i32
    return %arg0, %arg1, %c0_i32, %c0_i32_0 : i32, i32, i32, i32
  }
  func.func @transform_16(%arg0: i32, %arg1: i32) -> (i32, i32, i32, i32) {
    %c0_i32 = arith.constant 0 : i32
    %c0_i32_0 = arith.constant 0 : i32
    %c0_i32_1 = arith.constant 0 : i32
    return %arg0, %arg1, %c0_i32, %c0_i32_0 : i32, i32, i32, i32
  }
  func.func @transform_17(%arg0: i32, %arg1: i32) -> (i32, i32, i32, i32) {
    %c0_i32 = arith.constant 0 : i32
    %c0_i32_0 = arith.constant 0 : i32
    %c0_i32_1 = arith.constant 0 : i32
    return %arg0, %arg1, %c0_i32, %c0_i32_0 : i32, i32, i32, i32
  }
  func.func @transform_18(%arg0: i32, %arg1: i32) -> (i32, i32, i32, i32) {
    %c0_i32 = arith.constant 0 : i32
    %c0_i32_0 = arith.constant 0 : i32
    %c0_i32_1 = arith.constant 0 : i32
    return %arg0, %arg1, %c0_i32, %c0_i32_0 : i32, i32, i32, i32
  }
  func.func @transform_19(%arg0: i32, %arg1: i32) -> (i32, i32, i32) {
    %c0_i32 = arith.constant 0 : i32
    %c0_i32_0 = arith.constant 0 : i32
    %c0_i32_1 = arith.constant 0 : i32
    return %arg0, %c0_i32, %c0_i32_0 : i32, i32, i32
  }
  func.func @transform_20(%arg0: i32, %arg1: i32) -> (i32, i32, i32) {
    %c0_i32 = arith.constant 0 : i32
    %c0_i32_0 = arith.constant 0 : i32
    %c0_i32_1 = arith.constant 0 : i32
    return %arg0, %c0_i32, %c0_i32_0 : i32, i32, i32
  }
  func.func @transform_21(%arg0: i32, %arg1: i32) -> (i32, i32, i32) {
    %c0_i32 = arith.constant 0 : i32
    %c0_i32_0 = arith.constant 0 : i32
    %c0_i32_1 = arith.constant 0 : i32
    return %arg0, %c0_i32, %c0_i32_0 : i32, i32, i32
  }
  func.func @transform_22(%arg0: i32, %arg1: i32) -> (i32, i32, i32, i32) {
    %c0_i32 = arith.constant 0 : i32
    %c0_i32_0 = arith.constant 0 : i32
    %c0_i32_1 = arith.constant 0 : i32
    %c0_i32_2 = arith.constant 0 : i32
    return %arg0, %c0_i32, %c0_i32_0, %c0_i32_1 : i32, i32, i32, i32
  }
}

</mosaic_0001>

<bundles_post_ra>
// kernel: forward.1
= control target key start
LH: loop header
LB: loop body
LE: loop exit
PB: predicated region body
PF: predicated region fallthrough
CT: control target
= control target key end

     0   :  { %s8085_s0 = inlined_call_operand.vmem [shape: f32[3,2,4,16], index: 0, kind: input, shape index: {}]   ;;  %s8086_s1 = inlined_call_operand.hbm [shape: f32[5,16], index: 1, kind: input, shape index: {}]   ;;  %s8087_s2 = inlined_call_operand.vmem [shape: bf16[3,16,32], index: 2, kind: input, shape index: {}]   ;;  %s8088_s3 = inlined_call_operand.hbm [shape: f32[3,1,32], index: 3, kind: input, shape index: {}]   ;;  %s8089_s4 = inlined_call_operand.vmem [shape: bf16[3,16,32], index: 4, kind: input, shape index: {}]   ;;  %s8090_s5 = inlined_call_operand.hbm [shape: f32[3,1,32], index: 5, kind: input, shape index: {}]   ;;  %s8091_s6 = inlined_call_operand.hbm [shape: f32[3,1,32], index: 6, kind: input, shape index: {}]   ;;  %s8092_s7 = inlined_call_operand.hbm [shape: f32[3,2,1,32], index: 7, kind: input, shape index: {}]   ;;  %s8093_s8 = inlined_call_operand.hbm [shape: f32[3,2,1,32], index: 8, kind: input, shape index: {}]   ;;  %s8094_s9 = inlined_call_operand.vmem [shape: bf16[3,2,32,96], index: 9, kind: input, shape index: {}]   ;;  %s8095_s10 = inlined_call_operand.hbm [shape: f32[3,2,1,96], index: 10, kind: input, shape index: {}]   ;;  %s8096_s11 = inlined_call_operand.vmem [shape: bf16[3,2,32,32], index: 11, kind: input, shape index: {}]   ;;  %s8097_s12 = inlined_call_operand.hbm [shape: f32[3,2,1,32], index: 12, kind: input, shape index: {}]   ;;  %s8098_s13 = inlined_call_operand.hbm [shape: f32[3,2,1,32], index: 13, kind: input, shape index: {}]   ;;  %s8099_s14 = inlined_call_operand.hbm [shape: f32[3,2,1,32], index: 14, kind: input, shape index: {}]   ;;  %s8100_s15 = inlined_call_operand.vmem [shape: bf16[3,2,32,64], index: 15, kind: input, shape index: {}]   ;;  %s8101_s16 = inlined_call_operand.hbm [shape: f32[3,2,1,64], index: 16, kind: input, shape index: {}]   ;;  %s8102_s17 = inlined_call_operand.vmem [shape: bf16[3,2,64,32], index: 17, kind: input, shape index: {}]   ;;  %s8103_s18 = inlined_call_operand.hbm [shape: f32[3,2,1,32], index: 18, kind: input, shape index: {}]   ;;  %s8104_s19 = inlined_call_operand.vmem [shape: bf16[3,32,3], index: 19, kind: input, shape index: {}]   ;;  %s8105_s20 = inlined_call_operand.hbm [shape: f32[3,1,3], index: 20, kind: input, shape index: {}]   ;;  %s8106_s21 = inlined_call_operand.vmem [shape: f32[3,2,3], index: 21, kind: output, shape index: {0}]   ;;  %s8107_s22 = inlined_call_operand.vmem [shape: f32[3,2,5,128], index: 22, kind: output, shape index: {1}]  }
   0x1   :  { %8153 = sst [smem:[#allocation56_spill]] %s8085_s0 }
   0x2   :  { %8154 = sst [smem:[#allocation57_spill]] %s8086_s1 }
   0x3   :  { %8155 = sst [smem:[#allocation58_spill]] %s8087_s2 }
   0x4   :  { %8156 = sst [smem:[#allocation59_spill]] %s8088_s3 }
   0x5   :  { %8157 = sst [smem:[#allocation60_spill]] %s8089_s4 }
   0x6   :  { %8158 = sst [smem:[#allocation61_spill]] %s8090_s5 }
   0x7   :  { %8159 = sst [smem:[#allocation62_spill]] %s8091_s6 }
   0x8   :  { %8160 = sst [smem:[#allocation63_spill]] %s8092_s7 }
   0x9   :  { %8161 = sst [smem:[#allocation64_spill]] %s8093_s8 }
   0xa   :  { %8162 = sst [smem:[#allocation65_spill]] %s8094_s9 }
   0xb   :  { %8163 = sst [smem:[#allocation66_spill]] %s8095_s10 }
   0xc   :  { %8164 = sst [smem:[#allocation67_spill]] %s8096_s11 }
   0xd   :  { %8165 = sst [smem:[#allocation68_spill]] %s8097_s12 }
   0xe   :  { %8166 = sst [smem:[#allocation69_spill]] %s8098_s13 }
   0xf   :  { %8167 = sst [smem:[#allocation70_spill]] %s8099_s14 }
  0x10   :  { %8168 = sst [smem:[#allocation71_spill]] %s8100_s15 }
  0x11   :  { %8169 = sst [smem:[#allocation72_spill]] %s8101_s16 }
  0x12   :  { %8170 = sst [smem:[#allocation73_spill]] %s8102_s17 }
  0x13   :  { %8171 = sst [smem:[#allocation74_spill]] %s8103_s18 }
  0x14   :  { %8172 = sst [smem:[#allocation75_spill]] %s8104_s19 }
  0x15   :  { %8173 = sst [smem:[#allocation76_spill]] %s8105_s20 }
  0x16   :  { %8174 = sst [smem:[#allocation77_spill]] %s8106_s21 }
  0x17   :  { %8175 = sst [smem:[#allocation78_spill]] %s8107_s22 }
  0x18   :  { %28 = vsyncpa [#allocation4], 0 }
  0x19   :  { %29 = vsyncpa [#allocation6], 0 }
  0x1a   :  { %31 = vsyncpa [#allocation6 + $0x1], 0 }
  0x1b   :  { %32 = vsyncpa [#allocation9], 0 }
  0x1c   :  { %34 = vsyncpa [#allocation9 + $0x1], 0 }
  0x1d   :  { %35 = vsyncpa [#allocation12], 0 }
  0x1e   :  { %37 = vsyncpa [#allocation12 + $0x1], 0 }
  0x1f   :  { %38 = vsyncpa [#allocation15], 0 }
  0x20   :  { %40 = vsyncpa [#allocation15 + $0x1], 0 }
  0x21   :  { %41 = vsyncpa [#allocation18], 0 }
  0x22   :  { %43 = vsyncpa [#allocation18 + $0x1], 0 }
  0x23   :  { %44 = vsyncpa [#allocation21], 0 }
  0x24   :  { %46 = vsyncpa [#allocation21 + $0x1], 0  ;;  %s6724_s3 = smov 0   ;;  %s6726_s28 = smov 0  }
  0x25   :  { %s6728_s29 = smov 0   ;;  %s6730_s30 = smov 0  }
  0x26   :  { %s6732_s4 = smov 0   ;;  %s6734_s0 = smov 0  }
  0x27   :  { %s6736_s23 = smov 0   ;;  %s6738_s1 = smov 0  }
  0x28   :  { %s6740_s5 = smov 0   ;;  %s6742_s24 = smov 0  }
  0x29   :  { %s6744_s6 = smov 0  }
  0x2a LB: > { %8176 = sst [smem:[#allocation32_spill]] %s6540_s28  ;;  %s61_s25 = sadd.s32 1, %s6568_s5  ;;  %s6576_s6 = sphi %s6744_s6, %s52_s6   ;;  %s6572_s24 = sphi %s6742_s24, %s8286_s24   ;;  %s6568_s5 = sphi %s6740_s5, %s8285_s5   ;;  %s6564_s1 = sphi %s6738_s1, %s8284_s1   ;;  %s6560_s23 = sphi %s6736_s23, %s8283_s23   ;;  %s6556_s0 = sphi %s6734_s0, %s8282_s0   ;;  %s6552_s4 = sphi %s6732_s4, %s8281_s4   ;;  %s6548_s30 = sphi %s6730_s30, %s8280_s30   ;;  %s6544_s29 = sphi %s6728_s29, %s8279_s29   ;;  %s6540_s28 = sphi %s6726_s28, %s8278_s28   ;;  %s6536_s3 = sphi %s6724_s3, %s8277_s3  }
  0x2b   : > { %8177 = sst [smem:[#allocation33_spill]] %s6544_s29  ;;  %s64_s26 = sadd.s32 1, %s6572_s24 }
  0x2c   : > { %8178 = sst [smem:[#allocation34_spill]] %s6552_s4  ;;  %p62_p0 = scmp.ge.s32.totalorder %s61_s25, 2 }
  0x2d   : > { %8179 = sst [smem:[#allocation35_spill]] %s6556_s0  ;;  %s144_s2 = sadd.s32 1, %s6556_s0 }
  0x2e   : > { %8180 = sst [smem:[#allocation36_spill]] %s6560_s23  ;;  %p151_p1 = scmp.ne.s32.totalorder %s6556_s0, %s6552_s4 }
  0x2f   : > { %8181 = sst [smem:[#allocation37_spill]] %s6564_s1  ;;  %p152_p2 = scmp.eq.s32.totalorder %s6576_s6, 0 }
  0x30   : > { %8182 = sst [smem:[#allocation38_spill]] %s6568_s5  ;;  %s8288_s25 = smov (%p62_p0, %s61_s25), 0 }
  0x31   : > { %8183 = sst [smem:[#allocation39_spill]] %s6572_s24  ;;  %s8290_s26 = smov (!%p62_p0, %s64_s26), %s6572_s24 }
  0x32   : > { %8184 = sst [smem:[#allocation40_spill]] %s8288_s25  ;;  %p6788_p3 = por %p152_p2, %p151_p1 }
  0x33   : > { %s246_s21 = ssub.s32 %s6568_s5, %s8288_s25  ;;  %p66_p4 = scmp.ge.s32.totalorder %s8290_s26, 3 }
  0x34   : > { %s250_s22 = sadd.s32 1, %s6544_s29  ;;  %p257_p5 = scmp.ne.s32.totalorder %s6544_s29, %s6540_s28 }
  0x35   : > { %s8292_s26 = smov (%p66_p4, %s8290_s26), 0  ;;  %p5914_p7 = scmp.lt.s32.totalorder %s6576_s6, 6 }
  0x36   : > { %8186 = sst [smem:[#allocation41_spill]] %s8292_s26  ;;  %p6799_p6 = por %p257_p5, %p152_p2 }
  0x37   : > { %s141_s17 = ssub.s32 %s6572_s24, %s8292_s26  ;;  %s6807_s15 = sand.u32 1, %s6576_s6  }
  0x38   : > { %p142_p8 = scmp.eq.s32.totalorder %s141_s17, 0  ;;  %s247_s25 = sor.u32 %s246_s21, %s141_s17 }
  0x39   : > { %p248_p9 = scmp.eq.s32.totalorder %s247_s25, 0  ;;  %s6816_s23 = sand.u32 1, %s6556_s0  }
  0x3a   : > { %s6810_s11 = scalar_select %p142_p8, %s6556_s0, %s144_s2  }
  0x3b   : > { %s6813_s9 = scalar_select %p248_p9, %s6544_s29, %s250_s22  }
  0x3c   : > { %8188 = sst [smem:[#allocation42_spill]] %s6810_s11  ;;  %s6819_s1 = sshll.u32 %s6572_s24, 4 }
  0x3d   : > { %8189 = sst [smem:[#allocation43_spill]] %s6813_s9  ;;  %s729_s10 = scalar_lea.vmem [#allocation5], %s6816_s23 }
  0x3e   : > { %s8190_s13 = sld [smem:[#allocation59_spill]]  ;;  %s736_s7 = sshll.u32 %s729_s10, 4  ;;  %s737_s7 = int_to_ptr.vmem [resolvable:$true] %s736_s7 }
  0x3f   : > { %p6830_p10 = pnand %p5914_p7, %p6788_p3  ;;  %s5605_s21 = sshll.u32 %s6572_s24, 1 }
  0x40   : > { %p6839_p11 = pnand %p5914_p7, %p6799_p6  ;;  %s8116_s16 = scalar_lea.sflag [#allocation6], %s6807_s15 }
  0x41   : > { %p8125_p12 = pneg %p6830_p10  ;;  %s6105_s10 = scalar_lea.vmem %s737_s7, 16 }
  0x42   : > { %p6106_p13 = scmp.ne.s32.totalorder %s737_s7, %s6105_s10 }
  0x44   : > { %s734_s26 = scalar_lea.hbm %s8190_s13, %s6819_s1  ;;  %p6108_p0 = pnand %p6106_p13, %p8125_p12 }
  0x45   : > { %s6578_s13 = smov [#allocation5]  }
  0x46   : > { %p6109_p1 = pneg %p6108_p0  ;;  %s6110_s20 = sshll.u32 %s6578_s13, 4  ;;  %s6111_s20 = int_to_ptr.vmem [resolvable:$false] %s6110_s20 }
  0x47   : > { %s6112_s25 = scalar_lea.vmem %s6111_s20, 32  ;;  %p6113_p2 = scmp.lt.s32.totalorder %s737_s7, %s6111_s20 }
  0x48   : > { %p6114_p3 = scmp.lt.s32.totalorder %s6112_s25, %s6105_s10 }
  0x4a   : > { %p6115_p4 = por %p6114_p3, %p6113_p2 }
  0x4c   : > { %p6116_p5 = pnand %p6115_p4, %p6109_p1 }
  0x4e   : > { %6119 = shalt.err (!%p6116_p5)
}
  0x4f   : > { %5879 = dma.hbm_to_vmem [thread:$0]  (!%p6830_p10), %s734_s26, 16, %s737_s7, %s8116_s16  }
  0x50   : > { %s8193_s27 = sld [smem:[#allocation62_spill]]  ;;  %s771_s20 = scalar_lea.vmem [#allocation8], %s6816_s23 }
  0x51   : > { %s778_s10 = sshll.u32 %s771_s20, 4  ;;  %s6859_s25 = sand.u32 1, %s6544_s29   ;;  %s779_s10 = int_to_ptr.vmem [resolvable:$true] %s778_s10 }
  0x52   : > { %s793_s24 = sadd.s32 %s6568_s5, %s5605_s21  ;;  %s8115_s11 = scalar_lea.sflag [#allocation9], %s6807_s15 }
  0x53   : > { %s6133_s0 = scalar_lea.vmem %s779_s10, 16  ;;  %s6579_s9 = smov [#allocation8]  }
  0x54   : > { %p6134_p6 = scmp.ne.s32.totalorder %s779_s10, %s6133_s0  ;;  %s6138_s28 = sshll.u32 %s6579_s9, 4  ;;  %s6139_s28 = int_to_ptr.vmem [resolvable:$false] %s6138_s28 }
  0x55   : > { %s6140_s7 = scalar_lea.vmem %s6139_s28, 32  ;;  %p6141_p9 = scmp.lt.s32.totalorder %s779_s10, %s6139_s28 }
  0x56   : > { %s776_s13 = scalar_lea.hbm %s8193_s27, %s6819_s1  ;;  %p6136_p7 = pnand %p6134_p6, %p8125_p12 }
  0x57   : > { %p6142_p13 = scmp.lt.s32.totalorder %s6140_s7, %s6133_s0 }
  0x58   : > { %p6137_p8 = pneg %p6136_p7 }
  0x59   : > { %p6143_p0 = por %p6142_p13, %p6141_p9 }
  0x5b   : > { %p6144_p1 = pnand %p6143_p0, %p6137_p8 }
  0x5d   : > { %6147 = shalt.err (!%p6144_p1)
}
  0x5e   : > { %5885 = dma.hbm_to_vmem [thread:$0]  (!%p6830_p10), %s776_s13, 16, %s779_s10, %s8115_s11  }
  0x5f   : > { %s6870_s26 = sshll.u32 %s793_s24, 4  ;;  %s8194_s8 = sld [smem:[#allocation64_spill]] }
  0x60   : > { %s807_s28 = scalar_lea.vmem [#allocation11], %s6859_s25  ;;  %s8117_s2 = scalar_lea.sflag [#allocation12], %s6807_s15 }
  0x61   : > { %s816_s0 = sshll.u32 %s807_s28, 4  ;;  %p6880_p2 = pneg %p6839_p11  ;;  %s817_s0 = int_to_ptr.vmem [resolvable:$true] %s816_s0 }
  0x62   : > { %s6161_s20 = scalar_lea.vmem %s817_s0, 16  ;;  %s6580_s24 = smov [#allocation11]  }
  0x63   : > { %p6162_p3 = scmp.ne.s32.totalorder %s817_s0, %s6161_s20  ;;  %s6166_s13 = sshll.u32 %s6580_s24, 4  ;;  %s6167_s13 = int_to_ptr.vmem [resolvable:$false] %s6166_s13 }
  0x64   : > { %s6168_s10 = scalar_lea.vmem %s6167_s13, 32  ;;  %p6169_p6 = scmp.lt.s32.totalorder %s817_s0, %s6167_s13 }
  0x65   : > { %s814_s19 = scalar_lea.hbm %s8194_s8, %s6870_s26  ;;  %p6164_p4 = pnand %p6162_p3, %p6880_p2 }
  0x66   : > { %p6170_p7 = scmp.lt.s32.totalorder %s6168_s10, %s6161_s20 }
  0x67   : > { %p6165_p5 = pneg %p6164_p4 }
  0x68   : > { %p6171_p8 = por %p6170_p7, %p6169_p6 }
  0x6a   : > { %p6172_p9 = pnand %p6171_p8, %p6165_p5 }
  0x6c   : > { %6175 = shalt.err (!%p6172_p9)
}
  0x6d   : > { %5891 = dma.hbm_to_vmem [thread:$0]  (!%p6839_p11), %s814_s19, 16, %s817_s0, %s8117_s2  }
  0x6e   : > { %s8196_s12 = sld [smem:[#allocation68_spill]]  ;;  %s869_s28 = scalar_lea.vmem [#allocation14], %s6859_s25 }
  0x6f   : > { %s878_s24 = sshll.u32 %s869_s28, 4  ;;  %s8118_s20 = scalar_lea.sflag [#allocation15], %s6807_s15  ;;  %s879_s24 = int_to_ptr.vmem [resolvable:$true] %s878_s24 }
  0x70   : > { %s6189_s13 = scalar_lea.vmem %s879_s24, 16  ;;  %s6581_s10 = smov [#allocation14]  }
  0x71   : > { %p6190_p13 = scmp.ne.s32.totalorder %s879_s24, %s6189_s13  ;;  %s6194_s11 = sshll.u32 %s6581_s10, 4  ;;  %s6195_s11 = int_to_ptr.vmem [resolvable:$false] %s6194_s11 }
  0x72   : > { %s6196_s16 = scalar_lea.vmem %s6195_s11, 32  ;;  %p6197_p3 = scmp.lt.s32.totalorder %s879_s24, %s6195_s11 }
  0x73   : > { %p6192_p0 = pnand %p6190_p13, %p6880_p2  ;;  %p6198_p4 = scmp.lt.s32.totalorder %s6196_s16, %s6189_s13 }
  0x74   : > { %s876_s9 = scalar_lea.hbm %s8196_s12, %s6870_s26 }
  0x75   : > { %p6193_p1 = pneg %p6192_p0  ;;  %p6199_p5 = por %p6198_p4, %p6197_p3 }
  0x77   : > { %p6200_p6 = pnand %p6199_p5, %p6193_p1 }
  0x79   : > { %6203 = shalt.err (!%p6200_p6)
}
  0x7a   : > { %5897 = dma.hbm_to_vmem [thread:$0]  (!%p6839_p11), %s876_s9, 16, %s879_s24, %s8118_s20  }
  0x7b   : > { %s8197_s14 = sld [smem:[#allocation70_spill]]  ;;  %s907_s21 = scalar_lea.vmem [#allocation17], %s6859_s25 }
  0x7c   : > { %s916_s28 = sshll.u32 %s907_s21, 4  ;;  %s8121_s11 = scalar_lea.sflag [#allocation18], %s6807_s15  ;;  %s917_s28 = int_to_ptr.vmem [resolvable:$true] %s916_s28 }
  0x7d   : > { %s6217_s16 = scalar_lea.vmem %s917_s28, 16  ;;  %s6582_s13 = smov [#allocation17]  }
  0x7e   : > { %p6218_p7 = scmp.ne.s32.totalorder %s917_s28, %s6217_s16  ;;  %s6222_s10 = sshll.u32 %s6582_s13, 4  ;;  %s6223_s10 = int_to_ptr.vmem [resolvable:$false] %s6222_s10 }
  0x7f   : > { %s6224_s2 = scalar_lea.vmem %s6223_s10, 32  ;;  %p6225_p13 = scmp.lt.s32.totalorder %s917_s28, %s6223_s10 }
  0x80   : > { %p6220_p8 = pnand %p6218_p7, %p6880_p2  ;;  %p6226_p0 = scmp.lt.s32.totalorder %s6224_s2, %s6217_s16 }
  0x81   : > { %s914_s7 = scalar_lea.hbm %s8197_s14, %s6870_s26 }
  0x82   : > { %p6221_p9 = pneg %p6220_p8  ;;  %p6227_p1 = por %p6226_p0, %p6225_p13 }
  0x84   : > { %p6228_p3 = pnand %p6227_p1, %p6221_p9 }
  0x86   : > { %6231 = shalt.err (!%p6228_p3)
}
  0x87   : > { %5903 = dma.hbm_to_vmem [thread:$0]  (!%p6839_p11), %s914_s7, 16, %s917_s28, %s8121_s11  }
  0x88   : > { %s8198_s18 = sld [smem:[#allocation74_spill]]  ;;  %s969_s0 = scalar_lea.vmem [#allocation20], %s6859_s25 }
  0x89   : > { %s978_s21 = sshll.u32 %s969_s0, 4  ;;  %s8120_s2 = scalar_lea.sflag [#allocation21], %s6807_s15  ;;  %s979_s21 = int_to_ptr.vmem [resolvable:$true] %s978_s21 }
  0x8a   : > { %s6245_s16 = scalar_lea.vmem %s979_s21, 16  ;;  %s6583_s13 = smov [#allocation20]  }
  0x8b   : > { %p6246_p4 = scmp.ne.s32.totalorder %s979_s21, %s6245_s16  ;;  %s6250_s10 = sshll.u32 %s6583_s13, 4  ;;  %s6251_s10 = int_to_ptr.vmem [resolvable:$false] %s6250_s10 }
  0x8c   : > { %s6252_s20 = scalar_lea.vmem %s6251_s10, 32  ;;  %p6253_p7 = scmp.lt.s32.totalorder %s979_s21, %s6251_s10 }
  0x8d   : > { %p6248_p5 = pnand %p6246_p4, %p6880_p2  ;;  %p6254_p8 = scmp.lt.s32.totalorder %s6252_s20, %s6245_s16 }
  0x8e   : > { %s976_s19 = scalar_lea.hbm %s8198_s18, %s6870_s26 }
  0x8f   : > { %p6249_p6 = pneg %p6248_p5  ;;  %p6255_p9 = por %p6254_p8, %p6253_p7 }
  0x91   : > { %p6256_p13 = pnand %p6255_p9, %p6249_p6 }
  0x93   : > { %6259 = shalt.err (!%p6256_p13)
}
  0x94   : > { %s8199_s7 = sld [smem:[#allocation32_spill]]  ;;  %s8119_s28 = sadd.s32 4294967295, %s6576_s6  }
  0x95   : > { %5909 = dma.hbm_to_vmem [thread:$0]  (!%p6839_p11), %s976_s19, 16, %s979_s21, %s8120_s2  }
  0x96   : > { %p157_p0 = scmp.ne.s32.totalorder %s6552_s4, %s6548_s30  ;;  %p6931_p1 = scmp.eq.s32.totalorder %s8119_s28, 0 }
  0x97   : > { %p5599_p4 = scmp.ge.s32.totalorder %s6576_s6, 1  ;;  %p686_p6 = scmp.lt.s32.totalorder %s6576_s6, 7 }
  0x98   : > { %s8200_s20 = scalar_select %p6931_p1, 1, 0 }
  0x99   : > { %p6940_p5 = por %p6931_p1, %p157_p0  ;;  %p6951_p8 = pnand %p5599_p4, %p686_p6 }
  0x9a   : > { %p263_p3 = scmp.ne.s32.totalorder %s8199_s7, %s6536_s3  ;;  %s6584_s19 = smov [#allocation3]  }
  0x9b   : > { %s8201_s9 = scalar_select %p6940_p5, 1, 0 }
  0x9c   : > { %p6947_p7 = por %p263_p3, %p6931_p1  ;;  %s699_s3 = sshll.u32 %s6584_s19, 4  ;;  %s6957_s3 = int_to_ptr.vmem [resolvable:$true] %s699_s3 }
  0x9d   : > { %s8203_s24 = scalar_select %p6951_p8, 1, 0 }
  0x9e   : > { %s8202_s30 = scalar_select %p6947_p7, 1, 0 }
  0x9f   : > { %p5872_p9 = pneg %p6951_p8  ;;  %s8204_s16 = sld [smem:[#allocation61_spill]] }
  0xa0   : > { %s754_s10 = scalar_lea.vmem [#allocation7], %s6816_s23  ;;  %s6585_s19 = smov [#allocation7]  }
  0xa1   : > { %s761_s7 = sshll.u32 %s754_s10, 4  ;;  %p6966_p13 = pnand %p5872_p9, %p6931_p1  ;;  %s762_s7 = int_to_ptr.vmem [resolvable:$true] %s761_s7 }
  0xa2   : > { %s6273_s2 = scalar_lea.vmem %s762_s7, 16  ;;  %s6278_s11 = sshll.u32 %s6585_s19, 4  ;;  %s6279_s11 = int_to_ptr.vmem [resolvable:$false] %s6278_s11 }
  0xa3   : > { %p6274_p0 = scmp.ne.s32.totalorder %s762_s7, %s6273_s2  ;;  %s6280_s8 = scalar_lea.vmem %s6279_s11, 32 }
  0xa4   : > { %p6281_p6 = scmp.lt.s32.totalorder %s762_s7, %s6279_s11  ;;  %p6282_p7 = scmp.lt.s32.totalorder %s6280_s8, %s6273_s2 }
  0xa5   : > { %s759_s13 = scalar_lea.hbm %s8204_s16, %s6819_s1  ;;  %p6276_p3 = pnand %p6274_p0, %p8125_p12 }
  0xa6   : > { %p6283_p5 = por %p6282_p7, %p6281_p6 }
  0xa7   : > { %p6277_p4 = pneg %p6276_p3 }
  0xa9   : > { %p6284_p8 = pnand %p6283_p5, %p6277_p4 }
  0xab   : > { %6287 = shalt.err (!%p6284_p8)
}
  0xac   : > { %s8206_s0 = scalar_lea.sflag [#allocation6], %s6807_s15  ;;  %p6290_p9 = pneg %p6966_p13 }
  0xad   : > { %5882 = dma.hbm_to_vmem [thread:$0]  (!%p6830_p10), %s759_s13, 16, %s762_s7, %s8206_s0  }
  0xae   : > { %s6299_s21 = scalar_lea.vmem %s6957_s3, 128  ;;  %p6307_p1 = scmp.lt.s32.totalorder %s6957_s3, %s6957_s3 }
  0xaf   : > { %p6300_p0 = scmp.ne.s32.totalorder %s6957_s3, %s6299_s21  ;;  %p6308_p7 = scmp.lt.s32.totalorder %s6299_s21, %s6299_s21 }
  0xb1   : > { %p6302_p3 = pnand %p6300_p0, %p6290_p9  ;;  %p6309_p5 = por %p6308_p7, %p6307_p1 }
  0xb3   : > { %p6303_p12 = pneg %p6302_p3 }
  0xb5   : > { %p6310_p8 = pnand %p6309_p5, %p6303_p12 }
  0xb7   : > { %6313 = shalt.err (!%p6310_p8)
}
  0xb8   : > { %s8207_s2 = sld [smem:[#allocation57_spill]]  ;;  %s788_s19 = scalar_lea.vmem [#allocation10], %s6859_s25 }
  0xb9   : > { %s8208_s10 = sld [smem:[#allocation63_spill]]  ;;  %s797_s0 = sshll.u32 %s788_s19, 4  ;;  %s798_s0 = int_to_ptr.vmem [resolvable:$true] %s797_s0 }
  0xba   : > { %s6327_s21 = scalar_lea.vmem %s798_s0, 16  ;;  %s6586_s28 = smov [#allocation10]  }
  0xbb   : > { %p6328_p12 = scmp.ne.s32.totalorder %s798_s0, %s6327_s21  ;;  %s6332_s12 = sshll.u32 %s6586_s28, 4  ;;  %s6333_s12 = int_to_ptr.vmem [resolvable:$false] %s6332_s12 }
  0xbc   : > { %s6334_s8 = scalar_lea.vmem %s6333_s12, 32  ;;  %p6335_p6 = scmp.lt.s32.totalorder %s798_s0, %s6333_s12 }
  0xbd   : > { %p6330_p1 = pnand %p6328_p12, %p6880_p2  ;;  %p6336_p9 = scmp.lt.s32.totalorder %s6334_s8, %s6327_s21 }
  0xbe   : > { %5875 = dma.hbm_to_vmem [thread:$0]  (!%p6966_p13), %s8207_s2, 128, %s6957_s3, [#allocation4]  }
  0xbf   : > { %s795_s7 = scalar_lea.hbm %s8208_s10, %s6870_s26  ;;  %p6331_p4 = pneg %p6330_p1 }
  0xc0   : > { %p6337_p0 = por %p6336_p9, %p6335_p6 }
  0xc2   : > { %p6338_p13 = pnand %p6337_p0, %p6331_p4 }
  0xc4   : > { %6341 = shalt.err (!%p6338_p13)
}
  0xc5   : > { %s8209_s3 = scalar_lea.sflag [#allocation9], %s6807_s15  ;;  %s8210_s16 = sld [smem:[#allocation66_spill]] }
  0xc6   : > { %5888 = dma.hbm_to_vmem [thread:$0]  (!%p6839_p11), %s795_s7, 16, %s798_s0, %s8209_s3  }
  0xc7   : > { %s838_s10 = scalar_lea.vmem [#allocation13], %s6859_s25  ;;  %s6587_s21 = smov [#allocation13]  }
  0xc8   : > { %s847_s19 = sshll.u32 %s838_s10, 4  ;;  %s6360_s28 = sshll.u32 %s6587_s21, 4  ;;  %s848_s19 = int_to_ptr.vmem [resolvable:$true] %s847_s19  ;;  %s6361_s28 = int_to_ptr.vmem [resolvable:$false] %s6360_s28 }
  0xc9   : > { %s6355_s12 = scalar_lea.vmem %s848_s19, 16  ;;  %s6362_s8 = scalar_lea.vmem %s6361_s28, 32 }
  0xca   : > { %p6356_p3 = scmp.ne.s32.totalorder %s848_s19, %s6355_s12  ;;  %p6363_p8 = scmp.lt.s32.totalorder %s848_s19, %s6361_s28 }
  0xcb   : > { %s845_s13 = scalar_lea.hbm %s8210_s16, %s6870_s26  ;;  %p6364_p12 = scmp.lt.s32.totalorder %s6362_s8, %s6355_s12 }
  0xcc   : > { %p6358_p7 = pnand %p6356_p3, %p6880_p2 }
  0xcd   : > { %p6365_p1 = por %p6364_p12, %p6363_p8 }
  0xce   : > { %p6359_p5 = pneg %p6358_p7 }
  0xd0   : > { %p6366_p4 = pnand %p6365_p1, %p6359_p5 }
  0xd2   : > { %6369 = shalt.err (!%p6366_p4)
}
  0xd3   : > { %s8211_s7 = scalar_lea.sflag [#allocation12], %s6807_s15  ;;  %s8212_s11 = sld [smem:[#allocation69_spill]] }
  0xd4   : > { %5894 = dma.hbm_to_vmem [thread:$0]  (!%p6839_p11), %s845_s13, 16, %s848_s19, %s8211_s7  }
  0xd5   : > { %s888_s16 = scalar_lea.vmem [#allocation16], %s6859_s25  ;;  %s6588_s12 = smov [#allocation16]  }
  0xd6   : > { %s897_s10 = sshll.u32 %s888_s16, 4  ;;  %s6388_s28 = sshll.u32 %s6588_s12, 4  ;;  %s898_s10 = int_to_ptr.vmem [resolvable:$true] %s897_s10  ;;  %s6389_s28 = int_to_ptr.vmem [resolvable:$false] %s6388_s28 }
  0xd7   : > { %s6383_s21 = scalar_lea.vmem %s898_s10, 16  ;;  %s6390_s8 = scalar_lea.vmem %s6389_s28, 32 }
  0xd8   : > { %p6384_p6 = scmp.ne.s32.totalorder %s898_s10, %s6383_s21  ;;  %p6391_p13 = scmp.lt.s32.totalorder %s898_s10, %s6389_s28 }
  0xd9   : > { %s895_s2 = scalar_lea.hbm %s8212_s11, %s6870_s26  ;;  %p6392_p3 = scmp.lt.s32.totalorder %s6390_s8, %s6383_s21 }
  0xda   : > { %p6386_p9 = pnand %p6384_p6, %p6880_p2 }
  0xdb   : > { %p6393_p7 = por %p6392_p3, %p6391_p13 }
  0xdc   : > { %p6387_p0 = pneg %p6386_p9 }
  0xde   : > { %p6394_p5 = pnand %p6393_p7, %p6387_p0 }
  0xe0   : > { %6397 = shalt.err (!%p6394_p5)
}
  0xe1   : > { %s8213_s13 = scalar_lea.sflag [#allocation15], %s6807_s15  ;;  %s8214_s0 = sld [smem:[#allocation72_spill]] }
  0xe2   : > { %5900 = dma.hbm_to_vmem [thread:$0]  (!%p6839_p11), %s895_s2, 16, %s898_s10, %s8213_s13  }
  0xe3   : > { %s938_s11 = scalar_lea.vmem [#allocation19], %s6859_s25  ;;  %s6589_s21 = smov [#allocation19]  }
  0xe4   : > { %s947_s16 = sshll.u32 %s938_s11, 4  ;;  %s6416_s28 = sshll.u32 %s6589_s21, 4  ;;  %s948_s16 = int_to_ptr.vmem [resolvable:$true] %s947_s16  ;;  %s6417_s28 = int_to_ptr.vmem [resolvable:$false] %s6416_s28 }
  0xe5   : > { %s6411_s12 = scalar_lea.vmem %s948_s16, 16  ;;  %s6418_s8 = scalar_lea.vmem %s6417_s28, 32 }
  0xe6   : > { %p6412_p8 = scmp.ne.s32.totalorder %s948_s16, %s6411_s12  ;;  %p6419_p4 = scmp.lt.s32.totalorder %s948_s16, %s6417_s28 }
  0xe7   : > { %s945_s3 = scalar_lea.hbm %s8214_s0, %s6870_s26  ;;  %p6420_p6 = scmp.lt.s32.totalorder %s6418_s8, %s6411_s12 }
  0xe8   : > { %p6414_p12 = pnand %p6412_p8, %p6880_p2 }
  0xe9   : > { %p6421_p9 = por %p6420_p6, %p6419_p4 }
  0xea   : > { %p6415_p1 = pneg %p6414_p12 }
  0xec   : > { %p6422_p0 = pnand %p6421_p9, %p6415_p1 }
  0xee   : > { %6425 = shalt.err (!%p6422_p0)
}
  0xef   : > { %s8215_s25 = scalar_lea.sflag [#allocation18], %s6807_s15  ;;  %s8216_s2 = sld [smem:[#allocation76_spill]] }
  0xf0   : > { %5906 = dma.hbm_to_vmem [thread:$0]  (!%p6839_p11), %s945_s3, 16, %s948_s16, %s8215_s25  }
  0xf1   : > { %s996_s13 = scalar_lea.vmem [#allocation22], %s6816_s23  ;;  %p8217_p13 = pneg %p6830_p10 }
  0xf2   : > { %s1003_s19 = sshll.u32 %s996_s13, 4  ;;  %s6590_s22 = smov [#allocation22]   ;;  %s1004_s19 = int_to_ptr.vmem [resolvable:$true] %s1003_s19 }
  0xf3   : > { %s6439_s7 = scalar_lea.vmem %s1004_s19, 16  ;;  %s6444_s0 = sshll.u32 %s6590_s22, 4  ;;  %s6445_s0 = int_to_ptr.vmem [resolvable:$false] %s6444_s0 }
  0xf4   : > { %p6440_p2 = scmp.ne.s32.totalorder %s1004_s19, %s6439_s7  ;;  %s6446_s11 = scalar_lea.vmem %s6445_s0, 32 }
  0xf5   : > { %s1001_s10 = scalar_lea.hbm %s8216_s2, %s6819_s1  ;;  %p6447_p5 = scmp.lt.s32.totalorder %s1004_s19, %s6445_s0 }
  0xf6   : > { %p6442_p3 = pnand %p6440_p2, %p8217_p13  ;;  %p6448_p8 = scmp.lt.s32.totalorder %s6446_s11, %s6439_s7 }
  0xf8   : > { %p6443_p7 = pneg %p6442_p3  ;;  %p6449_p11 = por %p6448_p8, %p6447_p5 }
  0xfa   : > { %p6450_p12 = pnand %p6449_p11, %p6443_p7 }
  0xfc   : > { %6453 = shalt.err (!%p6450_p12)
}
  0xfd   : > { %s8218_s23 = scalar_lea.sflag [#allocation21], %s6807_s15  ;;  %p8219_p1 = scmp.ne.s32.totalorder %s8203_s24, 0 }
  0xfe   : > { %5912 = dma.hbm_to_vmem [thread:$0]  (!%p6830_p10), %s1001_s10, 16, %s1004_s19, %s8218_s23  }
  0xff   : > { %1012 = sbr.rel (%p8219_p1) target bundleno = 3236 (0xca4), region = 104 }
 0x104   : > { %p8220_p4 = scmp.ne.s32.totalorder %s8200_s20, 0 }
 0x106   : > { %6499 = dma.done.wait (%p8220_p4), [#allocation4], 128  }
 0x107   : > { %6501 = vsyncadd (%p8220_p4), [#allocation4], 4294967168  ;;  %s8221_s1 = sadd.s32 4294967295, %s6576_s6   ;;  %s7056_s17 = sand.u32 1, %s6552_s4  }
 0x108   : > { %s7053_s3 = sand.u32 1, %s8221_s1   ;;  %p8222_p10 = scmp.ne.s32.totalorder %s8201_s9, 0 }
 0x109   : > { %s1019_s15 = scalar_lea.sflag [#allocation6], %s7053_s3 }
 0x10a   : > { %6503 = dma.done.wait (%p8222_p10), %s1019_s15, 32  }
 0x10b   : > { %6505 = vsyncadd (%p8222_p10), %s1019_s15, 4294967264  ;;  %s1035_s24 = scalar_lea.sflag [#allocation9], %s7053_s3 }
 0x10c   : > { %6507 = dma.done.wait (%p8222_p10), %s1035_s24, 16  }
 0x10d   : > { %6509 = vsyncadd (%p8222_p10), %s1035_s24, 4294967280  ;;  %s8223_s21 = sld [smem:[#allocation32_spill]]  ;;  %p8224_p6 = scmp.ne.s32.totalorder %s8202_s30, 0 }
 0x113   : > { %s7072_s28 = sand.u32 1, %s8223_s21  }
 0x114   : > { %6511 = dma.done.wait (%p8224_p6), %s1035_s24, 16  }
 0x115   : > { %6513 = vsyncadd (%p8224_p6), %s1035_s24, 4294967280  ;;  %s1051_s25 = scalar_lea.sflag [#allocation12], %s7053_s3 }
 0x116   : > { %6515 = dma.done.wait (%p8224_p6), %s1051_s25, 32  }
 0x117   : > { %6517 = vsyncadd (%p8224_p6), %s1051_s25, 4294967264  ;;  %s1067_s2 = scalar_lea.sflag [#allocation15], %s7053_s3 }
 0x118   : > { %6519 = dma.done.wait (%p8224_p6), %s1067_s2, 32  }
 0x119   : > { %6521 = vsyncadd (%p8224_p6), %s1067_s2, 4294967264  ;;  %s1083_s19 = scalar_lea.sflag [#allocation18], %s7053_s3 }
 0x11a   : > { %6523 = dma.done.wait (%p8224_p6), %s1083_s19, 32  }
 0x11b   : > { %6525 = vsyncadd (%p8224_p6), %s1083_s19, 4294967264  ;;  %s1099_s0 = scalar_lea.sflag [#allocation21], %s7053_s3 }
 0x11c   : > { %6527 = dma.done.wait (%p8224_p6), %s1099_s0, 16  }
 0x11d   : > { %6529 = vsyncadd (%p8224_p6), %s1099_s0, 4294967280 }
 0x11e   : > { %6531 = dma.done.wait (%p8222_p10), %s1099_s0, 16  }
 0x11f   : > { %6533 = vsyncadd (%p8222_p10), %s1099_s0, 4294967280  ;;  %s8225_s1 = sld [smem:[#allocation37_spill]] }
 0x120   : > { %s8226_s15 = sld [smem:[#allocation36_spill]] }
 0x121   : > { %s8227_s2 = sld [smem:[#allocation56_spill]] }
 0x122   : > { %s8228_s23 = sld [smem:[#allocation58_spill]] }
 0x123   : > { %s8229_s13 = sld [smem:[#allocation60_spill]] }
 0x124   : > { %s8230_s18 = sld [smem:[#allocation65_spill]] }
 0x125   : > { %p1273_p9 = scmp.lt.s32.totalorder %s8225_s1, 2  ;;  %s8232_s0 = sld [smem:[#allocation71_spill]] }
 0x126   : > { %p1290_p0 = scmp.lt.s32.totalorder %s8226_s15, 1  ;;  %s8236_s19 = sld [smem:[#allocation77_spill]] }
 0x127   : > { %s8294_s1 = smov (!%p1273_p9, %s8225_s1), 2  ;;  %p5647_p2 = scmp.ne.s32.totalorder %s8226_s15, 0 }
 0x128   : > { %s1291_s3 = scalar_select %p1290_p0, %s8226_s15, 1 }
 0x129   : > { %s7115_s24 = sshll.u32 %s8294_s1, 3  ;;  %s5640_s30 = sshll.u32 %s8294_s1, 4 }
 0x12a   : > { %s1277_s9 = scalar_lea.vmem %s8227_s2, %s7115_s24  ;;  %s1282_s11 = scalar_lea.vmem %s8228_s23, %s7115_s24 }
 0x12b   : > { %s1287_s10 = scalar_lea.vmem %s8229_s13, %s7115_s24  ;;  %s5630_s27 = sshll.u32 %s1291_s3, 2 }
 0x12c   : > { %s1294_s26 = sadd.s32 %s7115_s24, %s5630_s27  ;;  %s5639_s8 = sshll.u32 %s1291_s3, 3 }
 0x12d   : > { %s5632_s12 = sshll.u32 %s1294_s26, 2  ;;  %s1321_s20 = sadd.s32 %s5640_s30, %s5639_s8 }
 0x12e   : > { %s7133_s5 = scalar_lea.vmem %s8230_s18, %s5632_s12  ;;  %s8231_s2 = sld [smem:[#allocation67_spill]] }
 0x12f   : > { %s7143_s7 = scalar_lea.vmem %s8232_s0, %s5632_s12  ;;  %s5641_s13 = sshll.u32 %s1321_s20, 2 }
 0x130   : > { %s8233_s26 = sld [smem:[#allocation73_spill]]  ;;  %s5644_s24 = sshll.u32 %s8294_s1, 1 }
 0x131   : > { %s8234_s18 = sld [smem:[#allocation75_spill]]  ;;  %s7163_s20 = scalar_lea.vmem %s8236_s19, %s5644_s24 }
 0x132   : > { %s8238_s1 = scalar_lea.vmem (!%p5647_p2), [#allocation7], %s7056_s17 }
 0x134   : > { %s7138_s4 = scalar_lea.vmem %s8231_s2, %s5632_s12  ;;  %s8235_s2 = sld [smem:[#allocation78_spill]] }
 0x136   : > { %s7148_s8 = scalar_lea.vmem %s8233_s26, %s5641_s13  ;;  %1342 = sbr.rel (%p5647_p2) target bundleno = 524 (0x20c), region = 160 }
 0x137   : > { %s7153_s16 = scalar_lea.vmem %s8234_s18, %s5640_s30 }
 0x13a   : > { %s7158_s29 = scalar_lea.vmem %s8235_s2, %s5640_s30 }
 0x13b   : > { %v6023_v0 = vld [vmem:[%s1282_s11] sm:$0xff]   ;;  %v6591_v1 = vmov 0.0   ;;  %vm6592_vm0 = vmmov 0   ;;  %vm1365_vm1 = vcmask 130048   ;;  %v1409_v4 = vld [vmem:[#allocation3] sm:$0x1f] }
 0x13c   : > { %5756 = vmatprep.subr.bf16.mxu0 %v6591_v1  ;;  %5762 = vmatprep.subr.bf16.mxu1 %v6591_v1  ;;  %v6024_v2 = vld [vmem:[%s1287_s10] sm:$0xff]   ;;  %v1413_v6 = vpack.c.bf16 %v1409_v4, %v1409_v4  ;;  %s8237_s11 = scalar_lea.vmem [#allocation5], %s7056_s17  ;;  %s8239_s10 = scalar_lea.vmem [#allocation8], %s7056_s17  ;;  %vm1474_vm2 = vcmask 1042432   ;;  %vm1475_vm3 = vcmask 1046532   ;;  %vm1486_vm4 = vcmask 253952  }
 0x13d   : > { %5757 = vmatpush3.bf16.msra.mxu0 %v6023_v0  ;;  %5758 = vmatprep.mubr.msk.bf16.mxu0 %vm6592_vm0, %v6591_v1  ;;  %v6025_v3 = vld [vmem:[%s1277_s9] sm:$0xff]   ;;  %vm1476_vm5 = vmor %vm1474_vm2, %vm1475_vm3  ;;  %vm1489_vm6 = vcmask 257024  }
 0x13e   : > { %5763 = vmatpush3.bf16.msra.mxu1 %v6024_v2  ;;  %5764 = vmatprep.mubr.msk.bf16.mxu1 %vm6592_vm0, %v6591_v1  ;;  %v1352_v5 = vpack.c.bf16 %v6025_v3, %v6025_v3  ;;  %v5648_v7 = vld [vmem:[%s8237_s11] ss:$0 sm:$0xff] }
 0x13f   : > { %v5651_v8 = vld [vmem:[%s8238_s1] ss:$0 sm:$0xff] }
 0x140   : > { %5759 = vmatmul.mubr.msk.bf16.vlgmr.msra.gmra.mxu0 %vm1365_vm1, %v1352_v5  ;;  %v1484_v11 = vld [vmem:[%s8239_s10] sm:$0x1] }
 0x141   : > { %5765 = vmatmul.mubr.msk.bf16.vlgmr.msra.gmra.mxu1 %vm1365_vm1, %v1413_v6 }
 0x200   : > { %v1403_v9 = vpop.f32.mrf.mxu0 }
 0x201   : > { %v1463_v10 = vpop.f32.mrf.mxu1  ;;  %v1404_v12 = vadd.f32 %v5648_v7, %v1403_v9 }
 0x202   : > { %v1464_v13 = vadd.f32 %v5651_v8, %v1463_v10  ;;  %v5760_v14 = vpop.f32.mrf.mxu0 }
 0x203   : > { %v5766_v15 = vpop.f32.mrf.mxu1  ;;  %v1470_v18 = vcombine.high %v1404_v12, %v1404_v12 }
 0x204   : > { %v1473_v16 = vcombine.high %v1464_v13, %v1464_v13  ;;  %v1485_v17 = vadd.f32 %v1484_v11, %v1464_v13  ;;  %v1406_v19 = vpop.f32.mrf.mxu0  ;;  %v5654_v21 = vrot.slane %v1464_v13, 9 }
 0x205   : > { %v1466_v20 = vpop.f32.mrf.mxu1 }
 0x206   : > { %v1479_v22 = vrot.slane %v1473_v16, 5  ;;  %1487 = vst.msk [vmem:[#allocation2] sm:$0x1] %vm1486_vm4, %v1485_v17  ;;  %1488 = vst.msk [vmem:[#allocation2 + $0x8] sm:$0x1] %vm1486_vm4, %v1485_v17  ;;  %v5761_v23 = vpop.f32.mrf.mxu0 }
 0x207   : > { %v5767_v24 = vpop.f32.mrf.mxu1 }
 0x208   : > { %v1480_v25 = vsel %vm1476_vm5, %v5654_v21, %v1479_v22 }
 0x209   : > { %v1482_v26 = vadd.f32 %v1480_v25, %v1404_v12  ;;  %v1483_v27 = vadd.f32 %v1480_v25, %v1470_v18 }
 0x20b   : > { %1490 = vst.msk [vmem:[#allocation2 + $0x1] sm:$0xf] %vm1489_vm6, %v1482_v26  ;;  %1491 = vst.msk [vmem:[#allocation2 + $0x9] sm:$0xf] %vm1489_vm6, %v1483_v27 }
 0x20c PF: > { %v1500_v29 = vlaneseq  ;;  %v6593_v30 = vmov 1966171168   ;;  %vm1668_vm7 = vcmask 254976   ;;  %vm1664_vm8 = vcmask 261120   ;;  %s8244_s15 = scalar_lea.vmem [#allocation10], %s7072_s28  ;;  %s8245_s30 = scalar_lea.vmem [#allocation11], %s7072_s28 }
 0x20d   : > { %v1498_v31 = vunpack.c.l.s4 %v6593_v30  ;;  %vm6595_vm9 = vmmov 0   ;;  %s8253_s9 = scalar_lea.vmem [#allocation13], %s7072_s28  ;;  %s6597_s0 = smov 96   ;;  %vm3317_vm13 = vcmask 35840   ;;  %vm3662_vm14 = vcmask 1041408  }
 0x20e   : > { %v7173_v33 = vshrl.u32 %v1500_v29, 7  ;;  %s6598_s13 = smov 123   ;;  %s6599_s27 = smov 118   ;;  %vm3568_vm15 = vcmask 39936   ;;  %vm3571_vm0 = vcmask 80896   ;;  %vm3574_vm1 = vcmask 121856  }
 0x20f   : > { %v1499_v34 = vunpack.c.0.s8 %v1498_v31  ;;  %s6600_s22 = smov 113   ;;  %s6603_s26 = smov 64   ;;  %vm3658_vm2 = vcmask 162816   ;;  %vm4796_vm3 = vcmask 523264   ;;  %vm5024_vm4 = vcmask 258048  }
 0x210   : > { %s6604_s3 = smov 5   ;;  %s6605_s14 = smov 10  }
 0x211   : > { %v7176_v37 = vsub.s32 %v1499_v34, %v7173_v33  ;;  %s6606_s18 = smov 15   ;;  %s8261_s24 = scalar_lea.vmem [#allocation16], %s7072_s28 }
 0x212   : > { %v1493_v28 = vld [vmem:[#allocation2 + $0x8] sm:$0x1f]  ;;  %v1492_v32 = vld [vmem:[#allocation2] sm:$0x1f]  ;;  %s8262_s21 = scalar_lea.vmem [#allocation17], %s7072_s28 }
 0x213   : > { %v1535_v35 = vcombine.high %v1493_v28, %v1493_v28  ;;  %v1496_v36 = vcombine.high %v1492_v32, %v1492_v32  ;;  %v1542_v38 = vrot.slane %v1493_v28, %v7176_v37  ;;  %v1503_v40 = vrot.slane %v1492_v32, %v7176_v37 }
 0x215   : > { %v1549_v39 = vrot.slane %v1535_v35, %v7176_v37  ;;  %v1510_v41 = vrot.slane %v1496_v36, %v7176_v37  ;;  %v1550_v42 = vcombine.high %v1542_v38, %v1542_v38  ;;  %v1511_v44 = vcombine.high %v1503_v40, %v1503_v40 }
 0x216   : > { %v7186_v45 = vrot.slane %v1503_v40, %v7176_v37  ;;  %v7192_v47 = vrot.slane %v1542_v38, %v7176_v37  ;;  %v8131_v40 = vmov 0.0  }
 0x217   : > { %v7183_v43 = vrot.slane %v1549_v39, %v7176_v37  ;;  %v7189_v46 = vrot.slane %v1510_v41, %v7176_v37  ;;  %v7195_v48 = vrot.slane %v1550_v42, %v7176_v37  ;;  %v7198_v49 = vrot.slane %v1511_v44, %v7176_v37  ;;  %v6028_v39 = vld [vmem:[%s7133_s5 + $0x8] sm:$0xff]   ;;  %5768 = vmatprep.subr.bf16.mxu0 %v8131_v40  ;;  %v6029_v41 = vld [vmem:[%s7133_s5] sm:$0xff]   ;;  %s6596_s5 = smov 32  }
 0x218   : > { %v7204_v51 = vcombine.high %v7186_v45, %v7186_v45  ;;  %v7208_v52 = vcombine.high %v7192_v47, %v7192_v47  ;;  %v1675_v54 = vmul.f32 %v7186_v45, %v7186_v45  ;;  %v1680_v6 = vmul.f32 %v7192_v47, %v7192_v47  ;;  %5772 = vmatprep.mubr.msk.bf16.mxu0 %vm6595_vm9, %v8131_v40 }
 0x219   : > { %8240 = vst [vmem:[#allocation44_spill] sm:$0xff] %v7183_v43  ;;  %v1684_v50 = vmul.f32 %v7183_v43, %v7183_v43  ;;  %v1600_v53 = vcombine.low %v7189_v46, %v7192_v47  ;;  %v1679_v55 = vmul.f32 %v7189_v46, %v7189_v46  ;;  %v7218_v56 = vcombine.high %v7195_v48, %v7195_v48 }
 0x21a   : > { %8241 = vst [vmem:[#allocation45_spill] sm:$0xff] %v7208_v52  ;;  %v1598_v57 = vcombine.low %v7186_v45, %v7198_v49  ;;  %v5656_v58 = vcombine.high %v7186_v45, %v7198_v49  ;;  %v7226_v59 = vcombine.high %v7198_v49, %v7198_v49  ;;  %v1601_v60 = vcombine.low %v7195_v48, %v7208_v52 }
 0x21b   : > { %8242 = vst [vmem:[#allocation46_spill] sm:$0xff] %v7218_v56  ;;  %v1622_v61 = vrot.slane %v1600_v53, %v7176_v37  ;;  %v1676_v62 = vmul.f32 %v7198_v49, %v7198_v49  ;;  %v1677_v63 = vmul.f32 %v7204_v51, %v7204_v51  ;;  %v1647_v0 = vcombine.low %v7218_v56, %v7183_v43 }
 0x21c   : > { %v1608_v1 = vrot.slane %v1598_v57, %v7176_v37  ;;  %v1615_v2 = vrot.slane %v5656_v58, %v7176_v37  ;;  %v1683_v3 = vmul.f32 %v7218_v56, %v7218_v56  ;;  %v1629_v4 = vrot.slane %v1601_v60, %v7176_v37  ;;  %5769 = vmatpush3.bf16.msra.mxu0 %v6028_v39 }
 0x21d   : > { %v1678_v5 = vmul.f32 %v7226_v59, %v7226_v59  ;;  %v1681_v7 = vmul.f32 %v7195_v48, %v7195_v48  ;;  %v1654_v8 = vrot.slane %v1647_v0, %v7176_v37  ;;  %v1682_v11 = vmul.f32 %v7208_v52, %v7208_v52  ;;  %5776 = vmatprep.subr.bf16.mxu1 %v8131_v40 }
 0x21e   : > { %v1630_v9 = vcombine.low %v1608_v1, %v1615_v2  ;;  %v1744_v10 = vcombine.low %v1683_v3, %v1684_v50  ;;  %v1631_v12 = vcombine.low %v1622_v61, %v1629_v4  ;;  %v1695_v13 = vcombine.low %v1675_v54, %v1676_v62  ;;  %5770 = vmatprep.subr.bf16.mxu0 %v8131_v40 }
 0x21f   : > { %v1696_v14 = vcombine.low %v1677_v63, %v1678_v5  ;;  %v1697_v15 = vcombine.low %v1679_v55, %v1680_v6  ;;  %v1661_v16 = vrot.slane %v1654_v8, %v7176_v37  ;;  %v1698_v19 = vcombine.low %v1681_v7, %v1682_v11  ;;  %5780 = vmatprep.mubr.msk.bf16.mxu1 %vm6595_vm9, %v8131_v40 }
 0x220   : > { %v1638_v17 = vrot.slane %v1630_v9, %v7176_v37  ;;  %v1751_v18 = vrot.slane %v1744_v10, %v7176_v37  ;;  %v1645_v20 = vrot.slane %v1631_v12, %v7176_v37  ;;  %v1705_v21 = vrot.slane %v1695_v13, %v7176_v37  ;;  %5771 = vmatpush3.bf16.msra.mxu0 %v6029_v41 }
 0x221   : > { %v1712_v22 = vrot.slane %v1696_v14, %v7176_v37  ;;  %v1719_v23 = vrot.slane %v1697_v15, %v7176_v37  ;;  %v1669_v24 = vsel %vm1668_vm7, %v1661_v16, 0.0  ;;  %v1726_v26 = vrot.slane %v1698_v19, %v7176_v37  ;;  %5784 = vmatprep.subr.bf16.mxu0 %v8131_v40 }
 0x222   : > { %v1758_v25 = vrot.slane %v1751_v18, %v7176_v37  ;;  %1670 = vadd.xlane.f32.xlu1 %v1669_v24  ;;  %v1646_v27 = vcombine.low %v1638_v17, %v1645_v20  ;;  %v1585_v42 = vand.u32 127, %v1500_v29  ;;  %v1588_v44 = vmul.u32 8, %v7173_v33  ;;  %v5657_v17 = vld [vmem:[%s8244_s15] ss:$0 sm:$0xff] }
 0x223   : > { %v1727_v28 = vcombine.low %v1705_v21, %v1712_v22  ;;  %v1728_v31 = vcombine.low %v1719_v23, %v1726_v26  ;;  %v7282_v60 = vsub.s32 0, %v7173_v33  ;;  %v1906_v21 = vcombine.high %v5657_v17, %v5657_v17  ;;  %v5658_v24 = vld [vmem:[%s8245_s30] ss:$0 sm:$0xff] }
 0x224   : > { %v1764_v30 = vsel %vm1668_vm7, %v1758_v25, 0.0  ;;  %v1665_v32 = vsel %vm1664_vm8, %v1646_v27, 0.0  ;;  %vm1589_vm10 = vcmp.ge.s32.totalorder %v1585_v42, %v1588_v44  ;;  %v1590_v50 = vadd.s32 8, %v1588_v44 }
 0x225   : > { %v1735_v34 = vrot.slane %v1727_v28, %v7176_v37  ;;  %1666 = vadd.xlane.f32.xlu0 %v1665_v32  ;;  %v1742_v35 = vrot.slane %v1728_v31, %v7176_v37  ;;  %8243 = vst [vmem:[#allocation47_spill] sm:$0xff] %v7282_v60  ;;  %v1913_v27 = vrot.slane %v5657_v17, %v7176_v37 }
 0x226   : > { %1765 = vadd.xlane.f32.xlu1 %v1764_v30  ;;  %vm1591_vm11 = vcmp.lt.s32.totalorder %v1585_v42, %v1590_v50  ;;  %v1920_v28 = vrot.slane %v1906_v21, %v7176_v37  ;;  %v1985_v41 = vrot.slane %v5658_v24, %v7176_v37 }
 0x227   : > { %v1743_v36 = vcombine.low %v1735_v34, %v1742_v35  ;;  %vm1592_vm12 = vmand %vm1589_vm10, %vm1591_vm11  ;;  %v1978_v34 = vcombine.high %v5658_v24, %v5658_v24  ;;  %v7322_v44 = vrot.slane %v1913_v27, %v7176_v37 }
 0x228   : > { %v5655_v53 = vsel %vm1592_vm12, 1.0, %v8131_v40  ;;  %v1922_v39 = vcombine.high %v1920_v28, %v1920_v28  ;;  %v7325_v50 = vrot.slane %v1920_v28, %v7176_v37 }
 0x229   : > { %v1761_v38 = vsel %vm1664_vm8, %v1743_v36, 0.0  ;;  %v1595_v54 = vpack.c.bf16 %v5655_v53, %v5655_v53  ;;  %v1921_v36 = vcombine.high %v1913_v27, %v1913_v27  ;;  %v1992_v42 = vrot.slane %v1978_v34, %v7176_v37 }
 0x22a   : > { %1762 = vadd.xlane.f32.xlu0 %v1761_v38 }
 0x22b   : > { %v2351_v55 = vrot.slane %v1595_v54, %v7176_v37  ;;  %v7328_v53 = vrot.slane %v1921_v36, %v7176_v37  ;;  %v7331_v54 = vrot.slane %v1922_v39, %v7176_v37 }
 0x22d   : > { %v2359_v57 = vrot.slane %v2351_v55, %v7176_v37  ;;  %v2352_v58 = vcombine.high %v2351_v55, %v2351_v55  ;;  %v1993_v55 = vcombine.high %v1985_v41, %v1985_v41 }
 0x22f   : > { %v2368_v61 = vunpack.i.h.s16 %v2359_v57  ;;  %v5664_v62 = vpack.i.b16 %v2359_v57, %v2359_v57  ;;  %v2366_v29 = vrot.slane %v2352_v58, %v7176_v37  ;;  %v1994_v57 = vcombine.high %v1992_v42, %v1992_v42 }
 0x230   : > { %v7334_v58 = vsub.s32 1, %v7173_v33 }
 0x231   : > { %v2372_v63 = vpack.i.b16 %v2368_v61, %v2368_v61  ;;  %v2378_v0 = vrot.slane %v5664_v62, %v7282_v60  ;;  %v5665_v1 = vpack.i.b16 %v2366_v29, %v2366_v29  ;;  %v2370_v2 = vunpack.i.h.s16 %v2366_v29 }
 0x232   : > { %8246 = vst [vmem:[#allocation48_spill] sm:$0xff] %v7334_v58  ;;  %v7337_v61 = vsub.s32 2, %v7173_v33  ;;  %v7340_v62 = vsub.s32 3, %v7173_v33  ;;  %v7343_v29 = vsub.s32 4, %v7173_v33 }
 0x233   : > { %v2382_v3 = vrot.slane %v2372_v63, %v7282_v60  ;;  %v2374_v4 = vpack.i.b16 %v2370_v2, %v2370_v2  ;;  %v2392_v6 = vpack.i.b16 %v2378_v0, %v2378_v0  ;;  %v2386_v7 = vrot.slane %v5665_v1, %v7282_v60 }
 0x234   : > { %8247 = vst [vmem:[#allocation49_spill] sm:$0xff] %v7337_v61  ;;  %8248 = vst [vmem:[#allocation50_spill] sm:$0xff] %v7340_v62  ;;  %v7346_v63 = vsub.s32 5, %v7173_v33  ;;  %v7349_v0 = vsub.s32 6, %v7173_v33  ;;  %v7352_v1 = vsub.s32 7, %v7173_v33  ;;  %v1951_v2 = vcombine.high %v7322_v44, %v7322_v44 }
 0x235   : > { %v2399_v5 = vpack.i.b16 %v2382_v3, %v2382_v3  ;;  %v2390_v8 = vrot.slane %v2374_v4, %v7282_v60  ;;  %v7294_v11 = vrot.slane %v2392_v6, %v7282_v60  ;;  %v2406_v12 = vpack.i.b16 %v2386_v7, %v2386_v7  ;;  %8249 = vst [vmem:[#allocation51_spill] sm:$0xff] %v7343_v29 }
 0x236   : > { %8250 = vst [vmem:[#allocation52_spill] sm:$0xff] %v7346_v63  ;;  %8251 = vst [vmem:[#allocation53_spill] sm:$0xff] %v7349_v0  ;;  %v1952_v3 = vcombine.high %v7325_v50, %v7325_v50  ;;  %v7359_v4 = vrot.slane %v1985_v41, %v7176_v37  ;;  %v1953_v6 = vcombine.high %v7328_v53, %v7328_v53 }
 0x237   : > { %v7290_v9 = vrot.slane %v2399_v5, %v7282_v60  ;;  %v2413_v10 = vpack.i.b16 %v2390_v8, %v2390_v8  ;;  %v7302_v14 = vrot.slane %v2406_v12, %v7282_v60  ;;  %v7362_v5 = vrot.slane %v1992_v42, %v7176_v37 }
 0x238   : > { %v1954_v7 = vcombine.high %v7331_v54, %v7331_v54  ;;  %v7369_v8 = vrot.slane %v1993_v55, %v7176_v37 }
 0x239   : > { %2425 = vrot.lane.b32.xlu1 %v7290_v9, %s6596_s5  ;;  %v7297_v13 = vrot.slane %v2413_v10, %v7282_v60  ;;  %v7372_v10 = vrot.slane %v1994_v57, %v7176_v37  ;;  %v2024_v27 = vcombine.high %v7362_v5, %v7362_v5 }
 0x23d   : > { %2423 = vrot.lane.b32.xlu1 %v7294_v11, %s6596_s5 }
 0x240   : > { %2429 = vrot.lane.b32.xlu0 %v7297_v13, %s6596_s5 }
 0x241   : > { %2427 = vrot.lane.b32.xlu1 %v7302_v14, %s6596_s5 }
 0x2ab   : > { %v1671_v15 = vpop.xlane.xlu1 %1670 }
 0x2ac   : > { %v7305_v16 = vmul.f32 0.03125, %v1671_v15 }
 0x2ae   : > { %v1667_v18 = vpop.xlane.xlu0 %1666  ;;  %v1770_v19 = vmul.f32 %v7305_v16, %v7305_v16  ;;  %v1810_v12 = vrot.slane %v7305_v16, %v7282_v60  ;;  %v1814_v15 = vrot.slane %v7305_v16, %v7334_v58 }
 0x2af   : > { %v1766_v20 = vpop.xlane.xlu1 %1765  ;;  %v7311_v22 = vmul.f32 0.03125, %v1667_v18 }
 0x2b0   : > { %v1768_v23 = vmul.f32 0.03125, %v1766_v20  ;;  %v1833_v34 = vsub.f32 %v7218_v56, %v1810_v12 }
 0x2b1   : > { %v1769_v31 = vmul.f32 %v7311_v22, %v7311_v22  ;;  %v1778_v17 = vrot.slane %v7311_v22, %v7282_v60  ;;  %v1782_v18 = vrot.slane %v7311_v22, %v7334_v58  ;;  %v1790_v20 = vrot.slane %v7311_v22, %v7340_v62 }
 0x2b2   : > { %v1772_v25 = vsub.f32 %v1768_v23, %v1770_v19  ;;  %v1786_v19 = vrot.slane %v7311_v22, %v7337_v61  ;;  %v1794_v21 = vrot.slane %v7311_v22, %v7343_v29  ;;  %v1798_v23 = vrot.slane %v7311_v22, %v7346_v63 }
 0x2b3   : > { %v1763_v26 = vpop.xlane.xlu0 %1762  ;;  %v1802_v16 = vrot.slane %v7311_v22, %v7349_v0  ;;  %v1826_v36 = vsub.f32 %v7198_v49, %v1782_v18  ;;  %v1828_v39 = vsub.f32 %v7226_v59, %v1790_v20 }
 0x2b4   : > { %v1836_v30 = vadd.f32 1e-05, %v1772_v25  ;;  %v1767_v32 = vmul.f32 0.03125, %v1763_v26  ;;  %v1806_v25 = vrot.slane %v7311_v22, %v7352_v1  ;;  %v2023_v26 = vcombine.high %v7359_v4, %v7359_v4 }
 0x2b5   : > { %v1834_v22 = vsub.f32 %v7183_v43, %v1814_v15  ;;  %v1829_v41 = vsub.f32 %v7189_v46, %v1794_v21  ;;  %v1830_v42 = vsub.f32 %v7192_v47, %v1798_v23  ;;  %v1831_v57 = vsub.f32 %v7195_v48, %v1802_v16 }
 0x2b6   : > { %6038 = vrsqrt.f32 %v1836_v30  ;;  %v1771_v35 = vsub.f32 %v1767_v32, %v1769_v31  ;;  %v2025_v31 = vcombine.high %v7369_v8, %v7369_v8  ;;  %v2026_v32 = vcombine.high %v7372_v10, %v7372_v10 }
 0x2b8   : > { %v1835_v38 = vadd.f32 1e-05, %v1771_v35  ;;  %v1825_v35 = vsub.f32 %v7186_v45, %v1778_v17 }
 0x2ba   : > { %6040 = vrsqrt.f32 %v1835_v38  ;;  %v1827_v38 = vsub.f32 %v7204_v51, %v1786_v19 }
 0x2c3   : > { %v6039_v24 = vpop.eup %6038 }
 0x2c4   : > { %v1876_v28 = vrot.slane %v6039_v24, %v7282_v60  ;;  %v1880_v30 = vrot.slane %v6039_v24, %v7334_v58  ;;  %v1832_v24 = vsub.f32 %v7208_v52, %v1806_v25 }
 0x2c6   : > { %v1899_v12 = vmul.f32 %v1876_v28, %v1833_v34  ;;  %v1900_v40 = vmul.f32 %v1880_v30, %v1834_v22 }
 0x2c7   : > { %v6041_v55 = vpop.eup %6040 }
 0x2c8   : > { %v1844_v15 = vrot.slane %v6041_v55, %v7282_v60  ;;  %v1848_v17 = vrot.slane %v6041_v55, %v7334_v58  ;;  %v1852_v18 = vrot.slane %v6041_v55, %v7337_v61  ;;  %v1856_v19 = vrot.slane %v6041_v55, %v7340_v62 }
 0x2c9   : > { %v1860_v20 = vrot.slane %v6041_v55, %v7343_v29  ;;  %v1864_v21 = vrot.slane %v6041_v55, %v7346_v63  ;;  %v1868_v23 = vrot.slane %v6041_v55, %v7349_v0  ;;  %v1872_v16 = vrot.slane %v6041_v55, %v7352_v1 }
 0x2ca   : > { %v1891_v43 = vmul.f32 %v1844_v15, %v1825_v35  ;;  %v1892_v25 = vmul.f32 %v1848_v17, %v1826_v36  ;;  %v1893_v28 = vmul.f32 %v1852_v18, %v1827_v38  ;;  %v1894_v30 = vmul.f32 %v1856_v19, %v1828_v39 }
 0x2cb   : > { %v1895_v34 = vmul.f32 %v1860_v20, %v1829_v41  ;;  %v1896_v22 = vmul.f32 %v1864_v21, %v1830_v42  ;;  %v1897_v60 = vmul.f32 %v1868_v23, %v1831_v57  ;;  %v1898_v58 = vmul.f32 %v1872_v16, %v1832_v24  ;;  %v2426_v23 = vpop.permute.xlu1 %2425 }
 0x2cc   : > { %v1963_v61 = vmul.f32 %v7322_v44, %v1891_v43  ;;  %v1964_v62 = vmul.f32 %v7328_v53, %v1892_v25  ;;  %v1965_v52 = vmul.f32 %v1951_v2, %v1893_v28  ;;  %v1966_v29 = vmul.f32 %v1953_v6, %v1894_v30 }
 0x2cd   : > { %v1967_v63 = vmul.f32 %v7325_v50, %v1895_v34  ;;  %v1968_v0 = vmul.f32 %v7331_v54, %v1896_v22  ;;  %v1969_v56 = vmul.f32 %v1952_v3, %v1897_v60  ;;  %v1970_v55 = vmul.f32 %v1954_v7, %v1898_v58 }
 0x2ce   : > { %v1971_v35 = vmul.f32 %v7322_v44, %v1899_v12  ;;  %v1972_v36 = vmul.f32 %v7328_v53, %v1900_v40  ;;  %v2035_v38 = vadd.f32 %v7359_v4, %v1963_v61  ;;  %v2036_v39 = vadd.f32 %v7369_v8, %v1964_v62 }
 0x2cf   : > { %v2037_v41 = vadd.f32 %v2023_v26, %v1965_v52  ;;  %v2038_v43 = vadd.f32 %v2025_v31, %v1966_v29  ;;  %v2039_v42 = vadd.f32 %v7362_v5, %v1967_v63  ;;  %v2040_v2 = vadd.f32 %v7372_v10, %v1968_v0 }
 0x2d0   : > { %v2041_v6 = vadd.f32 %v2024_v27, %v1969_v56  ;;  %v2042_v50 = vadd.f32 %v2026_v32, %v1970_v55  ;;  %v2043_v54 = vadd.f32 %v7359_v4, %v1971_v35  ;;  %v2044_v60 = vadd.f32 %v7369_v8, %v1972_v36  ;;  %v5659_v27 = vld [vmem:[%s8253_s9] ss:$0 sm:$0xff] }
 0x2d1   : > { %v2060_v58 = vcombine.low %v2035_v38, %v2036_v39  ;;  %v2061_v44 = vcombine.low %v2037_v41, %v2038_v43  ;;  %v2062_v3 = vcombine.low %v2039_v42, %v2040_v2  ;;  %v8252_v26 = vmov 0.0  }
 0x2d2   : > { %v2063_v40 = vcombine.low %v2041_v6, %v2042_v50  ;;  %v2109_v53 = vcombine.low %v2043_v54, %v2044_v60  ;;  %v2424_v50 = vpop.permute.xlu1 %2423 }
 0x2d3   : > { %v2070_v61 = vrot.slane %v2060_v58, %v7176_v37  ;;  %v2077_v52 = vrot.slane %v2061_v44, %v7176_v37  ;;  %v2084_v62 = vrot.slane %v2062_v3, %v7176_v37 }
 0x2d4   : > { %v2091_v29 = vrot.slane %v2063_v40, %v7176_v37  ;;  %v2116_v0 = vrot.slane %v2109_v53, %v7176_v37 }
 0x2d5   : > { %v2092_v56 = vcombine.low %v2070_v61, %v2077_v52 }
 0x2d6   : > { %v2093_v63 = vcombine.low %v2084_v62, %v2091_v29  ;;  %v2123_v8 = vrot.slane %v2116_v0, %v7176_v37  ;;  %v2428_v62 = vpop.permute.xlu1 %2427 }
 0x2d7   : > { %v2100_v4 = vrot.slane %v2092_v56, %v7176_v37 }
 0x2d8   : > { %v2107_v5 = vrot.slane %v2093_v63, %v7176_v37 }
 0x2da   : > { %v2108_v7 = vcombine.low %v2100_v4, %v2107_v5 }
 0x2dc   : > { %v2126_v10 = vpack.c.bf16 %v2123_v8, %v2108_v7 }
 0x2de   : > { %5773 = vmatmul.mubr.msk.bf16.vlgmr.msra.gmra.mxu0 %vm1664_vm8, %v2126_v10 }
 0x2df   : > { %5788 = vmatprep.mubr.msk.bf16.mxu0 %vm6595_vm9, %v8252_v26 }
 0x39e   : > { %v2182_v31 = vpop.f32.mrf.mxu0 }
 0x39f   : > { %v2183_v32 = vadd.f32 %v5659_v27, %v2182_v31 }
 0x3a0   : > { %v5774_v57 = vpop.f32.mrf.mxu0 }
 0x3a1   : > { %v2191_v24 = vcombine.high %v2183_v32, %v2183_v32  ;;  %v2198_v12 = vrot.slane %v2183_v32, %v7176_v37  ;;  %v2430_v32 = vpop.permute.xlu0 %2429 }
 0x3a2   : > { %v2185_v15 = vpop.f32.mrf.mxu0 }
 0x3a3   : > { %v2205_v17 = vrot.slane %v2191_v24, %v7176_v37  ;;  %v2206_v18 = vcombine.high %v2198_v12, %v2198_v12  ;;  %v2186_v19 = vadd.f32 %v5659_v27, %v2185_v15  ;;  %v2214_v20 = vrot.slane %v2198_v12, %v7176_v37 }
 0x3a4   : > { %v5775_v21 = vpop.f32.mrf.mxu0 }
 0x3a5   : > { %v2207_v16 = vcombine.high %v2205_v17, %v2205_v17  ;;  %v2221_v25 = vrot.slane %v2205_v17, %v7176_v37  ;;  %v2228_v28 = vrot.slane %v2206_v18, %v7176_v37  ;;  %v2246_v30 = vrot.slane %v2186_v19, %v7176_v37 }
 0x3a7   : > { %v2235_v34 = vrot.slane %v2207_v16, %v7176_v37  ;;  %v2237_v22 = vcombine.high %v2221_v25, %v2221_v25  ;;  %v2262_v55 = vcombine.low %v2214_v20, %v2228_v28  ;;  %v5663_v35 = vcombine.high %v2214_v20, %v2228_v28 }
 0x3a8   : > { %v2284_v36 = vrot.slane %v2221_v25, %v7176_v37  ;;  %v2247_v38 = vcombine.high %v2246_v30, %v2246_v30  ;;  %v2254_v39 = vrot.slane %v2246_v30, %v7176_v37 }
 0x3a9   : > { %v2270_v41 = vrot.slane %v2262_v55, %v7176_v37  ;;  %v2277_v43 = vrot.slane %v5663_v35, %v7176_v37  ;;  %v2301_v42 = vcombine.low %v2235_v34, %v2237_v22  ;;  %v2239_v2 = vcombine.high %v2235_v34, %v2235_v34 }
 0x3aa   : > { %v2261_v6 = vrot.slane %v2247_v38, %v7176_v37  ;;  %v2299_v58 = vrot.slane %v2284_v36, %v7176_v37 }
 0x3ab   : > { %v2285_v54 = vcombine.low %v2270_v41, %v2277_v43  ;;  %v2302_v60 = vcombine.low %v2239_v2, %v2254_v39  ;;  %v2309_v3 = vrot.slane %v2301_v42, %v7176_v37 }
 0x3ac   : > { %v2323_v53 = vrot.slane %v2261_v6, %v7176_v37 }
 0x3ad   : > { %v2292_v44 = vrot.slane %v2285_v54, %v7176_v37  ;;  %v2316_v40 = vrot.slane %v2302_v60, %v7176_v37 }
 0x3ae   : > { %v2338_v63 = vrot.slane %v2323_v53, %v7176_v37 }
 0x3af   : > { %v2300_v61 = vcombine.low %v2292_v44, %v2299_v58  ;;  %v2324_v52 = vcombine.low %v2309_v3, %v2316_v40 }
 0x3b1   : > { %v7464_v29 = vpack.c.bf16 %v2300_v61, %v2300_v61  ;;  %v2331_v56 = vrot.slane %v2324_v52, %v7176_v37 }
 0x3b3   : > { %v2339_v0 = vcombine.low %v2331_v56, %v2338_v63  ;;  %v2436_v4 = vmul.bf16 %v2426_v23, %v7464_v29  ;;  %v2435_v5 = vmul.bf16 %v2424_v50, %v7464_v29  ;;  %v2437_v7 = vmul.bf16 %v2428_v62, %v7464_v29 }
 0x3b4   : > { %v2438_v16 = vmul.bf16 %v2430_v32, %v7464_v29 }
 0x3b5   : > { %v7471_v8 = vpack.c.bf16 %v2339_v0, %v2339_v0  ;;  %v2480_v10 = vrot.slane %v2436_v4, %v7176_v37  ;;  %v2457_v27 = vrot.slane %v2435_v5, %v7176_v37  ;;  %v2503_v31 = vrot.slane %v2437_v7, %v7176_v37 }
 0x3b6   : > { %v2526_v42 = vrot.slane %v2438_v16, %v7176_v37 }
 0x3b7   : > { %v2440_v57 = vmul.bf16 %v2426_v23, %v7471_v8  ;;  %v2481_v24 = vcombine.high %v2480_v10, %v2480_v10  ;;  %v2488_v12 = vrot.slane %v2480_v10, %v7176_v37  ;;  %v2439_v15 = vmul.bf16 %v2424_v50, %v7471_v8 }
 0x3b8   : > { %v2458_v17 = vcombine.high %v2457_v27, %v2457_v27  ;;  %v2465_v18 = vrot.slane %v2457_v27, %v7176_v37  ;;  %v2441_v23 = vmul.bf16 %v2428_v62, %v7471_v8  ;;  %v2504_v55 = vcombine.high %v2503_v31, %v2503_v31 }
 0x3b9   : > { %v2495_v19 = vrot.slane %v2481_v24, %v7176_v37  ;;  %v2572_v20 = vrot.slane %v2440_v57, %v7176_v37  ;;  %v2641_v21 = vunpack.i.h.s16 %v2488_v12  ;;  %v2549_v28 = vrot.slane %v2439_v15, %v7176_v37 }
 0x3ba   : > { %v2473_v25 = vcombine.high %v2465_v18, %v2465_v18  ;;  %v2472_v22 = vrot.slane %v2458_v17, %v7176_v37  ;;  %v2511_v43 = vrot.slane %v2503_v31, %v7176_v37  ;;  %v2496_v2 = vcombine.high %v2488_v12, %v2488_v12 }
 0x3bb   : > { %v2573_v30 = vcombine.high %v2572_v20, %v2572_v20  ;;  %v2580_v34 = vrot.slane %v2572_v20, %v7176_v37  ;;  %v2643_v35 = vunpack.i.h.s16 %v2495_v19  ;;  %v5667_v36 = vpack.i.b16 %v2495_v19, %v2641_v21 }
 0x3bc   : > { %v2557_v38 = vrot.slane %v2549_v28, %v7176_v37  ;;  %v5666_v39 = vpack.i.b16 %v2488_v12, %v2473_v25  ;;  %v2550_v50 = vcombine.high %v2549_v28, %v2549_v28  ;;  %v2937_v44 = vcombine.low %v2465_v18, %v2472_v22 }
 0x3bd   : > { %v2587_v41 = vrot.slane %v2573_v30, %v7176_v37  ;;  %v2661_v6 = vunpack.i.h.s16 %v2580_v34  ;;  %v2588_v60 = vcombine.high %v2580_v34, %v2580_v34  ;;  %v2595_v3 = vrot.slane %v2441_v23, %v7176_v37 }
 0x3be   : > { %v2565_v54 = vcombine.high %v2557_v38, %v2557_v38  ;;  %v2938_v40 = vcombine.low %v5666_v39, %v5667_v36  ;;  %v2518_v53 = vrot.slane %v2504_v55, %v7176_v37  ;;  %v5668_v61 = vpack.i.b16 %v2496_v2, %v2643_v35 }
 0x3bf   : > { %v2663_v58 = vunpack.i.h.s16 %v2587_v41  ;;  %v2442_v52 = vmul.bf16 %v2430_v32, %v7471_v8  ;;  %v2519_v62 = vcombine.high %v2511_v43, %v2511_v43  ;;  %v2603_v56 = vrot.slane %v2595_v3, %v7176_v37 }
 0x3c0   : > { %v2527_v0 = vcombine.high %v2526_v42, %v2526_v42  ;;  %v5674_v4 = vpack.i.b16 %v2587_v41, %v2661_v6  ;;  %v2564_v5 = vrot.slane %v2550_v50, %v7176_v37  ;;  %v5673_v7 = vpack.i.b16 %v2580_v34, %v2565_v54 }
 0x3c1   : > { %v5675_v63 = vpack.i.b16 %v2588_v60, %v2663_v58  ;;  %v2534_v10 = vrot.slane %v2526_v42, %v7176_v37  ;;  %v2947_v27 = vrot.slane %v2937_v44, %v7176_v37  ;;  %v2596_v31 = vcombine.high %v2595_v3, %v2595_v3 }
 0x3c2   : > { %v2939_v57 = vcombine.low %v5668_v61, %v2511_v43  ;;  %v2541_v24 = vrot.slane %v2527_v0, %v7176_v37  ;;  %v2611_v12 = vcombine.high %v2603_v56, %v2603_v56  ;;  %v2618_v32 = vrot.slane %v2442_v52, %v7176_v37 }
 0x3c3   : > { %v3066_v15 = vcombine.low %v5675_v63, %v2603_v56  ;;  %v2651_v17 = vunpack.i.h.s16 %v2534_v10  ;;  %v2542_v18 = vcombine.high %v2534_v10, %v2534_v10  ;;  %v5669_v20 = vpack.i.b16 %v2534_v10, %v2519_v62 }
 0x3c4   : > { %v2653_v19 = vunpack.i.h.s16 %v2541_v24  ;;  %v2954_v21 = vrot.slane %v2938_v40, %v7176_v37  ;;  %v3064_v16 = vcombine.low %v2557_v38, %v2564_v5  ;;  %v3065_v25 = vcombine.low %v5673_v7, %v5674_v4 }
 0x3c5   : > { %v2619_v28 = vcombine.high %v2618_v32, %v2618_v32  ;;  %v2626_v23 = vrot.slane %v2618_v32, %v7176_v37  ;;  %v2961_v30 = vrot.slane %v2939_v57, %v7176_v37  ;;  %v5670_v34 = vpack.i.b16 %v2541_v24, %v2651_v17 }
 0x3c6   : > { %v5671_v22 = vpack.i.b16 %v2542_v18, %v2653_v19  ;;  %v2940_v55 = vcombine.low %v2518_v53, %v5669_v20  ;;  %v2610_v35 = vrot.slane %v2596_v31, %v7176_v37  ;;  %v3088_v43 = vrot.slane %v3066_v15, %v7176_v37 }
 0x3c7   : > { %v2633_v36 = vrot.slane %v2619_v28, %v7176_v37  ;;  %v2671_v39 = vunpack.i.h.s16 %v2626_v23  ;;  %v5676_v41 = vpack.i.b16 %v2626_v23, %v2611_v12  ;;  %v2969_v2 = vcombine.low %v2947_v27, %v2954_v21 }
 0x3c8   : > { %v2986_v42 = vcombine.low %v5670_v34, %v5671_v22  ;;  %v2968_v38 = vrot.slane %v2940_v55, %v7176_v37  ;;  %v2634_v6 = vcombine.high %v2626_v23, %v2626_v23  ;;  %v3081_v60 = vrot.slane %v3065_v25, %v7176_v37 }
 0x3c9   : > { %v2673_v50 = vunpack.i.h.s16 %v2633_v36  ;;  %v3067_v54 = vcombine.low %v2610_v35, %v5676_v41  ;;  %v3074_v3 = vrot.slane %v3064_v16, %v7176_v37  ;;  %v5677_v40 = vpack.i.b16 %v2633_v36, %v2671_v39 }
 0x3ca   : > { %v2993_v58 = vrot.slane %v2986_v42, %v7176_v37  ;;  %v2970_v44 = vcombine.low %v2961_v30, %v2968_v38  ;;  %v2977_v62 = vrot.slane %v2969_v2, %v7176_v37  ;;  %v6601_v55 = vmov 1983009808  }
 0x3cb   : > { %v5678_v53 = vpack.i.b16 %v2634_v6, %v2673_v50  ;;  %v3095_v61 = vrot.slane %v3067_v54, %v7176_v37  ;;  %v3096_v0 = vcombine.low %v3074_v3, %v3081_v60  ;;  %v3204_v35 = vunpack.c.l.s4 %v6601_v55 }
 0x3cc   : > { %v3000_v52 = vrot.slane %v2993_v58, %v7176_v37  ;;  %v2984_v56 = vrot.slane %v2970_v44, %v7176_v37  ;;  %v6602_v41 = vmov 1934713408  }
 0x3cd   : > { %v3113_v63 = vcombine.low %v5677_v40, %v5678_v53  ;;  %v3097_v4 = vcombine.low %v3088_v43, %v3095_v61  ;;  %v3104_v31 = vrot.slane %v3096_v0, %v7176_v37  ;;  %v3205_v39 = vunpack.c.0.s8 %v3204_v35 }
 0x3ce   : > { %3003 = vrot.lane.b32.xlu0 %v3000_v52, %s6597_s0  ;;  %v2985_v5 = vcombine.low %v2977_v62, %v2984_v56  ;;  %v3236_v43 = vunpack.c.l.s4 %v6602_v41 }
 0x3cf   : > { %v3120_v7 = vrot.slane %v3113_v63, %v7176_v37  ;;  %v3111_v10 = vrot.slane %v3097_v4, %v7176_v37  ;;  %v7540_v2 = vsub.s32 %v3205_v39, %v7173_v33 }
 0x3d0   : > { %v3237_v50 = vunpack.c.0.s8 %v3236_v43 }
 0x3d1   : > { %v3127_v27 = vrot.slane %v3120_v7, %v7176_v37  ;;  %v3112_v57 = vcombine.low %v3104_v31, %v3111_v10 }
 0x3d2   : > { %3001 = vrot.lane.b32.xlu0 %v2985_v5, %s6597_s0  ;;  %v7546_v40 = vsub.s32 %v3237_v50, %v7173_v33 }
 0x3d3   : > { %3130 = vrot.lane.b32.xlu1 %v3127_v27, %s6597_s0 }
 0x3d7   : > { %3128 = vrot.lane.b32.xlu1 %v3112_v57, %s6597_s0 }
 0x440   : > { %v3004_v24 = vpop.permute.xlu0 %3003 }
 0x441   : > { %v3012_v12 = vsel %vm1664_vm8, %v3004_v24, 0 }
 0x442   : > { %5777 = vmatpush3.bf16.xpose.msra.mxu1 %v3012_v12 }
 0x443   : > { %5778 = vmatprep.subr.bf16.mxu1 %v8252_v26 }
 0x444   : > { %v3002_v17 = vpop.permute.xlu0 %3001 }
 0x445   : > { %v3131_v15 = vpop.permute.xlu1 %3130  ;;  %v3009_v18 = vsel %vm1664_vm8, %v3002_v17, 0 }
 0x446   : > { %v3139_v32 = vsel %vm1664_vm8, %v3131_v15, 0 }
 0x447   : > { %5785 = vmatpush3.bf16.xpose.msra.mxu0 %v3139_v32 }
 0x448   : > { %5786 = vmatprep.subr.bf16.mxu0 %v8252_v26 }
 0x449   : > { %v3129_v19 = vpop.permute.xlu1 %3128 }
 0x44a   : > { %5779 = vmatpush3.bf16.xpose.msra.mxu1 %v3009_v18  ;;  %v3136_v20 = vsel %vm1664_vm8, %v3129_v19, 0 }
 0x44b   : > { %5792 = vmatprep.subr.bf16.mxu1 %v8252_v26 }
 0x44f   : > { %5787 = vmatpush3.bf16.xpose.msra.mxu0 %v3136_v20 }
 0x450   : > { %5800 = vmatprep.subr.bf16.mxu0 %v8252_v26 }
 0x451   : > { %5781 = vmatmul.mubr.msk.bf16.vlgmr.msra.gmra.mxu1 %vm1664_vm8, %v7464_v29 }
 0x452   : > { %5796 = vmatprep.mubr.msk.bf16.mxu1 %vm6595_vm9, %v8252_v26 }
 0x456   : > { %5789 = vmatmul.mubr.msk.bf16.vlgmr.msra.gmra.mxu0 %vm1664_vm8, %v7471_v8 }
 0x457   : > { %5804 = vmatprep.mubr.msk.bf16.mxu0 %vm6595_vm9, %v8252_v26 }
 0x511   : > { %v7534_v21 = vpop.f32.mrf.mxu1 }
 0x512   : > { %3183 = vrot.lane.b32.xlu0 %v7534_v21, %s6598_s13 }
 0x513   : > { %v5782_v16 = vpop.f32.mrf.mxu1 }
 0x515   : > { %v3051_v25 = vpop.f32.mrf.mxu1 }
 0x516   : > { %v3175_v28 = vpop.f32.mrf.mxu0  ;;  %3189 = vrot.lane.b32.xlu0 %v7534_v21, %s6599_s27 }
 0x517   : > { %3185 = vrot.lane.b32.xlu1 %v3175_v28, %s6598_s13  ;;  %v5783_v23 = vpop.f32.mrf.mxu1 }
 0x518   : > { %v5790_v30 = vpop.f32.mrf.mxu0 }
 0x51a   : > { %v3178_v34 = vpop.f32.mrf.mxu0  ;;  %3195 = vrot.lane.b32.xlu0 %v7534_v21, %s6600_s22 }
 0x51b   : > { %3191 = vrot.lane.b32.xlu1 %v3175_v28, %s6599_s27 }
 0x51c   : > { %v5791_v22 = vpop.f32.mrf.mxu0 }
 0x51f   : > { %3197 = vrot.lane.b32.xlu1 %v3175_v28, %s6600_s22 }
 0x584   : > { %v3184_v36 = vpop.permute.xlu0 %3183 }
 0x588   : > { %v3190_v42 = vpop.permute.xlu0 %3189 }
 0x589   : > { %v3186_v38 = vpop.permute.xlu1 %3185  ;;  %v3201_v6 = vcombine.low %v7534_v21, %v3190_v42  ;;  %v3202_v25 = vcombine.high %v7534_v21, %v3190_v42 }
 0x58b   : > { %v3209_v44 = vrot.slane %v3201_v6, %v7540_v2  ;;  %v3216_v55 = vrot.slane %v3202_v25, %v7540_v2 }
 0x58c   : > { %v3196_v54 = vpop.permute.xlu0 %3195 }
 0x58d   : > { %v3192_v60 = vpop.permute.xlu1 %3191  ;;  %v3217_v58 = vcombine.low %v3184_v36, %v3196_v54  ;;  %v3218_v19 = vcombine.high %v3184_v36, %v3196_v54 }
 0x58e   : > { %v3259_v53 = vcombine.low %v3175_v28, %v3192_v60  ;;  %v3260_v61 = vcombine.high %v3175_v28, %v3192_v60 }
 0x58f   : > { %v3225_v3 = vrot.slane %v3217_v58, %v7540_v2  ;;  %v3232_v34 = vrot.slane %v3218_v19, %v7540_v2 }
 0x590   : > { %v3267_v5 = vrot.slane %v3259_v53, %v7540_v2  ;;  %v3274_v7 = vrot.slane %v3260_v61, %v7540_v2 }
 0x591   : > { %v3233_v52 = vcombine.low %v3209_v44, %v3225_v3  ;;  %v3234_v62 = vcombine.high %v3209_v44, %v3225_v3  ;;  %v3198_v56 = vpop.permute.xlu1 %3197  ;;  %v3249_v39 = vcombine.low %v3216_v55, %v3232_v34 }
 0x592   : > { %v3275_v63 = vcombine.low %v3186_v38, %v3198_v56  ;;  %v3276_v0 = vcombine.high %v3186_v38, %v3198_v56 }
 0x593   : > { %v3241_v4 = vrot.slane %v3233_v52, %v7546_v40  ;;  %v3248_v57 = vrot.slane %v3234_v62, %v7546_v40  ;;  %v3258_v42 = vrot.slane %v3249_v39, %v7546_v40 }
 0x594   : > { %v3283_v10 = vrot.slane %v3275_v63, %v7540_v2  ;;  %v3290_v27 = vrot.slane %v3276_v0, %v7540_v2 }
 0x595   : > { %v3318_v33 = vsel %vm3317_vm13, %v3241_v4, -inf  ;;  %v3250_v31 = vcombine.high %v3241_v4, %v8252_v26  ;;  %v3324_v20 = vsel %vm3317_vm13, %v3248_v57, -inf  ;;  %v3251_v16 = vcombine.high %v3248_v57, %v8252_v26 }
 0x596   : > { %v3291_v24 = vcombine.low %v3267_v5, %v3283_v10  ;;  %3319 = vmax.xlane.f32.xlu0 %v3318_v33  ;;  %v3307_v12 = vcombine.low %v3274_v7, %v3290_v27  ;;  %v3292_v15 = vcombine.high %v3267_v5, %v3283_v10  ;;  %v3330_v38 = vsel %vm3317_vm13, %v3258_v42, -inf }
 0x597   : > { %v3321_v32 = vsel %vm3317_vm13, %v3250_v31, -inf  ;;  %v3327_v22 = vsel %vm3317_vm13, %v3251_v16, -inf }
 0x598   : > { %3322 = vmax.xlane.f32.xlu1 %v3321_v32  ;;  %v7558_v17 = vrot.slane %v3307_v12, %v7546_v40  ;;  %v3299_v18 = vrot.slane %v3291_v24, %v7546_v40  ;;  %v3306_v30 = vrot.slane %v3292_v15, %v7546_v40 }
 0x59a   : > { %3325 = vmax.xlane.f32.xlu0 %v3324_v20  ;;  %v3345_v28 = vsel %vm3317_vm13, %v7558_v17, -inf  ;;  %v7567_v23 = vcombine.high %v3299_v18, %v8252_v26  ;;  %v7576_v21 = vcombine.high %v3306_v30, %v8252_v26  ;;  %v3333_v36 = vsel %vm3317_vm13, %v3299_v18, -inf }
 0x59b   : > { %v3339_v43 = vsel %vm3317_vm13, %v3306_v30, -inf }
 0x59c   : > { %3346 = vmax.xlane.f32.xlu1 %v3345_v28  ;;  %v3336_v35 = vsel %vm3317_vm13, %v7567_v23, -inf  ;;  %v3342_v41 = vsel %vm3317_vm13, %v7576_v21, -inf }
 0x59e   : > { %3328 = vmax.xlane.f32.xlu0 %v3327_v22 }
 0x5a0   : > { %3337 = vmax.xlane.f32.xlu1 %v3336_v35 }
 0x5a2   : > { %3334 = vmax.xlane.f32.xlu0 %v3333_v36 }
 0x5a4   : > { %3343 = vmax.xlane.f32.xlu1 %v3342_v41 }
 0x5a6   : > { %3340 = vmax.xlane.f32.xlu0 %v3339_v43 }
 0x5aa   : > { %3331 = vmax.xlane.f32.xlu0 %v3330_v38 }
 0x61f   : > { %v3320_v6 = vpop.xlane.xlu0 %3319 }
 0x620   : > { %v3348_v50 = vsub.f32 %v3241_v4, %v3320_v6 }
 0x621   : > { %v3323_v54 = vpop.xlane.xlu1 %3322 }
 0x622   : > { %v3358_v60 = vmul.f32 1.442695, %v3348_v50  ;;  %v3349_v58 = vsub.f32 %v3250_v31, %v3323_v54 }
 0x623   : > { %v3326_v44 = vpop.xlane.xlu0 %3325 }
 0x624   : > { %6042 = vpow2.f32 %v3358_v60  ;;  %v3360_v3 = vmul.f32 1.442695, %v3349_v58  ;;  %v3350_v53 = vsub.f32 %v3248_v57, %v3326_v44 }
 0x625   : > { %v3347_v55 = vpop.xlane.xlu1 %3346 }
 0x626   : > { %6044 = vpow2.f32 %v3360_v3  ;;  %v3362_v61 = vmul.f32 1.442695, %v3350_v53  ;;  %v3357_v36 = vsub.f32 %v7558_v17, %v3347_v55 }
 0x627   : > { %v3329_v52 = vpop.xlane.xlu0 %3328 }
 0x628   : > { %6046 = vpow2.f32 %v3362_v61  ;;  %v3351_v62 = vsub.f32 %v3251_v16, %v3329_v52  ;;  %v3376_v39 = vmul.f32 1.442695, %v3357_v36 }
 0x629   : > { %v3338_v35 = vpop.xlane.xlu1 %3337 }
 0x62a   : > { %v3364_v56 = vmul.f32 1.442695, %v3351_v62  ;;  %v3354_v41 = vsub.f32 %v7567_v23, %v3338_v35 }
 0x62b   : > { %v3335_v63 = vpop.xlane.xlu0 %3334 }
 0x62c   : > { %6048 = vpow2.f32 %v3364_v56  ;;  %v3353_v7 = vsub.f32 %v3299_v18, %v3335_v63 }
 0x62d   : > { %v3344_v43 = vpop.xlane.xlu1 %3343 }
 0x62e   : > { %v3368_v24 = vmul.f32 1.442695, %v3353_v7  ;;  %v3356_v38 = vsub.f32 %v7576_v21, %v3344_v43 }
 0x62f   : > { %v3341_v0 = vpop.xlane.xlu0 %3340 }
 0x630   : > { %v3355_v12 = vsub.f32 %v3306_v30, %v3341_v0 }
 0x631   : > { %v7584_v5 = vpop.eup %6042 }
 0x632   : > { %v3378_v4 = vsel %vm3317_vm13, %v7584_v5, 0.0  ;;  %v3372_v19 = vmul.f32 1.442695, %v3355_v12 }
 0x633   : > { %v7588_v10 = vpop.eup %6044  ;;  %3379 = vadd.xlane.f32.xlu0 %v3378_v4  ;;  %v3332_v27 = vpop.xlane.xlu0 %3331 }
 0x634   : > { %v3352_v33 = vsub.f32 %v3258_v42, %v3332_v27  ;;  %v3381_v31 = vsel %vm3317_vm13, %v7588_v10, 0.0  ;;  %v3370_v42 = vmul.f32 1.442695, %v3354_v41 }
 0x635   : > { %v7592_v57 = vpop.eup %6046  ;;  %3382 = vadd.xlane.f32.xlu1 %v3381_v31 }
 0x636   : > { %v3366_v15 = vmul.f32 1.442695, %v3352_v33  ;;  %v3384_v32 = vsel %vm3317_vm13, %v7592_v57, 0.0 }
 0x637   : > { %3385 = vadd.xlane.f32.xlu0 %v3384_v32 }
 0x638   : > { %6050 = vpow2.f32 %v3366_v15 }
 0x639   : > { %v6049_v18 = vpop.eup %6048  ;;  %6052 = vpow2.f32 %v3368_v24 }
 0x63a   : > { %v3387_v20 = vsel %vm3317_vm13, %v6049_v18, 0.0  ;;  %6054 = vpow2.f32 %v3372_v19 }
 0x63b   : > { %3388 = vadd.xlane.f32.xlu1 %v3387_v20  ;;  %6056 = vpow2.f32 %v3376_v39 }
 0x63c   : > { %6058 = vpow2.f32 %v3370_v42 }
 0x645   : > { %v7597_v16 = vpop.eup %6050 }
 0x646   : > { %v3390_v25 = vsel %vm3317_vm13, %v7597_v16, 0.0  ;;  %v7601_v28 = vpop.eup %6052 }
 0x647   : > { %3391 = vadd.xlane.f32.xlu0 %v3390_v25  ;;  %v3393_v30 = vsel %vm3317_vm13, %v7601_v28, 0.0  ;;  %v7605_v34 = vpop.eup %6054 }
 0x648   : > { %v3399_v22 = vsel %vm3317_vm13, %v7605_v34, 0.0  ;;  %v7618_v6 = vpop.eup %6056 }
 0x649   : > { %v7622_v17 = vpop.eup %6058 }
 0x64a   : > { %v3396_v23 = vsel %vm3317_vm13, %v7622_v17, 0.0 }
 0x64b   : > { %3394 = vadd.xlane.f32.xlu0 %v3393_v30 }
 0x64c   : > { %2677 = vrot.lane.b32.xlu1 %v7290_v9, %s6603_s26  ;;  %v3374_v9 = vmul.f32 1.442695, %v3356_v38 }
 0x64e   : > { %6060 = vpow2.f32 %v3374_v9 }
 0x64f   : > { %3400 = vadd.xlane.f32.xlu0 %v3399_v22 }
 0x650   : > { %2675 = vrot.lane.b32.xlu1 %v7294_v11, %s6603_s26  ;;  %v3405_v11 = vsel %vm3317_vm13, %v7618_v6, 0.0 }
 0x65b   : > { %v7626_v50 = vpop.eup %6060 }
 0x665   : > { %2681 = vrot.lane.b32.xlu0 %v7297_v13, %s6603_s26  ;;  %v3402_v13 = vsel %vm3317_vm13, %v7626_v50, 0.0 }
 0x674   : > { %3406 = vadd.xlane.f32.xlu1 %v3405_v11 }
 0x678   : > { %3397 = vadd.xlane.f32.xlu1 %v3396_v23 }
 0x67c   : > { %3403 = vadd.xlane.f32.xlu1 %v3402_v13 }
 0x68d   : > { %2679 = vrot.lane.b32.xlu1 %v7302_v14, %s6603_s26 }
 0x6bc   : > { %v3380_v21 = vpop.xlane.xlu0 %3379 }
 0x6be   : > { %v3383_v54 = vpop.xlane.xlu1 %3382 }
 0x6bf   : > { %6062 = vrcp.f32 %v3383_v54 }
 0x6c0   : > { %v3386_v60 = vpop.xlane.xlu0 %3385 }
 0x6c4   : > { %v3389_v58 = vpop.xlane.xlu1 %3388 }
 0x6c5   : > { %6064 = vrcp.f32 %v3389_v58 }
 0x6c6   : > { %6066 = vrcp.f32 %v3386_v60 }
 0x6c7   : > { %6068 = vrcp.f32 %v3380_v21 }
 0x6cc   : > { %v6063_v3 = vpop.eup %6062 }
 0x6cd   : > { %v3411_v63 = vmul.f32 %v6063_v3, %v7588_v10 }
 0x6d0   : > { %v3392_v44 = vpop.xlane.xlu0 %3391 }
 0x6d1   : > { %6070 = vrcp.f32 %v3392_v44 }
 0x6d2   : > { %v6065_v53 = vpop.eup %6064 }
 0x6d3   : > { %v6067_v61 = vpop.eup %6066  ;;  %v3415_v62 = vmul.f32 %v6065_v53, %v6049_v18 }
 0x6d4   : > { %v7632_v52 = vpop.xlane.xlu0 %3394  ;;  %v6069_v56 = vpop.eup %6068  ;;  %v3413_v14 = vmul.f32 %v6067_v61, %v7592_v57 }
 0x6d5   : > { %v3409_v7 = vmul.f32 %v6069_v56, %v7584_v5  ;;  %v3432_v4 = vcombine.low %v3411_v63, %v3415_v62  ;;  %v2678_v63 = vpop.permute.xlu1 %2677 }
 0x6d7   : > { %v3424_v27 = vcombine.low %v3409_v7, %v3413_v14  ;;  %v3439_v31 = vrot.slane %v3432_v4, %v7540_v2 }
 0x6d8   : > { %v3401_v0 = vpop.xlane.xlu0 %3400 }
 0x6d9   : > { %v3431_v32 = vrot.slane %v3424_v27, %v7540_v2  ;;  %6072 = vrcp.f32 %v3401_v0 }
 0x6da   : > { %6074 = vrcp.f32 %v7632_v52 }
 0x6db   : > { %v3449_v19 = vcombine.low %v3431_v32, %v3439_v31  ;;  %v3450_v56 = vcombine.high %v3431_v32, %v3439_v31  ;;  %v2688_v31 = vmul.bf16 %v2678_v63, %v7464_v29 }
 0x6dc   : > { %v2682_v33 = vpop.permute.xlu0 %2681 }
 0x6dd   : > { %v2690_v24 = vmul.bf16 %v2682_v33, %v7464_v29  ;;  %v2694_v12 = vmul.bf16 %v2682_v33, %v7471_v8  ;;  %v3464_v4 = vrot.slane %v3450_v56, %v7546_v40  ;;  %v2676_v33 = vpop.permute.xlu1 %2675 }
 0x6de   : > { %v6071_v15 = vpop.eup %6070  ;;  %v2691_v0 = vmul.bf16 %v2676_v33, %v7471_v8 }
 0x6df   : > { %v2778_v18 = vrot.slane %v2690_v24, %v7176_v37  ;;  %v2870_v10 = vrot.slane %v2694_v12, %v7176_v37  ;;  %v3441_v57 = vmul.f32 %v6071_v15, %v7597_v16  ;;  %v7656_v16 = vrot.slane %v3449_v19, %v7546_v40 }
 0x6e0   : > { %v2687_v24 = vmul.bf16 %v2676_v33, %v7464_v29 }
 0x6e1   : > { %v2779_v5 = vcombine.high %v2778_v18, %v2778_v18  ;;  %v7645_v20 = vrot.slane %v2778_v18, %v7176_v37  ;;  %v2871_v25 = vcombine.high %v2870_v10, %v2870_v10  ;;  %v7648_v30 = vrot.slane %v2870_v10, %v7176_v37 }
 0x6e2   : > { %v3448_v22 = vrot.slane %v3441_v57, %v7540_v2  ;;  %v2709_v15 = vrot.slane %v2687_v24, %v7176_v37  ;;  %v2732_v18 = vrot.slane %v2688_v31, %v7176_v37 }
 0x6e3   : > { %v2793_v55 = vrot.slane %v2779_v5, %v7176_v37  ;;  %v2885_v35 = vrot.slane %v2871_v25, %v7176_v37  ;;  %v2903_v36 = vunpack.i.h.s16 %v7645_v20  ;;  %v2923_v39 = vunpack.i.h.s16 %v7648_v30 }
 0x6e4   : > { %v7659_v41 = vrot.slane %v3448_v22, %v7546_v40  ;;  %v2794_v43 = vcombine.high %v7645_v20, %v7645_v20  ;;  %v2886_v42 = vcombine.high %v7648_v30, %v7648_v30  ;;  %v3465_v62 = vcombine.high %v3448_v22, %v8252_v26 }
 0x6e5   : > { %v2905_v38 = vunpack.i.h.s16 %v2793_v55  ;;  %v2925_v9 = vunpack.i.h.s16 %v2885_v35  ;;  %v5684_v11 = vpack.i.b16 %v2793_v55, %v2903_v36  ;;  %v5691_v23 = vpack.i.b16 %v2885_v35, %v2923_v39 }
 0x6e6   : > { %v3480_v54 = vcombine.low %v7656_v16, %v7659_v41  ;;  %v3481_v14 = vcombine.high %v7656_v16, %v7659_v41  ;;  %v3479_v7 = vrot.slane %v3465_v62, %v7546_v40  ;;  %v2717_v10 = vrot.slane %v2709_v15, %v7176_v37 }
 0x6e7   : > { %v5685_v13 = vpack.i.b16 %v2794_v43, %v2905_v38  ;;  %v5692_v21 = vpack.i.b16 %v2886_v42, %v2925_v9  ;;  %v2733_v19 = vcombine.high %v2732_v18, %v2732_v18  ;;  %v2740_v5 = vrot.slane %v2732_v18, %v7176_v37 }
 0x6e8   : > { %v3482_v27 = vcombine.low %v3464_v4, %v3479_v7  ;;  %v3483_v12 = vcombine.high %v3464_v4, %v3479_v7  ;;  %v2692_v25 = vmul.bf16 %v2678_v63, %v7471_v8  ;;  %v2725_v22 = vcombine.high %v2717_v10, %v2717_v10 }
 0x6e9   : > { %v3638_v60 = vcombine.low %v5684_v11, %v5685_v13  ;;  %v3765_v58 = vcombine.low %v5691_v23, %v5692_v21  ;;  %v2747_v35 = vrot.slane %v2733_v19, %v7176_v37  ;;  %v2893_v36 = vunpack.i.h.s16 %v2740_v5  ;;  %v6073_v21 = vpop.eup %6072 }
 0x6ea   : > { %v2710_v39 = vcombine.high %v2709_v15, %v2709_v15  ;;  %v2824_v43 = vrot.slane %v2692_v25, %v7176_v37  ;;  %v5680_v52 = vpack.i.b16 %v2740_v5, %v2725_v22  ;;  %v2801_v13 = vrot.slane %v2691_v0, %v7176_v37 }
 0x6eb   : > { %v3645_v44 = vrot.slane %v3638_v60, %v7176_v37  ;;  %v3772_v3 = vrot.slane %v3765_v58, %v7176_v37  ;;  %v5681_v11 = vpack.i.b16 %v2747_v35, %v2893_v36  ;;  %v2895_v60 = vunpack.i.h.s16 %v2747_v35 }
 0x6ec   : > { %v2724_v23 = vrot.slane %v2710_v39, %v7176_v37  ;;  %v2748_v62 = vcombine.high %v2740_v5, %v2740_v5  ;;  %v7701_v63 = vrot.slane %v2801_v13, %v7176_v37  ;;  %v3421_v7 = vmul.f32 %v6073_v21, %v7605_v34 }
 0x6ed   : > { %v3652_v53 = vrot.slane %v3645_v44, %v7176_v37  ;;  %v3779_v61 = vrot.slane %v3772_v3, %v7176_v37  ;;  %v2825_v3 = vcombine.high %v2824_v43, %v2824_v43 }
 0x6ee   : > { %v2817_v34 = vcombine.high %v7701_v63, %v7701_v63 }
 0x6ef   : > { %3655 = vrot.lane.b32.xlu0 %v3652_v53, %s6603_s26  ;;  %3782 = vrot.lane.b32.xlu1 %v3779_v61, %s6603_s26  ;;  %v3590_v53 = vcombine.low %v5680_v52, %v5681_v11  ;;  %v6075_v61 = vpop.eup %6074  ;;  %v2839_v31 = vrot.slane %v2825_v3, %v7176_v37  ;;  %v2802_v52 = vcombine.high %v2801_v13, %v2801_v13 }
 0x6f1   : > { %v3606_v15 = vrot.slane %v3590_v53, %v7176_v37 }
 0x6f3   : > { %3546 = vrot.lane.b32.xlu0 %v3481_v14, %s6604_s3  ;;  %v3589_v14 = vcombine.low %v2717_v10, %v2724_v23 }
 0x6f5   : > { %v3599_v25 = vrot.slane %v3589_v14, %v7176_v37 }
 0x6f7   : > { %3554 = vrot.lane.b32.xlu0 %v3482_v27, %s6605_s14  ;;  %v5682_v27 = vpack.i.b16 %v2748_v62, %v2895_v60 }
 0x6fb   : > { %3562 = vrot.lane.b32.xlu0 %v3483_v12, %s6606_s18  ;;  %v2832_v12 = vrot.slane %v2824_v43, %v7176_v37  ;;  %v2915_v43 = vunpack.i.h.s16 %v2839_v31 }
 0x6fd   : > { %v3407_v32 = vpop.xlane.xlu1 %3406  ;;  %v2913_v39 = vunpack.i.h.s16 %v2832_v12  ;;  %v2840_v23 = vcombine.high %v2832_v12, %v2832_v12  ;;  %v5687_v21 = vpack.i.b16 %v2832_v12, %v2817_v34 }
 0x6fe   : > { %6076 = vrcp.f32 %v3407_v32  ;;  %v3417_v32 = vmul.f32 %v6075_v61, %v7601_v28 }
 0x6ff   : > { %v5688_v13 = vpack.i.b16 %v2839_v31, %v2913_v39  ;;  %v5689_v3 = vpack.i.b16 %v2840_v23, %v2915_v43 }
 0x700   : > { %v3484_v22 = vcombine.low %v3417_v32, %v3421_v7 }
 0x701   : > { %v3398_v57 = vpop.xlane.xlu1 %3397 }
 0x702   : > { %6078 = vrcp.f32 %v3398_v57 }
 0x705   : > { %v3404_v55 = vpop.xlane.xlu1 %3403 }
 0x706   : > { %6080 = vrcp.f32 %v3404_v55 }
 0x709   : > { %v2680_v42 = vpop.permute.xlu1 %2679 }
 0x70a   : > { %v2689_v38 = vmul.bf16 %v2680_v42, %v7464_v29  ;;  %v2693_v9 = vmul.bf16 %v2680_v42, %v7471_v8 }
 0x70b   : > { %v6077_v4 = vpop.eup %6076 }
 0x70c   : > { %v2755_v58 = vrot.slane %v2689_v38, %v7176_v37  ;;  %v2847_v44 = vrot.slane %v2693_v9, %v7176_v37  ;;  %v3501_v55 = vmul.f32 %v6077_v4, %v7618_v6  ;;  %v3491_v6 = vrot.slane %v3484_v22, %v7540_v2 }
 0x70e   : > { %v2756_v56 = vcombine.high %v2755_v58, %v2755_v58  ;;  %v2763_v29 = vrot.slane %v2755_v58, %v7176_v37  ;;  %v2855_v8 = vrot.slane %v2847_v44, %v7176_v37  ;;  %v2848_v35 = vcombine.high %v2847_v44, %v2847_v44 }
 0x70f   : > { %v6079_v24 = vpop.eup %6078  ;;  %v3508_v58 = vrot.slane %v3501_v55, %v7540_v2  ;;  %v2816_v44 = vrot.slane %v2802_v52, %v7176_v37 }
 0x710   : > { %v2771_v33 = vcombine.high %v2763_v29, %v2763_v29  ;;  %v2770_v18 = vrot.slane %v2756_v56, %v7176_v37  ;;  %v2863_v57 = vcombine.high %v2855_v8, %v2855_v8  ;;  %v3591_v10 = vcombine.low %v5682_v27, %v2763_v29 }
 0x711   : > { %v3419_v0 = vmul.f32 %v6079_v24, %v7622_v17  ;;  %v2862_v60 = vrot.slane %v2848_v35, %v7176_v37  ;;  %v3717_v29 = vcombine.low %v5687_v21, %v5688_v13  ;;  %v3718_v14 = vcombine.low %v5689_v3, %v2855_v8 }
 0x712   : > { %v5683_v19 = vpack.i.b16 %v7645_v20, %v2771_v33  ;;  %v3621_v20 = vcombine.low %v3599_v25, %v3606_v15  ;;  %v3613_v42 = vrot.slane %v3591_v10, %v7176_v37  ;;  %v5690_v38 = vpack.i.b16 %v7648_v30, %v2863_v57 }
 0x713   : > { %v6081_v5 = vpop.eup %6080  ;;  %v3532_v27 = vrot.slane %v3508_v58, %v7546_v40  ;;  %v3716_v33 = vcombine.low %v7701_v63, %v2816_v44  ;;  %v3740_v32 = vrot.slane %v3718_v14, %v7176_v37 }
 0x714   : > { %v3592_v36 = vcombine.low %v2770_v18, %v5683_v19  ;;  %v3423_v28 = vmul.f32 %v6081_v5, %v7626_v50  ;;  %v3629_v30 = vrot.slane %v3621_v20, %v7176_v37  ;;  %v3719_v53 = vcombine.low %v2862_v60, %v5690_v38  ;;  %v6030_v60 = vld [vmem:[%s7138_s4 + $0x8] sm:$0xff]  }
 0x715   : > { %v3733_v18 = vrot.slane %v3717_v29, %v7176_v37  ;;  %v3726_v57 = vrot.slane %v3716_v33, %v7176_v37 }
 0x716   : > { %v3620_v9 = vrot.slane %v3592_v36, %v7176_v37  ;;  %v3492_v11 = vcombine.low %v3419_v0, %v3423_v28  ;;  %v3747_v31 = vrot.slane %v3719_v53, %v7176_v37 }
 0x717   : > { %v3748_v10 = vcombine.low %v3726_v57, %v3733_v18 }
 0x718   : > { %v3622_v17 = vcombine.low %v3613_v42, %v3620_v9  ;;  %v3499_v50 = vrot.slane %v3492_v11, %v7540_v2  ;;  %v3525_v2 = vcombine.high %v3508_v58, %v8252_v26  ;;  %v3749_v63 = vcombine.low %v3740_v32, %v3747_v31 }
 0x719   : > { %v3756_v25 = vrot.slane %v3748_v10, %v7176_v37 }
 0x71a   : > { %v3636_v61 = vrot.slane %v3622_v17, %v7176_v37  ;;  %v3509_v62 = vcombine.low %v3491_v6, %v3499_v50  ;;  %v3510_v56 = vcombine.high %v3491_v6, %v3499_v50  ;;  %v3539_v8 = vrot.slane %v3525_v2, %v7546_v40  ;;  %v6031_v17 = vld [vmem:[%s7138_s4] sm:$0xff]   ;;  %s8256_s4 = scalar_lea.vmem [#allocation14], %s7072_s28 }
 0x71b   : > { %v3763_v34 = vrot.slane %v3749_v63, %v7176_v37 }
 0x71c   : > { %v3637_v7 = vcombine.low %v3629_v30, %v3636_v61  ;;  %v3517_v4 = vrot.slane %v3509_v62, %v7546_v40  ;;  %v3524_v12 = vrot.slane %v3510_v56, %v7546_v40 }
 0x71d   : > { %v3764_v22 = vcombine.low %v3756_v25, %v3763_v34 }
 0x71e   : > { %3653 = vrot.lane.b32.xlu0 %v3637_v7, %s6603_s26  ;;  %v3541_v24 = vcombine.high %v3517_v4, %v3532_v27  ;;  %v3540_v15 = vcombine.low %v3517_v4, %v3532_v27  ;;  %v3542_v19 = vcombine.low %v3524_v12, %v3539_v8  ;;  %v3543_v5 = vcombine.high %v3524_v12, %v3539_v8 }
 0x720   : > { %3548 = vrot.lane.b32.xlu1 %v3541_v24, %s6604_s3 }
 0x724   : > { %3556 = vrot.lane.b32.xlu1 %v3542_v19, %s6605_s14 }
 0x728   : > { %3564 = vrot.lane.b32.xlu1 %v3543_v5, %s6606_s18 }
 0x72c   : > { %3780 = vrot.lane.b32.xlu1 %v3764_v22, %s6603_s26 }
 0x761   : > { %v3656_v40 = vpop.permute.xlu0 %3655  ;;  %v3783_v55 = vpop.permute.xlu1 %3782 }
 0x762   : > { %v3664_v35 = vsel %vm3662_vm14, %v3656_v40, 0  ;;  %v3789_v36 = vsel %vm3662_vm14, %v3783_v55, 0 }
 0x763   : > { %5793 = vmatpush3.bf16.msra.mxu1 %v3664_v35  ;;  %5801 = vmatpush3.bf16.msra.mxu0 %v3789_v36 }
 0x764   : > { %5794 = vmatprep.subr.bf16.mxu1 %v8252_v26  ;;  %5802 = vmatprep.subr.bf16.mxu0 %v8252_v26 }
 0x765   : > { %v3547_v0 = vpop.permute.xlu0 %3546 }
 0x766   : > { %v3569_v43 = vsel %vm3568_vm15, %v3480_v54, %v3547_v0 }
 0x769   : > { %v3555_v28 = vpop.permute.xlu0 %3554 }
 0x76a   : > { %v3572_v52 = vsel %vm3571_vm0, %v3569_v43, %v3555_v28 }
 0x76d   : > { %v3563_v39 = vpop.permute.xlu0 %3562 }
 0x76e   : > { %v7751_v20 = vsel %vm3574_vm1, %v3572_v52, %v3563_v39 }
 0x76f   : > { %8254 = vst [vmem:[#allocation54_spill] sm:$0xff] %v7751_v20  ;;  %v3577_v38 = vpack.c.bf16 %v7751_v20, %v7751_v20 }
 0x790   : > { %v3654_v42 = vpop.permute.xlu0 %3653 }
 0x791   : > { %5795 = vmatpush3.bf16.msra.mxu1 %v3654_v42  ;;  %v5695_v42 = vld [vmem:[%s8256_s4] ss:$0 sm:$0xff] }
 0x792   : > { %v3549_v9 = vpop.permute.xlu1 %3548  ;;  %5808 = vmatprep.subr.bf16.mxu1 %v8252_v26 }
 0x793   : > { %v3570_v54 = vsel %vm3568_vm15, %v3540_v15, %v3549_v9 }
 0x794   : > { %5797 = vmatmul.mubr.msk.bf16.vlgmr.msra.gmra.mxu1 %vm3658_vm2, %v3577_v38 }
 0x795   : > { %5812 = vmatprep.mubr.msk.bf16.mxu1 %vm6595_vm9, %v8252_v26  ;;  %5809 = vmatpush3.bf16.msra.mxu1 %v6030_v60 }
 0x796   : > { %v3557_v16 = vpop.permute.xlu1 %3556  ;;  %5810 = vmatprep.subr.bf16.mxu1 %v8252_v26 }
 0x797   : > { %v3573_v11 = vsel %vm3571_vm0, %v3570_v54, %v3557_v16 }
 0x799   : > { %5811 = vmatpush3.bf16.msra.mxu1 %v6031_v17 }
 0x79a   : > { %v3565_v41 = vpop.permute.xlu1 %3564  ;;  %5824 = vmatprep.subr.bf16.mxu1 %v8252_v26 }
 0x79b   : > { %v7762_v23 = vsel %vm3574_vm1, %v3573_v11, %v3565_v41 }
 0x79c   : > { %8255 = vst [vmem:[#allocation55_spill] sm:$0xff] %v7762_v23  ;;  %v3578_v6 = vpack.c.bf16 %v7762_v23, %v7762_v23 }
 0x79e   : > { %v3781_v21 = vpop.permute.xlu1 %3780 }
 0x79f   : > { %5803 = vmatpush3.bf16.msra.mxu0 %v3781_v21 }
 0x7a0   : > { %5816 = vmatprep.subr.bf16.mxu0 %v8252_v26 }
 0x7a2   : > { %5805 = vmatmul.mubr.msk.bf16.vlgmr.msra.gmra.mxu0 %vm3658_vm2, %v3578_v6 }
 0x7a3   : > { %5820 = vmatprep.mubr.msk.bf16.mxu0 %vm6595_vm9, %v8252_v26 }
 0x854   : > { %v3700_v50 = vpop.f32.mrf.mxu1 }
 0x855   : > { %v3840_v58 = vrot.slane %v3700_v50, %v7176_v37  ;;  %v3833_v53 = vcombine.high %v3700_v50, %v3700_v50 }
 0x856   : > { %v5798_v13 = vpop.f32.mrf.mxu1 }
 0x857   : > { %v3848_v3 = vcombine.high %v3840_v58, %v3840_v58  ;;  %v3855_v62 = vrot.slane %v3840_v58, %v7176_v37  ;;  %v3847_v56 = vrot.slane %v3833_v53, %v7176_v37 }
 0x858   : > { %v3703_v44 = vpop.f32.mrf.mxu1 }
 0x859   : > { %v3869_v61 = vrot.slane %v3848_v3, %v7176_v37  ;;  %v3862_v33 = vrot.slane %v3847_v56, %v7176_v37 }
 0x85a   : > { %v5799_v30 = vpop.f32.mrf.mxu1 }
 0x85b   : > { %v3916_v29 = vcombine.low %v3855_v62, %v3869_v61  ;;  %v5694_v7 = vcombine.high %v3855_v62, %v3869_v61 }
 0x85d   : > { %v3926_v15 = vrot.slane %v3916_v29, %v7176_v37  ;;  %v3933_v8 = vrot.slane %v5694_v7, %v7176_v37 }
 0x85f   : > { %v3948_v25 = vcombine.low %v3926_v15, %v3933_v8  ;;  %v8258_v15 = vld [vmem:[#allocation45_spill] sm:$0xff]  ;;  %v8259_v8 = vld [vmem:[#allocation44_spill] sm:$0xff] }
 0x861   : > { %v3956_v0 = vrot.slane %v3948_v25, %v7176_v37 }
 0x862   : > { %v3825_v14 = vpop.f32.mrf.mxu0 }
 0x863   : > { %v3872_v4 = vcombine.high %v3825_v14, %v3825_v14  ;;  %v3879_v27 = vrot.slane %v3825_v14, %v7176_v37 }
 0x864   : > { %v5806_v2 = vpop.f32.mrf.mxu0 }
 0x865   : > { %v3886_v24 = vrot.slane %v3872_v4, %v7176_v37  ;;  %v3887_v12 = vcombine.high %v3879_v27, %v3879_v27  ;;  %v3894_v31 = vrot.slane %v3879_v27, %v7176_v37 }
 0x866   : > { %v3828_v32 = vpop.f32.mrf.mxu0 }
 0x867   : > { %v3908_v18 = vrot.slane %v3887_v12, %v7176_v37  ;;  %v3909_v57 = vcombine.high %v3894_v31, %v3894_v31  ;;  %v3918_v19 = vcombine.low %v3862_v33, %v3894_v31  ;;  %v3901_v10 = vrot.slane %v3886_v24, %v7176_v37 }
 0x868   : > { %v5807_v63 = vpop.f32.mrf.mxu0 }
 0x869   : > { %v3910_v5 = vcombine.high %v3908_v18, %v3908_v18  ;;  %v3919_v34 = vcombine.low %v3908_v18, %v3909_v57  ;;  %v3940_v22 = vrot.slane %v3918_v19, %v7176_v37 }
 0x86b   : > { %v3947_v40 = vrot.slane %v3919_v34, %v7176_v37  ;;  %v3965_v55 = vcombine.low %v3910_v5, %v3901_v10 }
 0x86d   : > { %v3949_v35 = vcombine.low %v3940_v22, %v3947_v40  ;;  %v3972_v36 = vrot.slane %v3965_v55, %v7176_v37 }
 0x86f   : > { %v3963_v28 = vrot.slane %v3949_v35, %v7176_v37  ;;  %v3979_v43 = vrot.slane %v3972_v36, %v7176_v37 }
 0x871   : > { %v3964_v39 = vcombine.low %v3956_v0, %v3963_v28 }
 0x873   : > { %v3982_v52 = vpack.c.bf16 %v3979_v43, %v3964_v39 }
 0x875   : > { %5813 = vmatmul.mubr.msk.bf16.vlgmr.msra.gmra.mxu1 %vm1664_vm8, %v3982_v52 }
 0x876   : > { %5832 = vmatprep.mubr.msk.bf16.mxu1 %vm6595_vm9, %v8252_v26 }
 0x935   : > { %v4038_v38 = vpop.f32.mrf.mxu1 }
 0x936   : > { %v4039_v9 = vadd.f32 %v5695_v42, %v4038_v38 }
 0x937   : > { %v5814_v16 = vpop.f32.mrf.mxu1 }
 0x938   : > { %v4047_v41 = vcombine.high %v4039_v9, %v4039_v9  ;;  %v4054_v54 = vrot.slane %v4039_v9, %v7176_v37 }
 0x939   : > { %v4041_v11 = vpop.f32.mrf.mxu1 }
 0x93a   : > { %v4061_v21 = vrot.slane %v4047_v41, %v7176_v37  ;;  %v4062_v6 = vcombine.high %v4054_v54, %v4054_v54  ;;  %v4070_v60 = vrot.slane %v4054_v54, %v7176_v37  ;;  %v4042_v17 = vadd.f32 %v5695_v42, %v4041_v11 }
 0x93b   : > { %v5815_v50 = vpop.f32.mrf.mxu1 }
 0x93c   : > { %v4063_v58 = vcombine.high %v4061_v21, %v4061_v21  ;;  %v4077_v13 = vrot.slane %v4061_v21, %v7176_v37  ;;  %v4084_v44 = vrot.slane %v4062_v6, %v7176_v37  ;;  %v4092_v3 = vcombine.high %v4070_v60, %v4070_v60 }
 0x93d   : > { %v7803_v30 = vadd.f32 %v4070_v60, %v7186_v45  ;;  %v4102_v53 = vrot.slane %v4042_v17, %v7176_v37 }
 0x93e   : > { %v4091_v61 = vrot.slane %v4063_v58, %v7176_v37  ;;  %v4093_v62 = vcombine.high %v4077_v13, %v4077_v13  ;;  %v4094_v56 = vcombine.high %v4084_v44, %v4084_v44  ;;  %v7808_v29 = vadd.f32 %v4084_v44, %v7198_v49 }
 0x93f   : > { %v7811_v14 = vadd.f32 %v4092_v3, %v7204_v51  ;;  %v7814_v7 = vadd.f32 %v4077_v13, %v7189_v46  ;;  %v4103_v4 = vcombine.high %v4102_v53, %v4102_v53  ;;  %v4110_v27 = vrot.slane %v4102_v53, %v7176_v37  ;;  %v8257_v51 = vld [vmem:[#allocation46_spill] sm:$0xff] }
 0x940   : > { %v4095_v45 = vcombine.high %v4091_v61, %v4091_v61  ;;  %v7818_v2 = vadd.f32 %v4094_v56, %v7226_v59  ;;  %v7821_v33 = vadd.f32 %v4091_v61, %v7192_v47  ;;  %v7824_v24 = vadd.f32 %v4093_v62, %v7195_v48 }
 0x941   : > { %v4117_v49 = vrot.slane %v4103_v4, %v7176_v37  ;;  %v7828_v12 = vadd.f32 %v4110_v27, %v8257_v51  ;;  %v4150_v46 = vcombine.low %v7803_v30, %v7808_v29  ;;  %v4224_v31 = vmul.f32 %v7803_v30, %v7803_v30  ;;  %v6032_v51 = vld [vmem:[%s7143_s7 + $0x8] sm:$0xff]  }
 0x942   : > { %v7835_v59 = vadd.f32 %v4095_v45, %v8258_v15  ;;  %v4151_v47 = vcombine.low %v7811_v14, %v7818_v2  ;;  %v4152_v48 = vcombine.low %v7814_v7, %v7821_v33  ;;  %v4225_v32 = vmul.f32 %v7808_v29, %v7808_v29  ;;  %5817 = vmatpush3.bf16.msra.mxu0 %v6032_v51  ;;  %v5699_v15 = vld [vmem:[%s8261_s24] ss:$0 sm:$0xff] }
 0x943   : > { %v7844_v18 = vadd.f32 %v4117_v49, %v8259_v8  ;;  %v4160_v57 = vrot.slane %v4150_v46, %v7176_v37  ;;  %v4226_v19 = vmul.f32 %v7811_v14, %v7811_v14  ;;  %v4227_v63 = vmul.f32 %v7818_v2, %v7818_v2  ;;  %v6033_v46 = vld [vmem:[%s7143_s7] sm:$0xff]   ;;  %5818 = vmatprep.subr.bf16.mxu0 %v8252_v26  ;;  %s8270_s7 = scalar_lea.vmem [#allocation19], %s7072_s28 }
 0x944   : > { %v4153_v10 = vcombine.low %v7824_v24, %v7835_v59  ;;  %v4167_v5 = vrot.slane %v4151_v47, %v7176_v37  ;;  %v4174_v34 = vrot.slane %v4152_v48, %v7176_v37  ;;  %v4228_v25 = vmul.f32 %v7814_v7, %v7814_v7  ;;  %v5700_v48 = vld [vmem:[%s8262_s21] ss:$0 sm:$0xff] }
 0x945   : > { %8260 = vst [vmem:[#allocation46_spill] sm:$0xff] %v7844_v18  ;;  %v4229_v22 = vmul.f32 %v7821_v33, %v7821_v33  ;;  %v4230_v40 = vmul.f32 %v7824_v24, %v7824_v24  ;;  %v4231_v55 = vmul.f32 %v7835_v59, %v7835_v59  ;;  %v4244_v35 = vcombine.low %v4224_v31, %v4225_v32 }
 0x946   : > { %v4181_v36 = vrot.slane %v4153_v10, %v7176_v37  ;;  %v4182_v0 = vcombine.low %v4160_v57, %v4167_v5  ;;  %v4245_v28 = vcombine.low %v4226_v19, %v4227_v63  ;;  %v4199_v39 = vcombine.low %v7828_v12, %v7844_v18  ;;  %5819 = vmatpush3.bf16.msra.mxu0 %v6033_v46 }
 0x947   : > { %v4246_v43 = vcombine.low %v4228_v25, %v4229_v22  ;;  %v4247_v52 = vcombine.low %v4230_v40, %v4231_v55  ;;  %v4254_v38 = vrot.slane %v4244_v35, %v7176_v37  ;;  %v4232_v54 = vmul.f32 %v7828_v12, %v7828_v12 }
 0x948   : > { %v4183_v42 = vcombine.low %v4174_v34, %v4181_v36  ;;  %v4261_v9 = vrot.slane %v4245_v28, %v7176_v37  ;;  %v4233_v11 = vmul.f32 %v7844_v18, %v7844_v18  ;;  %v4190_v21 = vrot.slane %v4182_v0, %v7176_v37 }
 0x949   : > { %v4268_v16 = vrot.slane %v4246_v43, %v7176_v37  ;;  %v4275_v41 = vrot.slane %v4247_v52, %v7176_v37  ;;  %v4206_v17 = vrot.slane %v4199_v39, %v7176_v37  ;;  %v4455_v57 = vcombine.high %v5699_v15, %v5699_v15 }
 0x94a   : > { %v4197_v6 = vrot.slane %v4183_v42, %v7176_v37  ;;  %v4276_v60 = vcombine.low %v4254_v38, %v4261_v9  ;;  %v4293_v58 = vcombine.low %v4232_v54, %v4233_v11  ;;  %v4527_v5 = vcombine.high %v5700_v48, %v5700_v48 }
 0x94b   : > { %v4277_v50 = vcombine.low %v4268_v16, %v4275_v41  ;;  %v4213_v61 = vrot.slane %v4206_v17, %v7176_v37  ;;  %v4462_v25 = vrot.slane %v5699_v15, %v7176_v37  ;;  %v4469_v22 = vrot.slane %v4455_v57, %v7176_v37  ;;  %v8269_v15 = vld [vmem:[#allocation53_spill] sm:$0xff] }
 0x94c   : > { %v4198_v13 = vcombine.low %v4190_v21, %v4197_v6  ;;  %v4284_v44 = vrot.slane %v4276_v60, %v7176_v37  ;;  %v4300_v62 = vrot.slane %v4293_v58, %v7176_v37  ;;  %v4534_v0 = vrot.slane %v5700_v48, %v7176_v37 }
 0x94d   : > { %v4291_v3 = vrot.slane %v4277_v50, %v7176_v37  ;;  %v4219_v27 = vsel %vm1668_vm7, %v4213_v61, 0.0  ;;  %v4541_v28 = vrot.slane %v4527_v5, %v7176_v37  ;;  %v4470_v39 = vcombine.high %v4462_v25, %v4462_v25  ;;  %v8263_v50 = vld [vmem:[#allocation47_spill] sm:$0xff]  ;;  %v8265_v61 = vld [vmem:[#allocation49_spill] sm:$0xff] }
 0x94e   : > { %v4216_v53 = vsel %vm1664_vm8, %v4198_v13, 0.0  ;;  %v4307_v45 = vrot.slane %v4300_v62, %v7176_v37  ;;  %v4471_v52 = vcombine.high %v4469_v22, %v4469_v22  ;;  %v7902_v42 = vrot.slane %v4462_v25, %v7176_v37  ;;  %v8264_v13 = vld [vmem:[#allocation48_spill] sm:$0xff] }
 0x94f   : > { %4217 = vadd.xlane.f32.xlu0 %v4216_v53  ;;  %v4292_v56 = vcombine.low %v4284_v44, %v4291_v3  ;;  %v7905_v38 = vrot.slane %v4469_v22, %v7176_v37  ;;  %v4542_v16 = vcombine.high %v4534_v0, %v4534_v0  ;;  %v4543_v41 = vcombine.high %v4541_v28, %v4541_v28 }
 0x950   : > { %v4313_v49 = vsel %vm1668_vm7, %v4307_v45, 0.0  ;;  %v7908_v54 = vrot.slane %v4470_v39, %v7176_v37  ;;  %v4499_v11 = vrot.slane %v4471_v52, %v7176_v37  ;;  %v4500_v21 = vcombine.high %v7902_v42, %v7902_v42 }
 0x951   : > { %v4310_v4 = vsel %vm1664_vm8, %v4292_v56, 0.0  ;;  %v4501_v6 = vcombine.high %v7905_v38, %v7905_v38  ;;  %v7916_v60 = vrot.slane %v4534_v0, %v7176_v37  ;;  %v7919_v17 = vrot.slane %v4541_v28, %v7176_v37  ;;  %v8266_v56 = vld [vmem:[#allocation50_spill] sm:$0xff] }
 0x952   : > { %4311 = vadd.xlane.f32.xlu1 %v4310_v4  ;;  %v7926_v3 = vrot.slane %v4542_v16, %v7176_v37  ;;  %v7929_v53 = vrot.slane %v4543_v41, %v7176_v37  ;;  %v4503_v57 = vcombine.high %v4499_v11, %v4499_v11 }
 0x953   : > { %4220 = vadd.xlane.f32.xlu0 %v4219_v27  ;;  %v8267_v27 = vld [vmem:[#allocation51_spill] sm:$0xff] }
 0x957   : > { %4314 = vadd.xlane.f32.xlu0 %v4313_v49  ;;  %v8268_v49 = vld [vmem:[#allocation52_spill] sm:$0xff] }
 0x9d8   : > { %v4218_v31 = vpop.xlane.xlu0 %4217 }
 0x9d9   : > { %v7891_v47 = vmul.f32 0.03125, %v4218_v31 }
 0x9db   : > { %v4312_v32 = vpop.xlane.xlu1 %4311  ;;  %v4318_v8 = vmul.f32 %v7891_v47, %v7891_v47  ;;  %v4327_v58 = vrot.slane %v7891_v47, %v8263_v50  ;;  %v4331_v44 = vrot.slane %v7891_v47, %v8264_v13  ;;  %v4335_v62 = vrot.slane %v7891_v47, %v8265_v61 }
 0x9dc   : > { %v4316_v19 = vmul.f32 0.03125, %v4312_v32  ;;  %v4221_v63 = vpop.xlane.xlu0 %4220  ;;  %v4339_v4 = vrot.slane %v7891_v47, %v8266_v56  ;;  %v4343_v45 = vrot.slane %v7891_v47, %v8267_v27  ;;  %v4347_v51 = vrot.slane %v7891_v47, %v8268_v49 }
 0x9dd   : > { %v4223_v10 = vmul.f32 0.03125, %v4221_v63  ;;  %v4351_v48 = vrot.slane %v7891_v47, %v8269_v15  ;;  %v4355_v32 = vrot.slane %v7891_v47, %v7352_v1  ;;  %v4573_v63 = vcombine.high %v7919_v17, %v7919_v17 }
 0x9de   : > { %v4320_v34 = vsub.f32 %v4316_v19, %v4318_v8  ;;  %v4502_v8 = vcombine.high %v7908_v54, %v7908_v54  ;;  %v4572_v19 = vcombine.high %v7916_v60, %v7916_v60  ;;  %v4374_v5 = vsub.f32 %v7803_v30, %v4327_v58 }
 0x9df   : > { %v4319_v35 = vmul.f32 %v4223_v10, %v4223_v10  ;;  %v4359_v46 = vrot.slane %v4223_v10, %v8263_v50  ;;  %v4363_v31 = vrot.slane %v4223_v10, %v8264_v13  ;;  %v4375_v10 = vsub.f32 %v7808_v29, %v4331_v44 }
 0x9e0   : > { %v4384_v40 = vadd.f32 1e-05, %v4320_v34  ;;  %v4315_v55 = vpop.xlane.xlu0 %4314  ;;  %v4574_v34 = vcombine.high %v7926_v3, %v7926_v3  ;;  %v4575_v47 = vcombine.high %v7929_v53, %v7929_v53  ;;  %v4376_v25 = vsub.f32 %v7811_v14, %v4335_v62 }
 0x9e1   : > { %v4317_v36 = vmul.f32 0.03125, %v4315_v55  ;;  %v4377_v22 = vsub.f32 %v7818_v2, %v4339_v4  ;;  %v4379_v55 = vsub.f32 %v7821_v33, %v4347_v51  ;;  %v4383_v0 = vsub.f32 %v7844_v18, %v4363_v31 }
 0x9e2   : > { %6082 = vrsqrt.f32 %v4384_v40  ;;  %v4378_v40 = vsub.f32 %v7814_v7, %v4343_v45  ;;  %v4380_v28 = vsub.f32 %v7824_v24, %v4351_v48  ;;  %v4381_v39 = vsub.f32 %v7835_v59, %v4355_v32 }
 0x9e3   : > { %v4321_v43 = vsub.f32 %v4317_v36, %v4319_v35  ;;  %v4382_v36 = vsub.f32 %v7828_v12, %v4359_v46 }
 0x9e5   : > { %v4385_v9 = vadd.f32 1e-05, %v4321_v43 }
 0x9e7   : > { %6084 = vrsqrt.f32 %v4385_v9 }
 0x9ef   : > { %v6083_v35 = vpop.eup %6082 }
 0x9f0   : > { %v4393_v43 = vrot.slane %v6083_v35, %v8263_v50  ;;  %v4397_v52 = vrot.slane %v6083_v35, %v8264_v13  ;;  %v4401_v9 = vrot.slane %v6083_v35, %v8265_v61  ;;  %v4405_v16 = vrot.slane %v6083_v35, %v8266_v56 }
 0x9f1   : > { %v4409_v41 = vrot.slane %v6083_v35, %v8267_v27  ;;  %v4413_v58 = vrot.slane %v6083_v35, %v8268_v49  ;;  %v4417_v44 = vrot.slane %v6083_v35, %v8269_v15  ;;  %v4421_v62 = vrot.slane %v6083_v35, %v7352_v1 }
 0x9f2   : > { %v4440_v4 = vmul.f32 %v4393_v43, %v4374_v5  ;;  %v4441_v45 = vmul.f32 %v4397_v52, %v4375_v10  ;;  %v4442_v51 = vmul.f32 %v4401_v9, %v4376_v25  ;;  %v4443_v46 = vmul.f32 %v4405_v16, %v4377_v22  ;;  %v6034_v9 = vld [vmem:[%s7148_s8 + $0x18] sm:$0xff]   ;;  %v6035_v16 = vld [vmem:[%s7148_s8 + $0x10] sm:$0xff]  }
 0x9f3   : > { %v4444_v31 = vmul.f32 %v4409_v41, %v4378_v40  ;;  %v4445_v48 = vmul.f32 %v4413_v58, %v4379_v55  ;;  %v4446_v32 = vmul.f32 %v4417_v44, %v4380_v28  ;;  %v4447_v23 = vmul.f32 %v4421_v62, %v4381_v39  ;;  %5825 = vmatpush3.bf16.msra.mxu1 %v6034_v9  ;;  %v6036_v41 = vld [vmem:[%s7148_s8 + $0x8] sm:$0xff]   ;;  %v6037_v58 = vld [vmem:[%s7148_s8] sm:$0xff]   ;;  %s8271_s8 = scalar_lea.vmem [#allocation20], %s7072_s28  ;;  %s8273_s28 = sld [smem:[#allocation36_spill]] }
 0x9f4   : > { %v6085_v20 = vpop.eup %6084  ;;  %v4512_v61 = vmul.f32 %v7902_v42, %v4440_v4  ;;  %v4513_v56 = vmul.f32 %v7908_v54, %v4441_v45  ;;  %v4514_v27 = vmul.f32 %v4500_v21, %v4442_v51  ;;  %v4515_v18 = vmul.f32 %v4502_v8, %v4443_v46  ;;  %5826 = vmatprep.subr.bf16.mxu1 %v8252_v26  ;;  %v5701_v44 = vld [vmem:[%s8270_s7] ss:$0 sm:$0xff] }
 0x9f5   : > { %v4425_v49 = vrot.slane %v6085_v20, %v8263_v50  ;;  %v4429_v15 = vrot.slane %v6085_v20, %v8264_v13  ;;  %v4516_v1 = vmul.f32 %v7905_v38, %v4444_v31  ;;  %v4517_v5 = vmul.f32 %v4499_v11, %v4445_v48 }
 0x9f6   : > { %v4518_v10 = vmul.f32 %v4501_v6, %v4446_v32  ;;  %v4519_v25 = vmul.f32 %v4503_v57, %v4447_v23  ;;  %v4584_v22 = vadd.f32 %v7916_v60, %v4512_v61  ;;  %v4585_v40 = vadd.f32 %v7926_v3, %v4513_v56 }
 0x9f7   : > { %v4448_v55 = vmul.f32 %v4425_v49, %v4382_v36  ;;  %v4449_v35 = vmul.f32 %v4429_v15, %v4383_v0  ;;  %v4586_v28 = vadd.f32 %v4572_v19, %v4514_v27  ;;  %v4587_v39 = vadd.f32 %v4574_v34, %v4515_v18  ;;  %5827 = vmatpush3.bf16.msra.mxu1 %v6035_v16 }
 0x9f8   : > { %v4588_v21 = vadd.f32 %v7919_v17, %v4516_v1  ;;  %v4589_v8 = vadd.f32 %v7929_v53, %v4517_v5  ;;  %v4590_v50 = vadd.f32 %v4573_v63, %v4518_v10  ;;  %v4591_v43 = vadd.f32 %v4575_v47, %v4519_v25  ;;  %5828 = vmatprep.subr.bf16.mxu1 %v8252_v26 }
 0x9f9   : > { %v4520_v20 = vmul.f32 %v7902_v42, %v4448_v55  ;;  %v4521_v38 = vmul.f32 %v7908_v54, %v4449_v35  ;;  %v4609_v11 = vcombine.low %v4584_v22, %v4585_v40  ;;  %v4610_v23 = vcombine.low %v4586_v28, %v4587_v39  ;;  %p5711_p13 = scmp.ne.s32.totalorder %s8273_s28, 1 }
 0x9fa   : > { %v4611_v6 = vcombine.low %v4588_v21, %v4589_v8  ;;  %v4612_v13 = vcombine.low %v4590_v50, %v4591_v43  ;;  %v5705_v8 = vld [vmem:[%s8271_s8] ss:$0 sm:$0xff] }
 0x9fb   : > { %v4592_v57 = vadd.f32 %v7916_v60, %v4520_v20  ;;  %v4593_v19 = vadd.f32 %v7926_v3, %v4521_v38  ;;  %v4619_v18 = vrot.slane %v4609_v11, %v7176_v37  ;;  %v4626_v17 = vrot.slane %v4610_v23, %v7176_v37  ;;  %5829 = vmatpush3.bf16.msra.mxu1 %v6036_v41 }
 0x9fc   : > { %v4633_v53 = vrot.slane %v4611_v6, %v7176_v37  ;;  %v4640_v42 = vrot.slane %v4612_v13, %v7176_v37  ;;  %5830 = vmatprep.subr.bf16.mxu1 %v8252_v26 }
 0x9fd   : > { %v4641_v63 = vcombine.low %v4619_v18, %v4626_v17  ;;  %v4658_v54 = vcombine.low %v4592_v57, %v4593_v19 }
 0x9fe   : > { %v4642_v34 = vcombine.low %v4633_v53, %v4640_v42 }
 0x9ff   : > { %v4649_v47 = vrot.slane %v4641_v63, %v7176_v37  ;;  %v4665_v60 = vrot.slane %v4658_v54, %v7176_v37  ;;  %5831 = vmatpush3.bf16.msra.mxu1 %v6037_v58 }
 0xa00   : > { %v4656_v3 = vrot.slane %v4642_v34, %v7176_v37 }
 0xa01   : > { %v4672_v36 = vrot.slane %v4665_v60, %v7176_v37 }
 0xa02   : > { %v4657_v0 = vcombine.low %v4649_v47, %v4656_v3 }
 0xa04   : > { %v4675_v52 = vpack.c.bf16 %v4672_v36, %v4657_v0 }
 0xa06   : > { %5821 = vmatmul.mubr.msk.bf16.vlgmr.msra.gmra.mxu0 %vm1664_vm8, %v4675_v52 }
 0xac6   : > { %v4731_v62 = vpop.f32.mrf.mxu0 }
 0xac7   : > { %v4732_v4 = vadd.f32 %v5701_v44, %v4731_v62 }
 0xac8   : > { %v5822_v45 = vpop.f32.mrf.mxu0 }
 0xac9   : > { %v4738_v51 = vmul.f32 %v4732_v4, %v4732_v4 }
 0xaca   : > { %v4734_v46 = vpop.f32.mrf.mxu0 }
 0xacb   : > { %v4740_v31 = vmul.f32 %v4738_v51, %v4732_v4  ;;  %v4735_v48 = vadd.f32 %v5701_v44, %v4734_v46 }
 0xacc   : > { %v5823_v32 = vpop.f32.mrf.mxu0 }
 0xacd   : > { %v4742_v61 = vmul.f32 0.044715, %v4740_v31  ;;  %v4739_v56 = vmul.f32 %v4735_v48, %v4735_v48 }
 0xacf   : > { %v4744_v27 = vadd.f32 %v4742_v61, %v4732_v4  ;;  %v4741_v49 = vmul.f32 %v4739_v56, %v4735_v48 }
 0xad1   : > { %v4746_v15 = vmul.f32 0.7978846, %v4744_v27  ;;  %v4743_v1 = vmul.f32 0.044715, %v4741_v49 }
 0xad3   : > { %6086 = vtanh.f32 %v4746_v15  ;;  %v4745_v26 = vadd.f32 %v4743_v1, %v4735_v48 }
 0xad5   : > { %v4747_v5 = vmul.f32 0.7978846, %v4745_v26 }
 0xad7   : > { %6088 = vtanh.f32 %v4747_v5 }
 0xae0   : > { %v6087_v10 = vpop.eup %6086 }
 0xae1   : > { %v4750_v25 = vadd.f32 1.0, %v6087_v10 }
 0xae3   : > { %v4752_v40 = vmul.f32 0.5, %v4750_v25 }
 0xae4   : > { %v6089_v22 = vpop.eup %6088 }
 0xae5   : > { %v4751_v55 = vadd.f32 1.0, %v6089_v22  ;;  %v4754_v28 = vmul.f32 %v4752_v40, %v4732_v4 }
 0xae7   : > { %v4753_v35 = vmul.f32 0.5, %v4751_v55 }
 0xae9   : > { %v4755_v39 = vmul.f32 %v4753_v35, %v4735_v48 }
 0xaeb   : > { %v4765_v21 = vpack.c.bf16 %v4755_v39, %v4754_v28 }
 0xaed   : > { %5833 = vmatmul.mubr.msk.bf16.vlgmr.msra.gmra.mxu1 %vm4796_vm3, %v4765_v21 }
 0xbad   : > { %v4834_v50 = vpop.f32.mrf.mxu1 }
 0xbae   : > { %v4835_v43 = vadd.f32 %v5705_v8, %v4834_v50 }
 0xbaf   : > { %v5834_v20 = vpop.f32.mrf.mxu1 }
 0xbb0   : > { %v4843_v38 = vcombine.high %v4835_v43, %v4835_v43  ;;  %v4850_v11 = vrot.slane %v4835_v43, %v7176_v37 }
 0xbb1   : > { %v4837_v23 = vpop.f32.mrf.mxu1 }
 0xbb2   : > { %v4857_v6 = vrot.slane %v4843_v38, %v7176_v37  ;;  %v4858_v13 = vcombine.high %v4850_v11, %v4850_v11  ;;  %v4866_v57 = vrot.slane %v4850_v11, %v7176_v37  ;;  %v4838_v19 = vadd.f32 %v5705_v8, %v4837_v23 }
 0xbb3   : > { %v5835_v18 = vpop.f32.mrf.mxu1 }
 0xbb4   : > { %v4859_v17 = vcombine.high %v4857_v6, %v4857_v6  ;;  %v4873_v53 = vrot.slane %v4857_v6, %v7176_v37  ;;  %v4880_v42 = vrot.slane %v4858_v13, %v7176_v37  ;;  %v4888_v63 = vcombine.high %v4866_v57, %v4866_v57 }
 0xbb5   : > { %v4924_v54 = vadd.f32 %v4866_v57, %v7803_v30  ;;  %v4898_v34 = vrot.slane %v4838_v19, %v7176_v37 }
 0xbb6   : > { %v4887_v47 = vrot.slane %v4859_v17, %v7176_v37  ;;  %v4889_v60 = vcombine.high %v4873_v53, %v4873_v53  ;;  %v4890_v3 = vcombine.high %v4880_v42, %v4880_v42  ;;  %v4925_v36 = vadd.f32 %v4880_v42, %v7808_v29 }
 0xbb7   : > { %v4926_v0 = vadd.f32 %v4888_v63, %v7811_v14  ;;  %v4928_v52 = vadd.f32 %v4873_v53, %v7814_v7  ;;  %v4899_v9 = vcombine.high %v4898_v34, %v4898_v34  ;;  %v4906_v16 = vrot.slane %v4898_v34, %v7176_v37  ;;  %v8272_v7 = vld [vmem:[#allocation46_spill] sm:$0xff] }
 0xbb8   : > { %v4891_v41 = vcombine.high %v4887_v47, %v4887_v47  ;;  %v4927_v58 = vadd.f32 %v4890_v3, %v7818_v2  ;;  %v4929_v30 = vadd.f32 %v4887_v47, %v7821_v33  ;;  %v4930_v44 = vadd.f32 %v4889_v60, %v7824_v24 }
 0xbb9   : > { %v4944_v62 = vcombine.low %v4924_v54, %v4925_v36  ;;  %v4913_v4 = vrot.slane %v4899_v9, %v7176_v37  ;;  %v4932_v14 = vadd.f32 %v4906_v16, %v7828_v12  ;;  %v4966_v2 = vrot.slane %v4928_v52, %v7176_v37 }
 0xbba   : > { %v4945_v45 = vcombine.low %v4926_v0, %v4927_v58  ;;  %v4983_v51 = vcombine.low %v4929_v30, %v4930_v44  ;;  %v4931_v29 = vadd.f32 %v4891_v41, %v7835_v59 }
 0xbbb   : > { %v4933_v46 = vadd.f32 %v4913_v4, %v8272_v7  ;;  %v4952_v31 = vrot.slane %v4944_v62, %v7176_v37  ;;  %v4981_v12 = vrot.slane %v4966_v2, %v7176_v37 }
 0xbbc   : > { %v4959_v48 = vrot.slane %v4945_v45, %v7176_v37  ;;  %v4984_v33 = vcombine.low %v4931_v29, %v4932_v14  ;;  %v4991_v24 = vrot.slane %v4983_v51, %v7176_v37 }
 0xbbd   : > { %v5005_v56 = vrot.slane %v4933_v46, %v7176_v37 }
 0xbbe   : > { %v4967_v32 = vcombine.low %v4952_v31, %v4959_v48  ;;  %v4998_v61 = vrot.slane %v4984_v33, %v7176_v37 }
 0xbbf   : > { %v5020_v1 = vrot.slane %v5005_v56, %v7176_v37 }
 0xbc0   : > { %v4974_v59 = vrot.slane %v4967_v32, %v7176_v37  ;;  %v5006_v27 = vcombine.low %v4991_v24, %v4998_v61 }
 0xbc2   : > { %v4982_v49 = vcombine.low %v4974_v59, %v4981_v12  ;;  %v5013_v15 = vrot.slane %v5006_v27, %v7176_v37  ;;  %5030 = sbr.rel (%p5711_p13) target bundleno = 3236 (0xca4), region = 164 }
 0xbc4   : > { %5025 = vst.msk [vmem:[#allocation2] sm:$0x1f] %vm5024_vm4, %v4982_v49  ;;  %v5021_v26 = vcombine.low %v5013_v15, %v5020_v1 }
 0xbc6   : > { %5026 = vst.msk [vmem:[#allocation2 + $0x8] sm:$0x1f] %vm5024_vm4, %v5021_v26 }
 0xbc7   : > { %v8274_v5 = vld [vmem:[#allocation54_spill] sm:$0xff]  ;;  %v8275_v25 = vld [vmem:[#allocation55_spill] sm:$0xff]  ;;  %v6607_v37 = vmov 0.0   ;;  %v5035_v35 = vsel %vm5024_vm4, %v4982_v49, 0.0  ;;  %v5042_v28 = vsel %vm5024_vm4, %v5021_v26, 0.0  ;;  %vm6608_vm5 = vmmov 0  }
 0xbc8   : > { %v5031_v10 = vsel %vm3658_vm2, %v8274_v5, 0.0  ;;  %v5032_v22 = vsel %vm3658_vm2, %v8275_v25, 0.0  ;;  %v6090_v40 = vld [vmem:[%s7153_s16 + $0x8] sm:$0xff]   ;;  %5836 = vmatprep.subr.bf16.mxu0 %v6607_v37  ;;  %v6091_v55 = vld [vmem:[%s7153_s16] sm:$0xff]   ;;  %5840 = vmatprep.mubr.msk.bf16.mxu0 %vm6608_vm5, %v6607_v37  ;;  %v5036_v39 = vrot.slane %v5035_v35, 4  ;;  %v5043_v21 = vrot.slane %v5042_v28, 4 }
 0xbc9   : > { %5033 = vst [vmem:[%s7158_s29] sm:$0x1f] %v5031_v10  ;;  %5034 = vst [vmem:[%s7158_s29 + $0x8] sm:$0x1f] %v5032_v22  ;;  %5837 = vmatpush3.bf16.msra.mxu0 %v6090_v40  ;;  %vm5069_vm6 = vcmask 1041409   ;;  %s8276_s29 = scalar_lea.vmem [#allocation22], %s7056_s17  ;;  %vm5127_vm7 = vcmask 17408  }
 0xbca   : > { %5838 = vmatprep.subr.bf16.mxu0 %v6607_v37  ;;  %v5037_v8 = vadd.f32 %v5036_v39, %v5035_v35  ;;  %v5044_v50 = vadd.f32 %v5043_v21, %v5042_v28  ;;  %v5712_v47 = vld [vmem:[%s8276_s29] ss:$0 sm:$0xff] }
 0xbcc   : > { %v5038_v43 = vrot.slane %v5037_v8, 2  ;;  %v5045_v20 = vrot.slane %v5044_v50, 2 }
 0xbcd   : > { %5839 = vmatpush3.bf16.msra.mxu0 %v6091_v55 }
 0xbce   : > { %v5039_v38 = vadd.f32 %v5038_v43, %v5037_v8  ;;  %v5046_v11 = vadd.f32 %v5045_v20, %v5044_v50 }
 0xbd0   : > { %v5040_v23 = vrot.slane %v5039_v38, 1  ;;  %v5047_v6 = vrot.slane %v5046_v11, 1 }
 0xbd2   : > { %v5041_v13 = vadd.f32 %v5040_v23, %v5039_v38  ;;  %v5048_v57 = vadd.f32 %v5047_v6, %v5046_v11 }
 0xbd4   : > { %v5050_v19 = vmul.f32 0.2, %v5041_v13  ;;  %v5051_v18 = vmul.f32 0.2, %v5048_v57 }
 0xbd6   : > { %v5057_v17 = vpack.c.bf16 %v5050_v19, %v5050_v19  ;;  %v5058_v53 = vpack.c.bf16 %v5051_v18, %v5051_v18 }
 0xbd8   : > { %v5067_v42 = vunpack.c.l.b16 %v5057_v17  ;;  %v5068_v63 = vunpack.c.l.b16 %v5058_v53 }
 0xbda   : > { %v5070_v54 = vsel %vm5069_vm6, %v5068_v63, %v5067_v42 }
 0xbdb   : > { %v5071_v34 = vpack.c.b16 %v5070_v54, %v5070_v54 }
 0xbdd   : > { %5841 = vmatmul.mubr.msk.bf16.vlgmr.msra.gmra.mxu0 %vm1664_vm8, %v5071_v34 }
 0xc9d   : > { %v5121_v60 = vpop.f32.mrf.mxu0 }
 0xc9e   : > { %v5122_v3 = vadd.f32 %v5712_v47, %v5121_v60 }
 0xc9f   : > { %v5842_v36 = vpop.f32.mrf.mxu0 }
 0xca0   : > { %5128 = vst.msk [vmem:[%s7163_s20] sm:$0x3] %vm5127_vm7, %v5122_v3 }
 0xca1   : > { %v5124_v0 = vpop.f32.mrf.mxu0 }
 0xca3   : > { %v5843_v52 = vpop.f32.mrf.mxu0 }
 0xca4 PF: > { %s52_s6 = sadd.s32 1, %s6576_s6   ;;  %s8277_s3 = sld [smem:[#allocation32_spill]] }
 0xca5   : > { %p49_p3 = scmp.ge.s32.totalorder %s52_s6, 8   ;;  %s8278_s28 = sld [smem:[#allocation33_spill]] }
 0xca6   : > { %s8279_s29 = sld [smem:[#allocation43_spill]] }
 0xca7   : > { %s8280_s30 = sld [smem:[#allocation34_spill]] }
 0xca8   : > { %s8281_s4 = sld [smem:[#allocation35_spill]] }
 0xca9   : > { %s8282_s0 = sld [smem:[#allocation42_spill]]  ;;  %51 = sbr.rel (!%p49_p3) target bundleno = 42 (0x2a), region = 324 }
 0xcaa   : > { %s8283_s23 = sld [smem:[#allocation38_spill]] }
 0xcab   : > { %s8284_s1 = sld [smem:[#allocation39_spill]] }
 0xcac   : > { %s8285_s5 = sld [smem:[#allocation40_spill]] }
 0xcad   : > { %s8286_s24 = sld [smem:[#allocation41_spill]] }
 0xcae   :  { %5164 = vsyncpa [#allocation4], 1 }
 0xcaf   :  { %5166 = vsyncpa [#allocation4 + $0x1], 1 }
 0xcb0   :  { %5167 = vsyncpa [#allocation6], 1 }
 0xcb1   :  { %5169 = vsyncpa [#allocation6 + $0x1], 1 }
 0xcb2   :  { %5170 = vsyncpa [#allocation9], 1 }
 0xcb3   :  { %5172 = vsyncpa [#allocation9 + $0x1], 1 }
 0xcb4   :  { %5173 = vsyncpa [#allocation12], 1 }
 0xcb5   :  { %5175 = vsyncpa [#allocation12 + $0x1], 1 }
 0xcb6   :  { %5176 = vsyncpa [#allocation15], 1 }
 0xcb7   :  { %5178 = vsyncpa [#allocation15 + $0x1], 1 }
 0xcb8   :  { %5179 = vsyncpa [#allocation18], 1 }
 0xcb9   :  { %5181 = vsyncpa [#allocation18 + $0x1], 1 }
 0xcba   :  { %5182 = vsyncpa [#allocation21], 1 }
 0xcbb   :  { %5184 = vsyncpa [#allocation21 + $0x1], 1 }

</bundles_post_ra>
